<compile_context>
chip_gen: v6e
topology: v6e:2x2x1
jax: 0.10.0
libtpu: 0.0.40
codegen_flags: <defaults>
</compile_context>

<pallas_src>
import math
import functools

import jax
import jax.numpy as jnp
from jax.experimental import pallas as pl
from jax.experimental.pallas import tpu as pltpu

NEG_INF = -1e30   # stand-in for -inf in additive attention masks (avoids NaN)
LN_EPS = 1e-5     # PyTorch LayerNorm default


# ----------------------------------------------------------------------------
# In-kernel helpers (traced inside the Pallas kernels)
# ----------------------------------------------------------------------------
def _layer_norm(x, gamma, beta, eps):
    """x: (M, D) f32, gamma/beta: (1, D) f32."""
    mu = jnp.mean(x, axis=-1, keepdims=True)
    var = jnp.mean(jnp.square(x - mu), axis=-1, keepdims=True)
    return (x - mu) * jax.lax.rsqrt(var + eps) * gamma + beta


def _attention_heads(q, k, v, add_mask, wo, bo, *, H, Dh):
    """Scaled-dot-product attention for one batch element, all data in vregs.

    q: (Lq, H*Dh) f32 (already scaled by 1/sqrt(Dh), bias included)
    k, v: (Lk, H*Dh) f32
    add_mask: additive f32 mask broadcastable against (Lq, Lk)
    wo: (H*Dh, D) bf16, bo: (1, D) f32
    returns (Lq, D) f32
    """
    # TODO(synk): heads are processed in a short static loop because Mosaic's
    # dot_general lowering does not take the multi-batch-dim (b,h) einsum;
    # the output projection below is a single K=H*Dh matmul on the
    # concatenated context (no per-head K=Dh accumulation).
    ctx = []
    for h in range(H):
        sl = slice(h * Dh, (h + 1) * Dh)
        qh = q[:, sl].astype(jnp.bfloat16)
        kh = k[:, sl].astype(jnp.bfloat16)
        vh = v[:, sl].astype(jnp.bfloat16)
        s = jax.lax.dot_general(qh, kh, (((1,), (1,)), ((), ())),
                                preferred_element_type=jnp.float32)   # (Lq, Lk)
        s = s + add_mask
        p = jnp.exp(s - jnp.max(s, axis=-1, keepdims=True))
        p = p / jnp.sum(p, axis=-1, keepdims=True)        # exact normalization
        ctx.append(jnp.dot(p.astype(jnp.bfloat16), vh,
                           preferred_element_type=jnp.float32))        # (Lq, Dh)
    context = jnp.concatenate(ctx, axis=-1)                            # (Lq, H*Dh)
    return jnp.dot(context.astype(jnp.bfloat16), wo,
                   preferred_element_type=jnp.float32) + bo


# ----------------------------------------------------------------------------
# Fused encoder stack kernel: grid = (B, n_layers)
# ----------------------------------------------------------------------------
def _encoder_stack_kernel(
    x_ref, kpm_ref,
    wq_ref, wk_ref, wv_ref, bq_ref, bk_ref, bv_ref, wo_ref, bo_ref,
    w1_ref, b1_ref, w2_ref, b2_ref,
    ln1_g_ref, ln1_b_ref, ln2_g_ref, ln2_b_ref,
    fin_g_ref, fin_b_ref,
    o_ref,
    act_ref,
    *, nhead, eps,
):
    layer = pl.program_id(1)
    n_layers = pl.num_programs(1)
    _, L, D = x_ref.shape
    H = nhead
    Dh = D // H
    scale = 1.0 / math.sqrt(Dh)

    @pl.when(layer == 0)
    def _():
        act_ref[...] = x_ref[0]          # load activation into VMEM once

    x = act_ref[...]                     # (L, D) f32, resident across layers
    xb = x.astype(jnp.bfloat16)

    # three lane-aligned projections (bf16 MXU operands, f32 accumulation)
    q = (jnp.dot(xb, wq_ref[0], preferred_element_type=jnp.float32)
         + bq_ref[0]) * scale
    k = jnp.dot(xb, wk_ref[0], preferred_element_type=jnp.float32) + bk_ref[0]
    v = jnp.dot(xb, wv_ref[0], preferred_element_type=jnp.float32) + bv_ref[0]

    attn = _attention_heads(q, k, v, kpm_ref[0], wo_ref[0], bo_ref[0],
                            H=H, Dh=Dh)
    h1 = _layer_norm(x + attn, ln1_g_ref[0], ln1_b_ref[0], eps)

    ff = jnp.dot(h1.astype(jnp.bfloat16), w1_ref[0],
                 preferred_element_type=jnp.float32) + b1_ref[0]
    ff = jnp.maximum(ff, 0.0)
    ff = jnp.dot(ff.astype(jnp.bfloat16), w2_ref[0],
                 preferred_element_type=jnp.float32) + b2_ref[0]
    h2 = _layer_norm(h1 + ff, ln2_g_ref[0], ln2_b_ref[0], eps)

    act_ref[...] = h2

    @pl.when(layer == n_layers - 1)
    def _():
        # fused final encoder LayerNorm; single HBM writeback per batch block
        y = _layer_norm(h2, fin_g_ref[...], fin_b_ref[...], eps)
        o_ref[...] = y[None].astype(o_ref.dtype)


# ----------------------------------------------------------------------------
# Fused decoder stack kernel: grid = (B, n_layers)
# ----------------------------------------------------------------------------
def _decoder_stack_kernel(
    x_ref, mem_ref, tgt_kpm_ref, src_kpm_ref,
    s_wq_ref, s_wk_ref, s_wv_ref, s_bq_ref, s_bk_ref, s_bv_ref, s_wo_ref, s_bo_ref,
    c_wq_ref, c_wk_ref, c_wv_ref, c_bq_ref, c_bk_ref, c_bv_ref, c_wo_ref, c_bo_ref,
    w1_ref, b1_ref, w2_ref, b2_ref,
    ln1_g_ref, ln1_b_ref, ln2_g_ref, ln2_b_ref, ln3_g_ref, ln3_b_ref,
    o_ref,
    act_ref,
    *, nhead, eps,
):
    layer = pl.program_id(1)
    n_layers = pl.num_programs(1)
    _, Lt, D = x_ref.shape
    H = nhead
    Dh = D // H
    scale = 1.0 / math.sqrt(Dh)

    @pl.when(layer == 0)
    def _():
        act_ref[...] = x_ref[0]

    # causal mask generated in-kernel (no (Lt, Lt) HBM array per layer)
    rows = jax.lax.broadcasted_iota(jnp.int32, (Lt, Lt), 0)
    cols = jax.lax.broadcasted_iota(jnp.int32, (Lt, Lt), 1)
    self_mask = (jnp.where(cols > rows, NEG_INF, 0.0).astype(jnp.float32)
                 + tgt_kpm_ref[0])                           # (Lt, Lt)

    x = act_ref[...]
    xb = x.astype(jnp.bfloat16)

    # ---- masked causal self-attention ----
    q = (jnp.dot(xb, s_wq_ref[0], preferred_element_type=jnp.float32)
         + s_bq_ref[0]) * scale
    k = jnp.dot(xb, s_wk_ref[0], preferred_element_type=jnp.float32) + s_bk_ref[0]
    v = jnp.dot(xb, s_wv_ref[0], preferred_element_type=jnp.float32) + s_bv_ref[0]
    attn = _attention_heads(q, k, v, self_mask, s_wo_ref[0], s_bo_ref[0],
                            H=H, Dh=Dh)
    h1 = _layer_norm(x + attn, ln1_g_ref[0], ln1_b_ref[0], eps)

    # ---- cross-attention over the encoder memory ----
    memb = mem_ref[0].astype(jnp.bfloat16)
    q = (jnp.dot(h1.astype(jnp.bfloat16), c_wq_ref[0],
                 preferred_element_type=jnp.float32) + c_bq_ref[0]) * scale
    k = jnp.dot(memb, c_wk_ref[0], preferred_element_type=jnp.float32) + c_bk_ref[0]
    v = jnp.dot(memb, c_wv_ref[0], preferred_element_type=jnp.float32) + c_bv_ref[0]
    attn2 = _attention_heads(q, k, v, src_kpm_ref[0], c_wo_ref[0], c_bo_ref[0],
                             H=H, Dh=Dh)
    h2 = _layer_norm(h1 + attn2, ln2_g_ref[0], ln2_b_ref[0], eps)

    # ---- feed-forward ----
    ff = jnp.dot(h2.astype(jnp.bfloat16), w1_ref[0],
                 preferred_element_type=jnp.float32) + b1_ref[0]
    ff = jnp.maximum(ff, 0.0)
    ff = jnp.dot(ff.astype(jnp.bfloat16), w2_ref[0],
                 preferred_element_type=jnp.float32) + b2_ref[0]
    h3 = _layer_norm(h2 + ff, ln3_g_ref[0], ln3_b_ref[0], eps)

    act_ref[...] = h3

    @pl.when(layer == n_layers - 1)
    def _():
        o_ref[...] = h3[None].astype(o_ref.dtype)


# ----------------------------------------------------------------------------
# Fused final decoder LayerNorm + generator (lane-padded vocab)
# ----------------------------------------------------------------------------
def _generator_kernel(x_ref, g_ref, b_ref, w_ref, bias_ref, o_ref, *, eps):
    x = x_ref[0]                                         # (L, D)
    h = _layer_norm(x, g_ref[...], b_ref[...], eps)
    y = jnp.dot(h.astype(jnp.bfloat16), w_ref[...],
                preferred_element_type=jnp.float32) + bias_ref[...]
    o_ref[...] = y[None].astype(o_ref.dtype)             # lane-dense (Vp=128k)


# ----------------------------------------------------------------------------
# pallas_call wrappers
# ----------------------------------------------------------------------------
def _spec_helpers(n_grid_axes):
    """BlockSpec factories for a (batch, layer) grid."""
    def per_layer(*shape):
        return pl.BlockSpec((1,) + shape, lambda b, l: (l,) + (0,) * len(shape))

    def per_batch(*shape):
        return pl.BlockSpec((1,) + shape, lambda b, l: (b,) + (0,) * len(shape))

    def shared(*shape):
        return pl.BlockSpec(shape, lambda b, l: (0,) * len(shape))

    return per_layer, per_batch, shared


def encoder_stack(x, src_kpm, p, fin_g, fin_b, *, nhead):
    B, L, D = x.shape
    n_layers, _, d_ff = p["w1"].shape
    per_layer, per_batch, shared = _spec_helpers(2)
    kernel = functools.partial(_encoder_stack_kernel, nhead=nhead, eps=LN_EPS)
    return pl.pallas_call(
        kernel,
        out_shape=jax.ShapeDtypeStruct((B, L, D), jnp.float32),
        grid_spec=pltpu.PrefetchScalarGridSpec(
            num_scalar_prefetch=0,
            grid=(B, n_layers),
            in_specs=[
                per_batch(L, D),                          # x
                per_batch(1, L),                          # additive key-pad mask
                per_layer(D, D), per_layer(D, D), per_layer(D, D),   # wq wk wv
                per_layer(1, D), per_layer(1, D), per_layer(1, D),   # bq bk bv
                per_layer(D, D), per_layer(1, D),                    # wo bo
                per_layer(D, d_ff), per_layer(1, d_ff),              # w1 b1
                per_layer(d_ff, D), per_layer(1, D),                 # w2 b2
                per_layer(1, D), per_layer(1, D),                    # ln1 g/b
                per_layer(1, D), per_layer(1, D),                    # ln2 g/b
                shared(1, D), shared(1, D),                          # final norm
            ],
            out_specs=per_batch(L, D),
            scratch_shapes=[pltpu.VMEM((L, D), jnp.float32)],
        ),
        compiler_params=pltpu.CompilerParams(
            dimension_semantics=("parallel", "arbitrary")),
    )(x, src_kpm,
      p["wq"], p["wk"], p["wv"], p["bq"], p["bk"], p["bv"], p["wo"], p["bo"],
      p["w1"], p["b1"], p["w2"], p["b2"],
      p["ln1_g"], p["ln1_b"], p["ln2_g"], p["ln2_b"],
      fin_g, fin_b)


def decoder_stack(x, mem, tgt_kpm, src_kpm, p, *, nhead):
    B, Lt, D = x.shape
    Ls = mem.shape[1]
    n_layers, _, d_ff = p["w1"].shape
    per_layer, per_batch, shared = _spec_helpers(2)
    kernel = functools.partial(_decoder_stack_kernel, nhead=nhead, eps=LN_EPS)
    return pl.pallas_call(
        kernel,
        out_shape=jax.ShapeDtypeStruct((B, Lt, D), jnp.float32),
        grid_spec=pltpu.PrefetchScalarGridSpec(
            num_scalar_prefetch=0,
            grid=(B, n_layers),
            in_specs=[
                per_batch(Lt, D),                         # tgt activation
                per_batch(Ls, D),                         # encoder memory
                per_batch(1, Lt),                         # tgt key-pad mask
                per_batch(1, Ls),                         # src key-pad mask
                per_layer(D, D), per_layer(D, D), per_layer(D, D),   # self wq wk wv
                per_layer(1, D), per_layer(1, D), per_layer(1, D),   # self bq bk bv
                per_layer(D, D), per_layer(1, D),                    # self wo bo
                per_layer(D, D), per_layer(D, D), per_layer(D, D),   # cross wq wk wv
                per_layer(1, D), per_layer(1, D), per_layer(1, D),   # cross bq bk bv
                per_layer(D, D), per_layer(1, D),                    # cross wo bo
                per_layer(D, d_ff), per_layer(1, d_ff),              # w1 b1
                per_layer(d_ff, D), per_layer(1, D),                 # w2 b2
                per_layer(1, D), per_layer(1, D),                    # ln1 g/b
                per_layer(1, D), per_layer(1, D),                    # ln2 g/b
                per_layer(1, D), per_layer(1, D),                    # ln3 g/b
            ],
            out_specs=per_batch(Lt, D),
            scratch_shapes=[pltpu.VMEM((Lt, D), jnp.float32)],
        ),
        compiler_params=pltpu.CompilerParams(
            dimension_semantics=("parallel", "arbitrary")),
    )(x, mem, tgt_kpm, src_kpm,
      p["s_wq"], p["s_wk"], p["s_wv"], p["s_bq"], p["s_bk"], p["s_bv"],
      p["s_wo"], p["s_bo"],
      p["c_wq"], p["c_wk"], p["c_wv"], p["c_bq"], p["c_bk"], p["c_bv"],
      p["c_wo"], p["c_bo"],
      p["w1"], p["b1"], p["w2"], p["b2"],
      p["ln1_g"], p["ln1_b"], p["ln2_g"], p["ln2_b"], p["ln3_g"], p["ln3_b"])


def generator(x, g, b, w, bias):
    B, L, D = x.shape
    Vp = w.shape[1]
    kernel = functools.partial(_generator_kernel, eps=LN_EPS)
    return pl.pallas_call(
        kernel,
        out_shape=jax.ShapeDtypeStruct((B, L, Vp), jnp.float32),
        grid_spec=pltpu.PrefetchScalarGridSpec(
            num_scalar_prefetch=0,
            grid=(B,),
            in_specs=[
                pl.BlockSpec((1, L, D), lambda bi: (bi, 0, 0)),
                pl.BlockSpec((1, D), lambda bi: (0, 0)),
                pl.BlockSpec((1, D), lambda bi: (0, 0)),
                pl.BlockSpec((D, Vp), lambda bi: (0, 0)),
                pl.BlockSpec((1, Vp), lambda bi: (0, 0)),
            ],
            out_specs=pl.BlockSpec((1, L, Vp), lambda bi: (bi, 0, 0)),
        ),
        compiler_params=pltpu.CompilerParams(dimension_semantics=("parallel",)),
    )(x, g, b, w, bias)


# ----------------------------------------------------------------------------
# Full forward (orchestration in JAX, compute in 3 fused Pallas kernels)
# ----------------------------------------------------------------------------
def mini_transformer_forward(params, src, tgt, *, nhead, d_model, pad_idx, vocab):
    """src: (B, Ls) int32, tgt: (B, Lt) int32 -> logits (B, Lt, vocab)."""
    B, Ls = src.shape
    Lt = tgt.shape[1]
    sqrt_d = math.sqrt(d_model)
    pe = params["pe"]

    # embeddings * sqrt(d_model) + positional encoding
    src_emb = jnp.take(params["src_emb"], src, axis=0) * sqrt_d + pe[:Ls][None]
    tgt_emb = jnp.take(params["tgt_emb"], tgt, axis=0) * sqrt_d + pe[:Lt][None]

    # compact additive key-padding masks (broadcast inside the kernels)
    src_kpm = jnp.where(src == pad_idx, NEG_INF, 0.0).astype(jnp.float32)[:, None, :]
    tgt_kpm = jnp.where(tgt == pad_idx, NEG_INF, 0.0).astype(jnp.float32)[:, None, :]

    # whole encoder stack = ONE pallas_call (final encoder LayerNorm fused in)
    mem = encoder_stack(src_emb, src_kpm, params["enc"],
                        params["enc_norm_g"], params["enc_norm_b"], nhead=nhead)

    # whole decoder stack = ONE pallas_call
    out = decoder_stack(tgt_emb, mem, tgt_kpm, src_kpm, params["dec"], nhead=nhead)

    # fused final decoder LayerNorm + generator (lane-padded vocab, sliced back)
    logits = generator(out, params["dec_norm_g"], params["dec_norm_b"],
                       params["gen_w"], params["gen_b"])
    return logits[:, :, :vocab]


# ----------------------------------------------------------------------------
# Deterministic parameter initialization (stacked, kernel-friendly layout)
# ----------------------------------------------------------------------------
def init_params(seed, vocab, d_model, nhead, n_enc, n_dec, d_ff, max_len, pad_idx):
    base = jax.random.PRNGKey(seed)
    counter = iter(range(1_000_000))
    vpad = ((vocab + 127) // 128) * 128       # lane-dense generator output

    def nk():
        return jax.random.fold_in(base, next(counter))

    def dense(shape):
        return (0.02 * jax.random.normal(nk(), shape)).astype(jnp.float32)

    def wstack(n, shape):                      # stacked bf16 weights
        return jnp.stack([dense(shape) for _ in range(n)]).astype(jnp.bfloat16)

    def zstack(n, cols):
        return jnp.zeros((n, 1, cols), jnp.float32)

    def ostack(n, cols):
        return jnp.ones((n, 1, cols), jnp.float32)

    enc = dict(
        wq=wstack(n_enc, (d_model, d_model)),
        wk=wstack(n_enc, (d_model, d_model)),
        wv=wstack(n_enc, (d_model, d_model)),
        bq=zstack(n_enc, d_model), bk=zstack(n_enc, d_model), bv=zstack(n_enc, d_model),
        wo=wstack(n_enc, (d_model, d_model)), bo=zstack(n_enc, d_model),
        w1=wstack(n_enc, (d_model, d_ff)), b1=zstack(n_enc, d_ff),
        w2=wstack(n_enc, (d_ff, d_model)), b2=zstack(n_enc, d_model),
        ln1_g=ostack(n_enc, d_model), ln1_b=zstack(n_enc, d_model),
        ln2_g=ostack(n_enc, d_model), ln2_b=zstack(n_enc, d_model),
    )
    dec = dict(
        s_wq=wstack(n_dec, (d_model, d_model)),
        s_wk=wstack(n_dec, (d_model, d_model)),
        s_wv=wstack(n_dec, (d_model, d_model)),
        s_bq=zstack(n_dec, d_model), s_bk=zstack(n_dec, d_model), s_bv=zstack(n_dec, d_model),
        s_wo=wstack(n_dec, (d_model, d_model)), s_bo=zstack(n_dec, d_model),
        c_wq=wstack(n_dec, (d_model, d_model)),
        c_wk=wstack(n_dec, (d_model, d_model)),
        c_wv=wstack(n_dec, (d_model, d_model)),
        c_bq=zstack(n_dec, d_model), c_bk=zstack(n_dec, d_model), c_bv=zstack(n_dec, d_model),
        c_wo=wstack(n_dec, (d_model, d_model)), c_bo=zstack(n_dec, d_model),
        w1=wstack(n_dec, (d_model, d_ff)), b1=zstack(n_dec, d_ff),
        w2=wstack(n_dec, (d_ff, d_model)), b2=zstack(n_dec, d_model),
        ln1_g=ostack(n_dec, d_model), ln1_b=zstack(n_dec, d_model),
        ln2_g=ostack(n_dec, d_model), ln2_b=zstack(n_dec, d_model),
        ln3_g=ostack(n_dec, d_model), ln3_b=zstack(n_dec, d_model),
    )

    # embedding tables with padding row zeroed (padding_idx semantics)
    src_emb = dense((vocab, d_model)).at[pad_idx].set(0.0)
    tgt_emb = dense((vocab, d_model)).at[pad_idx].set(0.0)

    # sinusoidal positional encoding
    position = jnp.arange(max_len, dtype=jnp.float32)[:, None]
    div_term = jnp.exp(jnp.arange(0, d_model, 2, dtype=jnp.float32)
                       * (-math.log(10000.0) / d_model))
    pe = jnp.zeros((max_len, d_model), jnp.float32)
    pe = pe.at[:, 0::2].set(jnp.sin(position * div_term))
    pe = pe.at[:, 1::2].set(jnp.cos(position * div_term))

    gen_w = jnp.pad(dense((d_model, vocab)),
                    ((0, 0), (0, vpad - vocab))).astype(jnp.bfloat16)
    gen_b = jnp.zeros((1, vpad), jnp.float32)

    return dict(
        src_emb=src_emb, tgt_emb=tgt_emb, pe=pe,
        enc=enc, dec=dec,
        enc_norm_g=jnp.ones((1, d_model), jnp.float32),
        enc_norm_b=jnp.zeros((1, d_model), jnp.float32),
        dec_norm_g=jnp.ones((1, d_model), jnp.float32),
        dec_norm_b=jnp.zeros((1, d_model), jnp.float32),
        gen_w=gen_w, gen_b=gen_b,
    )


# ----------------------------------------------------------------------------
if __name__ == "__main__":
    # small config consistent with the module's constructor
    VOCAB = 50
    D_MODEL = 32
    NHEAD = 4
    N_ENC = 2
    N_DEC = 2
    D_FF = 64
    MAX_LEN = 64
    PAD_IDX = 0
    B, SRC_LEN, TGT_LEN = 2, 8, 8

    params = init_params(0, VOCAB, D_MODEL, NHEAD, N_ENC, N_DEC, D_FF, MAX_LEN, PAD_IDX)

    key = jax.random.PRNGKey(0)
    k_src, k_tgt = jax.random.split(key)
    src = jax.random.randint(k_src, (B, SRC_LEN), 1, VOCAB, dtype=jnp.int32)
    tgt = jax.random.randint(k_tgt, (B, TGT_LEN), 1, VOCAB, dtype=jnp.int32)
    # inject a couple of pad tokens to exercise the key-padding masks
    src = src.at[0, -1].set(PAD_IDX)
    tgt = tgt.at[1, -1].set(PAD_IDX)

    fwd = jax.jit(
        functools.partial(
            mini_transformer_forward,
            nhead=NHEAD, d_model=D_MODEL, pad_idx=PAD_IDX, vocab=VOCAB,
        )
    )
    logits = fwd(params, src, tgt)
    jax.block_until_ready(logits)

    assert logits.shape == (B, TGT_LEN, VOCAB), logits.shape
    assert bool(jnp.all(jnp.isfinite(logits)))
    print("KERNEL_OK")
</pallas_src>

<mosaic_0001>
module attributes {stable_mosaic.version = 11 : i64} {
  func.func @_generator_kernel(%arg0: i32, %arg1: memref<1x8x32xf32, #tpu.memory_space<vmem>>, %arg2: memref<1x32xf32, #tpu.memory_space<vmem>>, %arg3: memref<1x32xf32, #tpu.memory_space<vmem>>, %arg4: memref<32x128xbf16, #tpu.memory_space<vmem>>, %arg5: memref<1x128xf32, #tpu.memory_space<vmem>>, %arg6: memref<1x8x128xf32, #tpu.memory_space<vmem>>) attributes {dimension_semantics = [#tpu.dimension_semantics<parallel>], iteration_bounds = array<i64: 2>, scalar_prefetch = 0 : i64, scratch_operands = 0 : i64, tpu.core_type = #tpu.core_type<tc>, window_params = [{transform_indices = @transform_0, window_bounds = array<i64: 1, 8, 32>}, {pipeline_mode = #tpu.pipeline_mode<synchronous>, transform_indices = @transform_1, window_bounds = array<i64: 1, 32>}, {pipeline_mode = #tpu.pipeline_mode<synchronous>, transform_indices = @transform_2, window_bounds = array<i64: 1, 32>}, {pipeline_mode = #tpu.pipeline_mode<synchronous>, transform_indices = @transform_3, window_bounds = array<i64: 32, 128>}, {pipeline_mode = #tpu.pipeline_mode<synchronous>, transform_indices = @transform_4, window_bounds = array<i64: 1, 128>}, {transform_indices = @transform_5, window_bounds = array<i64: 1, 8, 128>}]} {
    %c0 = arith.constant 0 : index
    %c0_0 = arith.constant 0 : index
    %c0_1 = arith.constant 0 : index
    %0 = vector.load %arg1[%c0, %c0_0, %c0_1] : memref<1x8x32xf32, #tpu.memory_space<vmem>>, vector<1x8x32xf32>
    %1 = vector.shape_cast %0 : vector<1x8x32xf32> to vector<8x32xf32>
    %c0_2 = arith.constant 0 : index
    %c0_3 = arith.constant 0 : index
    %2 = vector.load %arg2[%c0_2, %c0_3] : memref<1x32xf32, #tpu.memory_space<vmem>>, vector<1x32xf32>
    %c0_4 = arith.constant 0 : index
    %c0_5 = arith.constant 0 : index
    %3 = vector.load %arg3[%c0_4, %c0_5] : memref<1x32xf32, #tpu.memory_space<vmem>>, vector<1x32xf32>
    %cst = arith.constant dense<0.000000e+00> : vector<8xf32>
    %4 = vector.multi_reduction <add>, %1, %cst [1] : vector<8x32xf32> to vector<8xf32>
    %5 = vector.shape_cast %4 : vector<8xf32> to vector<8x1xf32>
    %cst_6 = arith.constant 3.200000e+01 : f32
    %6 = vector.broadcast %cst_6 : f32 to vector<8x1xf32>
    %7 = arith.divf %5, %6 : vector<8x1xf32>
    %8 = vector.broadcast %7 : vector<8x1xf32> to vector<8x32xf32>
    %9 = arith.subf %1, %8 : vector<8x32xf32>
    %10 = arith.mulf %9, %9 : vector<8x32xf32>
    %cst_7 = arith.constant dense<0.000000e+00> : vector<8xf32>
    %11 = vector.multi_reduction <add>, %10, %cst_7 [1] : vector<8x32xf32> to vector<8xf32>
    %12 = vector.shape_cast %11 : vector<8xf32> to vector<8x1xf32>
    %cst_8 = arith.constant 3.200000e+01 : f32
    %13 = vector.broadcast %cst_8 : f32 to vector<8x1xf32>
    %14 = arith.divf %12, %13 : vector<8x1xf32>
    %15 = vector.broadcast %7 : vector<8x1xf32> to vector<8x32xf32>
    %16 = arith.subf %1, %15 : vector<8x32xf32>
    %cst_9 = arith.constant 9.99999974E-6 : f32
    %17 = vector.broadcast %cst_9 : f32 to vector<8x1xf32>
    %18 = arith.addf %14, %17 : vector<8x1xf32>
    %19 = math.rsqrt %18 : vector<8x1xf32>
    %20 = vector.broadcast %19 : vector<8x1xf32> to vector<8x32xf32>
    %21 = arith.mulf %16, %20 : vector<8x32xf32>
    %22 = vector.broadcast %2 : vector<1x32xf32> to vector<8x32xf32>
    %23 = arith.mulf %21, %22 : vector<8x32xf32>
    %24 = vector.broadcast %3 : vector<1x32xf32> to vector<8x32xf32>
    %25 = arith.addf %23, %24 : vector<8x32xf32>
    %26 = arith.truncf %25 : vector<8x32xf32> to vector<8x32xbf16>
    %c0_10 = arith.constant 0 : index
    %c0_11 = arith.constant 0 : index
    %27 = vector.load %arg4[%c0_10, %c0_11] : memref<32x128xbf16, #tpu.memory_space<vmem>>, vector<32x128xbf16>
    %cst_12 = arith.constant dense<0.000000e+00> : vector<8x128xf32>
    %28 = tpu.matmul %26, %27, %cst_12 {dimension_numbers = #tpu.dot_dimension_numbers<[1], [0], [0], [1], [0, 0, 1, 1], [], []>} : vector<8x32xbf16>, vector<32x128xbf16>, vector<8x128xf32> -> vector<8x128xf32>
    %c0_13 = arith.constant 0 : index
    %c0_14 = arith.constant 0 : index
    %29 = vector.load %arg5[%c0_13, %c0_14] : memref<1x128xf32, #tpu.memory_space<vmem>>, vector<1x128xf32>
    %30 = vector.broadcast %29 : vector<1x128xf32> to vector<8x128xf32>
    %31 = arith.addf %28, %30 : vector<8x128xf32>
    %32 = vector.shape_cast %31 : vector<8x128xf32> to vector<1x8x128xf32>
    %c0_15 = arith.constant 0 : index
    %c0_16 = arith.constant 0 : index
    %c0_17 = arith.constant 0 : index
    %33 = vector.load %arg6[%c0_15, %c0_16, %c0_17] : memref<1x8x128xf32, #tpu.memory_space<vmem>>, vector<1x8x128xf32>
    tpu.vector_store %arg6[%c0_15, %c0_16, %c0_17], %32 {strides = array<i32>} : memref<1x8x128xf32, #tpu.memory_space<vmem>>, vector<1x8x128xf32>,
    return
  }
  func.func @transform_0(%arg0: i32) -> (i32, i32, i32) {
    %c0_i32 = arith.constant 0 : i32
    %c0_i32_0 = arith.constant 0 : i32
    %c0_i32_1 = arith.constant 0 : i32
    return %arg0, %c0_i32, %c0_i32_0 : i32, i32, i32
  }
  func.func @transform_1(%arg0: i32) -> (i32, i32) {
    %c0_i32 = arith.constant 0 : i32
    %c0_i32_0 = arith.constant 0 : i32
    %c0_i32_1 = arith.constant 0 : i32
    return %c0_i32, %c0_i32_0 : i32, i32
  }
  func.func @transform_2(%arg0: i32) -> (i32, i32) {
    %c0_i32 = arith.constant 0 : i32
    %c0_i32_0 = arith.constant 0 : i32
    %c0_i32_1 = arith.constant 0 : i32
    return %c0_i32, %c0_i32_0 : i32, i32
  }
  func.func @transform_3(%arg0: i32) -> (i32, i32) {
    %c0_i32 = arith.constant 0 : i32
    %c0_i32_0 = arith.constant 0 : i32
    %c0_i32_1 = arith.constant 0 : i32
    return %c0_i32, %c0_i32_0 : i32, i32
  }
  func.func @transform_4(%arg0: i32) -> (i32, i32) {
    %c0_i32 = arith.constant 0 : i32
    %c0_i32_0 = arith.constant 0 : i32
    %c0_i32_1 = arith.constant 0 : i32
    return %c0_i32, %c0_i32_0 : i32, i32
  }
  func.func @transform_5(%arg0: i32) -> (i32, i32, i32) {
    %c0_i32 = arith.constant 0 : i32
    %c0_i32_0 = arith.constant 0 : i32
    %c0_i32_1 = arith.constant 0 : i32
    return %arg0, %c0_i32, %c0_i32_0 : i32, i32, i32
  }
}

module attributes {stable_mosaic.version = 11 : i64} {
  func.func @_encoder_stack_kernel(%arg0: i32, %arg1: i32, %arg2: memref<1x8x32xf32, #tpu.memory_space<vmem>>, %arg3: memref<1x1x8xf32, #tpu.memory_space<vmem>>, %arg4: memref<1x32x32xbf16, #tpu.memory_space<vmem>>, %arg5: memref<1x32x32xbf16, #tpu.memory_space<vmem>>, %arg6: memref<1x32x32xbf16, #tpu.memory_space<vmem>>, %arg7: memref<1x1x32xf32, #tpu.memory_space<vmem>>, %arg8: memref<1x1x32xf32, #tpu.memory_space<vmem>>, %arg9: memref<1x1x32xf32, #tpu.memory_space<vmem>>, %arg10: memref<1x32x32xbf16, #tpu.memory_space<vmem>>, %arg11: memref<1x1x32xf32, #tpu.memory_space<vmem>>, %arg12: memref<1x32x64xbf16, #tpu.memory_space<vmem>>, %arg13: memref<1x1x64xf32, #tpu.memory_space<vmem>>, %arg14: memref<1x64x32xbf16, #tpu.memory_space<vmem>>, %arg15: memref<1x1x32xf32, #tpu.memory_space<vmem>>, %arg16: memref<1x1x32xf32, #tpu.memory_space<vmem>>, %arg17: memref<1x1x32xf32, #tpu.memory_space<vmem>>, %arg18: memref<1x1x32xf32, #tpu.memory_space<vmem>>, %arg19: memref<1x1x32xf32, #tpu.memory_space<vmem>>, %arg20: memref<1x32xf32, #tpu.memory_space<vmem>>, %arg21: memref<1x32xf32, #tpu.memory_space<vmem>>, %arg22: memref<1x8x32xf32, #tpu.memory_space<vmem>>, %arg23: memref<8x32xf32, #tpu.memory_space<vmem>>) attributes {dimension_semantics = [#tpu.dimension_semantics<parallel>, #tpu.dimension_semantics<arbitrary>], iteration_bounds = array<i64: 2, 2>, scalar_prefetch = 0 : i64, scratch_operands = 1 : i64, tpu.core_type = #tpu.core_type<tc>, window_params = [{transform_indices = @transform_0, window_bounds = array<i64: 1, 8, 32>}, {transform_indices = @transform_1, window_bounds = array<i64: 1, 1, 8>}, {transform_indices = @transform_2, window_bounds = array<i64: 1, 32, 32>}, {transform_indices = @transform_3, window_bounds = array<i64: 1, 32, 32>}, {transform_indices = @transform_4, window_bounds = array<i64: 1, 32, 32>}, {transform_indices = @transform_5, window_bounds = array<i64: 1, 1, 32>}, {transform_indices = @transform_6, window_bounds = array<i64: 1, 1, 32>}, {transform_indices = @transform_7, window_bounds = array<i64: 1, 1, 32>}, {transform_indices = @transform_8, window_bounds = array<i64: 1, 32, 32>}, {transform_indices = @transform_9, window_bounds = array<i64: 1, 1, 32>}, {transform_indices = @transform_10, window_bounds = array<i64: 1, 32, 64>}, {transform_indices = @transform_11, window_bounds = array<i64: 1, 1, 64>}, {transform_indices = @transform_12, window_bounds = array<i64: 1, 64, 32>}, {transform_indices = @transform_13, window_bounds = array<i64: 1, 1, 32>}, {transform_indices = @transform_14, window_bounds = array<i64: 1, 1, 32>}, {transform_indices = @transform_15, window_bounds = array<i64: 1, 1, 32>}, {transform_indices = @transform_16, window_bounds = array<i64: 1, 1, 32>}, {transform_indices = @transform_17, window_bounds = array<i64: 1, 1, 32>}, {pipeline_mode = #tpu.pipeline_mode<synchronous>, transform_indices = @transform_18, window_bounds = array<i64: 1, 32>}, {pipeline_mode = #tpu.pipeline_mode<synchronous>, transform_indices = @transform_19, window_bounds = array<i64: 1, 32>}, {transform_indices = @transform_20, window_bounds = array<i64: 1, 8, 32>}]} {
    %c0_i32 = arith.constant 0 : i32
    %0 = arith.cmpi eq, %arg1, %c0_i32 : i32
    %1 = arith.extui %0 : i1 to i32
    %c0_i32_0 = arith.constant 0 : i32
    %2 = arith.cmpi ne, %1, %c0_i32_0 : i32
    scf.if %2 {
      %c0_89 = arith.constant 0 : index
      %c0_90 = arith.constant 0 : index
      %c0_91 = arith.constant 0 : index
      %195 = vector.load %arg2[%c0_89, %c0_90, %c0_91] : memref<1x8x32xf32, #tpu.memory_space<vmem>>, vector<1x8x32xf32>
      %196 = vector.shape_cast %195 : vector<1x8x32xf32> to vector<8x32xf32>
      %c0_92 = arith.constant 0 : index
      %c0_93 = arith.constant 0 : index
      %197 = vector.load %arg23[%c0_92, %c0_93] : memref<8x32xf32, #tpu.memory_space<vmem>>, vector<8x32xf32>
      tpu.vector_store %arg23[%c0_92, %c0_93], %196 {strides = array<i32>} : memref<8x32xf32, #tpu.memory_space<vmem>>, vector<8x32xf32>,
    } else {
    }
    %c0 = arith.constant 0 : index
    %c0_1 = arith.constant 0 : index
    %3 = vector.load %arg23[%c0, %c0_1] : memref<8x32xf32, #tpu.memory_space<vmem>>, vector<8x32xf32>
    %4 = arith.truncf %3 : vector<8x32xf32> to vector<8x32xbf16>
    %c0_2 = arith.constant 0 : index
    %c0_3 = arith.constant 0 : index
    %c0_4 = arith.constant 0 : index
    %5 = vector.load %arg4[%c0_2, %c0_3, %c0_4] : memref<1x32x32xbf16, #tpu.memory_space<vmem>>, vector<1x32x32xbf16>
    %6 = vector.shape_cast %5 : vector<1x32x32xbf16> to vector<32x32xbf16>
    %cst = arith.constant dense<0.000000e+00> : vector<8x32xf32>
    %7 = tpu.matmul %4, %6, %cst {dimension_numbers = #tpu.dot_dimension_numbers<[1], [0], [0], [1], [0, 0, 1, 1], [], []>} : vector<8x32xbf16>, vector<32x32xbf16>, vector<8x32xf32> -> vector<8x32xf32>
    %c0_5 = arith.constant 0 : index
    %c0_6 = arith.constant 0 : index
    %c0_7 = arith.constant 0 : index
    %8 = vector.load %arg7[%c0_5, %c0_6, %c0_7] : memref<1x1x32xf32, #tpu.memory_space<vmem>>, vector<1x1x32xf32>
    %9 = vector.shape_cast %8 : vector<1x1x32xf32> to vector<1x32xf32>
    %10 = vector.broadcast %9 : vector<1x32xf32> to vector<8x32xf32>
    %11 = arith.addf %7, %10 : vector<8x32xf32>
    %cst_8 = arith.constant 0.353553385 : f32
    %12 = vector.broadcast %cst_8 : f32 to vector<8x32xf32>
    %13 = arith.mulf %11, %12 : vector<8x32xf32>
    %c0_9 = arith.constant 0 : index
    %c0_10 = arith.constant 0 : index
    %c0_11 = arith.constant 0 : index
    %14 = vector.load %arg5[%c0_9, %c0_10, %c0_11] : memref<1x32x32xbf16, #tpu.memory_space<vmem>>, vector<1x32x32xbf16>
    %15 = vector.shape_cast %14 : vector<1x32x32xbf16> to vector<32x32xbf16>
    %cst_12 = arith.constant dense<0.000000e+00> : vector<8x32xf32>
    %16 = tpu.matmul %4, %15, %cst_12 {dimension_numbers = #tpu.dot_dimension_numbers<[1], [0], [0], [1], [0, 0, 1, 1], [], []>} : vector<8x32xbf16>, vector<32x32xbf16>, vector<8x32xf32> -> vector<8x32xf32>
    %c0_13 = arith.constant 0 : index
    %c0_14 = arith.constant 0 : index
    %c0_15 = arith.constant 0 : index
    %17 = vector.load %arg8[%c0_13, %c0_14, %c0_15] : memref<1x1x32xf32, #tpu.memory_space<vmem>>, vector<1x1x32xf32>
    %18 = vector.shape_cast %17 : vector<1x1x32xf32> to vector<1x32xf32>
    %19 = vector.broadcast %18 : vector<1x32xf32> to vector<8x32xf32>
    %20 = arith.addf %16, %19 : vector<8x32xf32>
    %c0_16 = arith.constant 0 : index
    %c0_17 = arith.constant 0 : index
    %c0_18 = arith.constant 0 : index
    %21 = vector.load %arg6[%c0_16, %c0_17, %c0_18] : memref<1x32x32xbf16, #tpu.memory_space<vmem>>, vector<1x32x32xbf16>
    %22 = vector.shape_cast %21 : vector<1x32x32xbf16> to vector<32x32xbf16>
    %cst_19 = arith.constant dense<0.000000e+00> : vector<8x32xf32>
    %23 = tpu.matmul %4, %22, %cst_19 {dimension_numbers = #tpu.dot_dimension_numbers<[1], [0], [0], [1], [0, 0, 1, 1], [], []>} : vector<8x32xbf16>, vector<32x32xbf16>, vector<8x32xf32> -> vector<8x32xf32>
    %c0_20 = arith.constant 0 : index
    %c0_21 = arith.constant 0 : index
    %c0_22 = arith.constant 0 : index
    %24 = vector.load %arg9[%c0_20, %c0_21, %c0_22] : memref<1x1x32xf32, #tpu.memory_space<vmem>>, vector<1x1x32xf32>
    %25 = vector.shape_cast %24 : vector<1x1x32xf32> to vector<1x32xf32>
    %26 = vector.broadcast %25 : vector<1x32xf32> to vector<8x32xf32>
    %27 = arith.addf %23, %26 : vector<8x32xf32>
    %c0_23 = arith.constant 0 : index
    %c0_24 = arith.constant 0 : index
    %c0_25 = arith.constant 0 : index
    %28 = vector.load %arg3[%c0_23, %c0_24, %c0_25] : memref<1x1x8xf32, #tpu.memory_space<vmem>>, vector<1x1x8xf32>
    %29 = vector.shape_cast %28 : vector<1x1x8xf32> to vector<1x8xf32>
    %c0_26 = arith.constant 0 : index
    %c0_27 = arith.constant 0 : index
    %c0_28 = arith.constant 0 : index
    %30 = vector.load %arg10[%c0_26, %c0_27, %c0_28] : memref<1x32x32xbf16, #tpu.memory_space<vmem>>, vector<1x32x32xbf16>
    %31 = vector.shape_cast %30 : vector<1x32x32xbf16> to vector<32x32xbf16>
    %c0_29 = arith.constant 0 : index
    %c0_30 = arith.constant 0 : index
    %c0_31 = arith.constant 0 : index
    %32 = vector.load %arg11[%c0_29, %c0_30, %c0_31] : memref<1x1x32xf32, #tpu.memory_space<vmem>>, vector<1x1x32xf32>
    %33 = vector.shape_cast %32 : vector<1x1x32xf32> to vector<1x32xf32>
    %34 = vector.extract_strided_slice %13 {offsets = [0, 0], sizes = [8, 8], strides = [1, 1]} : vector<8x32xf32> to vector<8x8xf32>
    %35 = arith.truncf %34 : vector<8x8xf32> to vector<8x8xbf16>
    %36 = vector.extract_strided_slice %20 {offsets = [0, 0], sizes = [8, 8], strides = [1, 1]} : vector<8x32xf32> to vector<8x8xf32>
    %37 = arith.truncf %36 : vector<8x8xf32> to vector<8x8xbf16>
    %38 = vector.extract_strided_slice %27 {offsets = [0, 0], sizes = [8, 8], strides = [1, 1]} : vector<8x32xf32> to vector<8x8xf32>
    %39 = arith.truncf %38 : vector<8x8xf32> to vector<8x8xbf16>
    %cst_32 = arith.constant dense<0.000000e+00> : vector<8x8xf32>
    %40 = tpu.matmul %35, %37, %cst_32 {dimension_numbers = #tpu.dot_dimension_numbers<[1], [1], [0], [0], [0, 0, 1, 0], [], []>} : vector<8x8xbf16>, vector<8x8xbf16>, vector<8x8xf32> -> vector<8x8xf32>
    %41 = vector.broadcast %29 : vector<1x8xf32> to vector<8x8xf32>
    %42 = arith.addf %40, %41 : vector<8x8xf32>
    %cst_33 = arith.constant dense<0xFF800000> : vector<8xf32>
    %43 = vector.multi_reduction <maximumf>, %42, %cst_33 [1] : vector<8x8xf32> to vector<8xf32>
    %44 = vector.shape_cast %43 : vector<8xf32> to vector<8x1xf32>
    %45 = vector.broadcast %44 : vector<8x1xf32> to vector<8x8xf32>
    %46 = arith.subf %42, %45 : vector<8x8xf32>
    %47 = math.exp %46 : vector<8x8xf32>
    %cst_34 = arith.constant dense<0.000000e+00> : vector<8xf32>
    %48 = vector.multi_reduction <add>, %47, %cst_34 [1] : vector<8x8xf32> to vector<8xf32>
    %49 = vector.shape_cast %48 : vector<8xf32> to vector<8x1xf32>
    %50 = vector.broadcast %49 : vector<8x1xf32> to vector<8x8xf32>
    %51 = arith.divf %47, %50 : vector<8x8xf32>
    %52 = arith.truncf %51 : vector<8x8xf32> to vector<8x8xbf16>
    %cst_35 = arith.constant dense<0.000000e+00> : vector<8x8xf32>
    %53 = tpu.matmul %52, %39, %cst_35 {dimension_numbers = #tpu.dot_dimension_numbers<[1], [0], [0], [1], [0, 0, 1, 1], [], []>} : vector<8x8xbf16>, vector<8x8xbf16>, vector<8x8xf32> -> vector<8x8xf32>
    %54 = vector.extract_strided_slice %13 {offsets = [0, 8], sizes = [8, 8], strides = [1, 1]} : vector<8x32xf32> to vector<8x8xf32>
    %55 = arith.truncf %54 : vector<8x8xf32> to vector<8x8xbf16>
    %56 = vector.extract_strided_slice %20 {offsets = [0, 8], sizes = [8, 8], strides = [1, 1]} : vector<8x32xf32> to vector<8x8xf32>
    %57 = arith.truncf %56 : vector<8x8xf32> to vector<8x8xbf16>
    %58 = vector.extract_strided_slice %27 {offsets = [0, 8], sizes = [8, 8], strides = [1, 1]} : vector<8x32xf32> to vector<8x8xf32>
    %59 = arith.truncf %58 : vector<8x8xf32> to vector<8x8xbf16>
    %cst_36 = arith.constant dense<0.000000e+00> : vector<8x8xf32>
    %60 = tpu.matmul %55, %57, %cst_36 {dimension_numbers = #tpu.dot_dimension_numbers<[1], [1], [0], [0], [0, 0, 1, 0], [], []>} : vector<8x8xbf16>, vector<8x8xbf16>, vector<8x8xf32> -> vector<8x8xf32>
    %61 = vector.broadcast %29 : vector<1x8xf32> to vector<8x8xf32>
    %62 = arith.addf %60, %61 : vector<8x8xf32>
    %cst_37 = arith.constant dense<0xFF800000> : vector<8xf32>
    %63 = vector.multi_reduction <maximumf>, %62, %cst_37 [1] : vector<8x8xf32> to vector<8xf32>
    %64 = vector.shape_cast %63 : vector<8xf32> to vector<8x1xf32>
    %65 = vector.broadcast %64 : vector<8x1xf32> to vector<8x8xf32>
    %66 = arith.subf %62, %65 : vector<8x8xf32>
    %67 = math.exp %66 : vector<8x8xf32>
    %cst_38 = arith.constant dense<0.000000e+00> : vector<8xf32>
    %68 = vector.multi_reduction <add>, %67, %cst_38 [1] : vector<8x8xf32> to vector<8xf32>
    %69 = vector.shape_cast %68 : vector<8xf32> to vector<8x1xf32>
    %70 = vector.broadcast %69 : vector<8x1xf32> to vector<8x8xf32>
    %71 = arith.divf %67, %70 : vector<8x8xf32>
    %72 = arith.truncf %71 : vector<8x8xf32> to vector<8x8xbf16>
    %cst_39 = arith.constant dense<0.000000e+00> : vector<8x8xf32>
    %73 = tpu.matmul %72, %59, %cst_39 {dimension_numbers = #tpu.dot_dimension_numbers<[1], [0], [0], [1], [0, 0, 1, 1], [], []>} : vector<8x8xbf16>, vector<8x8xbf16>, vector<8x8xf32> -> vector<8x8xf32>
    %74 = vector.extract_strided_slice %13 {offsets = [0, 16], sizes = [8, 8], strides = [1, 1]} : vector<8x32xf32> to vector<8x8xf32>
    %75 = arith.truncf %74 : vector<8x8xf32> to vector<8x8xbf16>
    %76 = vector.extract_strided_slice %20 {offsets = [0, 16], sizes = [8, 8], strides = [1, 1]} : vector<8x32xf32> to vector<8x8xf32>
    %77 = arith.truncf %76 : vector<8x8xf32> to vector<8x8xbf16>
    %78 = vector.extract_strided_slice %27 {offsets = [0, 16], sizes = [8, 8], strides = [1, 1]} : vector<8x32xf32> to vector<8x8xf32>
    %79 = arith.truncf %78 : vector<8x8xf32> to vector<8x8xbf16>
    %cst_40 = arith.constant dense<0.000000e+00> : vector<8x8xf32>
    %80 = tpu.matmul %75, %77, %cst_40 {dimension_numbers = #tpu.dot_dimension_numbers<[1], [1], [0], [0], [0, 0, 1, 0], [], []>} : vector<8x8xbf16>, vector<8x8xbf16>, vector<8x8xf32> -> vector<8x8xf32>
    %81 = vector.broadcast %29 : vector<1x8xf32> to vector<8x8xf32>
    %82 = arith.addf %80, %81 : vector<8x8xf32>
    %cst_41 = arith.constant dense<0xFF800000> : vector<8xf32>
    %83 = vector.multi_reduction <maximumf>, %82, %cst_41 [1] : vector<8x8xf32> to vector<8xf32>
    %84 = vector.shape_cast %83 : vector<8xf32> to vector<8x1xf32>
    %85 = vector.broadcast %84 : vector<8x1xf32> to vector<8x8xf32>
    %86 = arith.subf %82, %85 : vector<8x8xf32>
    %87 = math.exp %86 : vector<8x8xf32>
    %cst_42 = arith.constant dense<0.000000e+00> : vector<8xf32>
    %88 = vector.multi_reduction <add>, %87, %cst_42 [1] : vector<8x8xf32> to vector<8xf32>
    %89 = vector.shape_cast %88 : vector<8xf32> to vector<8x1xf32>
    %90 = vector.broadcast %89 : vector<8x1xf32> to vector<8x8xf32>
    %91 = arith.divf %87, %90 : vector<8x8xf32>
    %92 = arith.truncf %91 : vector<8x8xf32> to vector<8x8xbf16>
    %cst_43 = arith.constant dense<0.000000e+00> : vector<8x8xf32>
    %93 = tpu.matmul %92, %79, %cst_43 {dimension_numbers = #tpu.dot_dimension_numbers<[1], [0], [0], [1], [0, 0, 1, 1], [], []>} : vector<8x8xbf16>, vector<8x8xbf16>, vector<8x8xf32> -> vector<8x8xf32>
    %94 = vector.extract_strided_slice %13 {offsets = [0, 24], sizes = [8, 8], strides = [1, 1]} : vector<8x32xf32> to vector<8x8xf32>
    %95 = arith.truncf %94 : vector<8x8xf32> to vector<8x8xbf16>
    %96 = vector.extract_strided_slice %20 {offsets = [0, 24], sizes = [8, 8], strides = [1, 1]} : vector<8x32xf32> to vector<8x8xf32>
    %97 = arith.truncf %96 : vector<8x8xf32> to vector<8x8xbf16>
    %98 = vector.extract_strided_slice %27 {offsets = [0, 24], sizes = [8, 8], strides = [1, 1]} : vector<8x32xf32> to vector<8x8xf32>
    %99 = arith.truncf %98 : vector<8x8xf32> to vector<8x8xbf16>
    %cst_44 = arith.constant dense<0.000000e+00> : vector<8x8xf32>
    %100 = tpu.matmul %95, %97, %cst_44 {dimension_numbers = #tpu.dot_dimension_numbers<[1], [1], [0], [0], [0, 0, 1, 0], [], []>} : vector<8x8xbf16>, vector<8x8xbf16>, vector<8x8xf32> -> vector<8x8xf32>
    %101 = vector.broadcast %29 : vector<1x8xf32> to vector<8x8xf32>
    %102 = arith.addf %100, %101 : vector<8x8xf32>
    %cst_45 = arith.constant dense<0xFF800000> : vector<8xf32>
    %103 = vector.multi_reduction <maximumf>, %102, %cst_45 [1] : vector<8x8xf32> to vector<8xf32>
    %104 = vector.shape_cast %103 : vector<8xf32> to vector<8x1xf32>
    %105 = vector.broadcast %104 : vector<8x1xf32> to vector<8x8xf32>
    %106 = arith.subf %102, %105 : vector<8x8xf32>
    %107 = math.exp %106 : vector<8x8xf32>
    %cst_46 = arith.constant dense<0.000000e+00> : vector<8xf32>
    %108 = vector.multi_reduction <add>, %107, %cst_46 [1] : vector<8x8xf32> to vector<8xf32>
    %109 = vector.shape_cast %108 : vector<8xf32> to vector<8x1xf32>
    %110 = vector.broadcast %109 : vector<8x1xf32> to vector<8x8xf32>
    %111 = arith.divf %107, %110 : vector<8x8xf32>
    %112 = arith.truncf %111 : vector<8x8xf32> to vector<8x8xbf16>
    %cst_47 = arith.constant dense<0.000000e+00> : vector<8x8xf32>
    %113 = tpu.matmul %112, %99, %cst_47 {dimension_numbers = #tpu.dot_dimension_numbers<[1], [0], [0], [1], [0, 0, 1, 1], [], []>} : vector<8x8xbf16>, vector<8x8xbf16>, vector<8x8xf32> -> vector<8x8xf32>
    %114 = tpu.concatenate %53, %73, %93, %113 in 1 : vector<8x8xf32>, vector<8x8xf32>, vector<8x8xf32>, vector<8x8xf32> -> vector<8x32xf32>
    %115 = arith.truncf %114 : vector<8x32xf32> to vector<8x32xbf16>
    %cst_48 = arith.constant dense<0.000000e+00> : vector<8x32xf32>
    %116 = tpu.matmul %115, %31, %cst_48 {dimension_numbers = #tpu.dot_dimension_numbers<[1], [0], [0], [1], [0, 0, 1, 1], [], []>} : vector<8x32xbf16>, vector<32x32xbf16>, vector<8x32xf32> -> vector<8x32xf32>
    %117 = vector.broadcast %33 : vector<1x32xf32> to vector<8x32xf32>
    %118 = arith.addf %116, %117 : vector<8x32xf32>
    %119 = arith.addf %3, %118 : vector<8x32xf32>
    %c0_49 = arith.constant 0 : index
    %c0_50 = arith.constant 0 : index
    %c0_51 = arith.constant 0 : index
    %120 = vector.load %arg16[%c0_49, %c0_50, %c0_51] : memref<1x1x32xf32, #tpu.memory_space<vmem>>, vector<1x1x32xf32>
    %121 = vector.shape_cast %120 : vector<1x1x32xf32> to vector<1x32xf32>
    %c0_52 = arith.constant 0 : index
    %c0_53 = arith.constant 0 : index
    %c0_54 = arith.constant 0 : index
    %122 = vector.load %arg17[%c0_52, %c0_53, %c0_54] : memref<1x1x32xf32, #tpu.memory_space<vmem>>, vector<1x1x32xf32>
    %123 = vector.shape_cast %122 : vector<1x1x32xf32> to vector<1x32xf32>
    %cst_55 = arith.constant dense<0.000000e+00> : vector<8xf32>
    %124 = vector.multi_reduction <add>, %119, %cst_55 [1] : vector<8x32xf32> to vector<8xf32>
    %125 = vector.shape_cast %124 : vector<8xf32> to vector<8x1xf32>
    %cst_56 = arith.constant 3.200000e+01 : f32
    %126 = vector.broadcast %cst_56 : f32 to vector<8x1xf32>
    %127 = arith.divf %125, %126 : vector<8x1xf32>
    %128 = vector.broadcast %127 : vector<8x1xf32> to vector<8x32xf32>
    %129 = arith.subf %119, %128 : vector<8x32xf32>
    %130 = arith.mulf %129, %129 : vector<8x32xf32>
    %cst_57 = arith.constant dense<0.000000e+00> : vector<8xf32>
    %131 = vector.multi_reduction <add>, %130, %cst_57 [1] : vector<8x32xf32> to vector<8xf32>
    %132 = vector.shape_cast %131 : vector<8xf32> to vector<8x1xf32>
    %cst_58 = arith.constant 3.200000e+01 : f32
    %133 = vector.broadcast %cst_58 : f32 to vector<8x1xf32>
    %134 = arith.divf %132, %133 : vector<8x1xf32>
    %135 = vector.broadcast %127 : vector<8x1xf32> to vector<8x32xf32>
    %136 = arith.subf %119, %135 : vector<8x32xf32>
    %cst_59 = arith.constant 9.99999974E-6 : f32
    %137 = vector.broadcast %cst_59 : f32 to vector<8x1xf32>
    %138 = arith.addf %134, %137 : vector<8x1xf32>
    %139 = math.rsqrt %138 : vector<8x1xf32>
    %140 = vector.broadcast %139 : vector<8x1xf32> to vector<8x32xf32>
    %141 = arith.mulf %136, %140 : vector<8x32xf32>
    %142 = vector.broadcast %121 : vector<1x32xf32> to vector<8x32xf32>
    %143 = arith.mulf %141, %142 : vector<8x32xf32>
    %144 = vector.broadcast %123 : vector<1x32xf32> to vector<8x32xf32>
    %145 = arith.addf %143, %144 : vector<8x32xf32>
    %146 = arith.truncf %145 : vector<8x32xf32> to vector<8x32xbf16>
    %c0_60 = arith.constant 0 : index
    %c0_61 = arith.constant 0 : index
    %c0_62 = arith.constant 0 : index
    %147 = vector.load %arg12[%c0_60, %c0_61, %c0_62] : memref<1x32x64xbf16, #tpu.memory_space<vmem>>, vector<1x32x64xbf16>
    %148 = vector.shape_cast %147 : vector<1x32x64xbf16> to vector<32x64xbf16>
    %cst_63 = arith.constant dense<0.000000e+00> : vector<8x64xf32>
    %149 = tpu.matmul %146, %148, %cst_63 {dimension_numbers = #tpu.dot_dimension_numbers<[1], [0], [0], [1], [0, 0, 1, 1], [], []>} : vector<8x32xbf16>, vector<32x64xbf16>, vector<8x64xf32> -> vector<8x64xf32>
    %c0_64 = arith.constant 0 : index
    %c0_65 = arith.constant 0 : index
    %c0_66 = arith.constant 0 : index
    %150 = vector.load %arg13[%c0_64, %c0_65, %c0_66] : memref<1x1x64xf32, #tpu.memory_space<vmem>>, vector<1x1x64xf32>
    %151 = vector.shape_cast %150 : vector<1x1x64xf32> to vector<1x64xf32>
    %152 = vector.broadcast %151 : vector<1x64xf32> to vector<8x64xf32>
    %153 = arith.addf %149, %152 : vector<8x64xf32>
    %cst_67 = arith.constant 0.000000e+00 : f32
    %154 = vector.broadcast %cst_67 : f32 to vector<8x64xf32>
    %155 = arith.maximumf %153, %154 : vector<8x64xf32>
    %156 = arith.truncf %155 : vector<8x64xf32> to vector<8x64xbf16>
    %c0_68 = arith.constant 0 : index
    %c0_69 = arith.constant 0 : index
    %c0_70 = arith.constant 0 : index
    %157 = vector.load %arg14[%c0_68, %c0_69, %c0_70] : memref<1x64x32xbf16, #tpu.memory_space<vmem>>, vector<1x64x32xbf16>
    %158 = vector.shape_cast %157 : vector<1x64x32xbf16> to vector<64x32xbf16>
    %cst_71 = arith.constant dense<0.000000e+00> : vector<8x32xf32>
    %159 = tpu.matmul %156, %158, %cst_71 {dimension_numbers = #tpu.dot_dimension_numbers<[1], [0], [0], [1], [0, 0, 1, 1], [], []>} : vector<8x64xbf16>, vector<64x32xbf16>, vector<8x32xf32> -> vector<8x32xf32>
    %c0_72 = arith.constant 0 : index
    %c0_73 = arith.constant 0 : index
    %c0_74 = arith.constant 0 : index
    %160 = vector.load %arg15[%c0_72, %c0_73, %c0_74] : memref<1x1x32xf32, #tpu.memory_space<vmem>>, vector<1x1x32xf32>
    %161 = vector.shape_cast %160 : vector<1x1x32xf32> to vector<1x32xf32>
    %162 = vector.broadcast %161 : vector<1x32xf32> to vector<8x32xf32>
    %163 = arith.addf %159, %162 : vector<8x32xf32>
    %164 = arith.addf %145, %163 : vector<8x32xf32>
    %c0_75 = arith.constant 0 : index
    %c0_76 = arith.constant 0 : index
    %c0_77 = arith.constant 0 : index
    %165 = vector.load %arg18[%c0_75, %c0_76, %c0_77] : memref<1x1x32xf32, #tpu.memory_space<vmem>>, vector<1x1x32xf32>
    %166 = vector.shape_cast %165 : vector<1x1x32xf32> to vector<1x32xf32>
    %c0_78 = arith.constant 0 : index
    %c0_79 = arith.constant 0 : index
    %c0_80 = arith.constant 0 : index
    %167 = vector.load %arg19[%c0_78, %c0_79, %c0_80] : memref<1x1x32xf32, #tpu.memory_space<vmem>>, vector<1x1x32xf32>
    %168 = vector.shape_cast %167 : vector<1x1x32xf32> to vector<1x32xf32>
    %cst_81 = arith.constant dense<0.000000e+00> : vector<8xf32>
    %169 = vector.multi_reduction <add>, %164, %cst_81 [1] : vector<8x32xf32> to vector<8xf32>
    %170 = vector.shape_cast %169 : vector<8xf32> to vector<8x1xf32>
    %cst_82 = arith.constant 3.200000e+01 : f32
    %171 = vector.broadcast %cst_82 : f32 to vector<8x1xf32>
    %172 = arith.divf %170, %171 : vector<8x1xf32>
    %173 = vector.broadcast %172 : vector<8x1xf32> to vector<8x32xf32>
    %174 = arith.subf %164, %173 : vector<8x32xf32>
    %175 = arith.mulf %174, %174 : vector<8x32xf32>
    %cst_83 = arith.constant dense<0.000000e+00> : vector<8xf32>
    %176 = vector.multi_reduction <add>, %175, %cst_83 [1] : vector<8x32xf32> to vector<8xf32>
    %177 = vector.shape_cast %176 : vector<8xf32> to vector<8x1xf32>
    %cst_84 = arith.constant 3.200000e+01 : f32
    %178 = vector.broadcast %cst_84 : f32 to vector<8x1xf32>
    %179 = arith.divf %177, %178 : vector<8x1xf32>
    %180 = vector.broadcast %172 : vector<8x1xf32> to vector<8x32xf32>
    %181 = arith.subf %164, %180 : vector<8x32xf32>
    %cst_85 = arith.constant 9.99999974E-6 : f32
    %182 = vector.broadcast %cst_85 : f32 to vector<8x1xf32>
    %183 = arith.addf %179, %182 : vector<8x1xf32>
    %184 = math.rsqrt %183 : vector<8x1xf32>
    %185 = vector.broadcast %184 : vector<8x1xf32> to vector<8x32xf32>
    %186 = arith.mulf %181, %185 : vector<8x32xf32>
    %187 = vector.broadcast %166 : vector<1x32xf32> to vector<8x32xf32>
    %188 = arith.mulf %186, %187 : vector<8x32xf32>
    %189 = vector.broadcast %168 : vector<1x32xf32> to vector<8x32xf32>
    %190 = arith.addf %188, %189 : vector<8x32xf32>
    %c0_86 = arith.constant 0 : index
    %c0_87 = arith.constant 0 : index
    %191 = vector.load %arg23[%c0_86, %c0_87] : memref<8x32xf32, #tpu.memory_space<vmem>>, vector<8x32xf32>
    tpu.vector_store %arg23[%c0_86, %c0_87], %190 {strides = array<i32>} : memref<8x32xf32, #tpu.memory_space<vmem>>, vector<8x32xf32>,
    %c1_i32 = arith.constant 1 : i32
    %192 = arith.cmpi eq, %arg1, %c1_i32 : i32
    %193 = arith.extui %192 : i1 to i32
    %c0_i32_88 = arith.constant 0 : i32
    %194 = arith.cmpi ne, %193, %c0_i32_88 : i32
    scf.if %194 {
      %c0_89 = arith.constant 0 : index
      %c0_90 = arith.constant 0 : index
      %195 = vector.load %arg20[%c0_89, %c0_90] : memref<1x32xf32, #tpu.memory_space<vmem>>, vector<1x32xf32>
      %c0_91 = arith.constant 0 : index
      %c0_92 = arith.constant 0 : index
      %196 = vector.load %arg21[%c0_91, %c0_92] : memref<1x32xf32, #tpu.memory_space<vmem>>, vector<1x32xf32>
      %cst_93 = arith.constant dense<0.000000e+00> : vector<8xf32>
      %197 = vector.multi_reduction <add>, %190, %cst_93 [1] : vector<8x32xf32> to vector<8xf32>
      %198 = vector.shape_cast %197 : vector<8xf32> to vector<8x1xf32>
      %cst_94 = arith.constant 3.200000e+01 : f32
      %199 = vector.broadcast %cst_94 : f32 to vector<8x1xf32>
      %200 = arith.divf %198, %199 : vector<8x1xf32>
      %201 = vector.broadcast %200 : vector<8x1xf32> to vector<8x32xf32>
      %202 = arith.subf %190, %201 : vector<8x32xf32>
      %203 = arith.mulf %202, %202 : vector<8x32xf32>
      %cst_95 = arith.constant dense<0.000000e+00> : vector<8xf32>
      %204 = vector.multi_reduction <add>, %203, %cst_95 [1] : vector<8x32xf32> to vector<8xf32>
      %205 = vector.shape_cast %204 : vector<8xf32> to vector<8x1xf32>
      %cst_96 = arith.constant 3.200000e+01 : f32
      %206 = vector.broadcast %cst_96 : f32 to vector<8x1xf32>
      %207 = arith.divf %205, %206 : vector<8x1xf32>
      %208 = vector.broadcast %200 : vector<8x1xf32> to vector<8x32xf32>
      %209 = arith.subf %190, %208 : vector<8x32xf32>
      %cst_97 = arith.constant 9.99999974E-6 : f32
      %210 = vector.broadcast %cst_97 : f32 to vector<8x1xf32>
      %211 = arith.addf %207, %210 : vector<8x1xf32>
      %212 = math.rsqrt %211 : vector<8x1xf32>
      %213 = vector.broadcast %212 : vector<8x1xf32> to vector<8x32xf32>
      %214 = arith.mulf %209, %213 : vector<8x32xf32>
      %215 = vector.broadcast %195 : vector<1x32xf32> to vector<8x32xf32>
      %216 = arith.mulf %214, %215 : vector<8x32xf32>
      %217 = vector.broadcast %196 : vector<1x32xf32> to vector<8x32xf32>
      %218 = arith.addf %216, %217 : vector<8x32xf32>
      %219 = vector.shape_cast %218 : vector<8x32xf32> to vector<1x8x32xf32>
      %c0_98 = arith.constant 0 : index
      %c0_99 = arith.constant 0 : index
      %c0_100 = arith.constant 0 : index
      %220 = vector.load %arg22[%c0_98, %c0_99, %c0_100] : memref<1x8x32xf32, #tpu.memory_space<vmem>>, vector<1x8x32xf32>
      tpu.vector_store %arg22[%c0_98, %c0_99, %c0_100], %219 {strides = array<i32>} : memref<1x8x32xf32, #tpu.memory_space<vmem>>, vector<1x8x32xf32>,
    } else {
    }
    return
  }
  func.func @transform_0(%arg0: i32, %arg1: i32) -> (i32, i32, i32) {
    %c0_i32 = arith.constant 0 : i32
    %c0_i32_0 = arith.constant 0 : i32
    %c0_i32_1 = arith.constant 0 : i32
    return %arg0, %c0_i32, %c0_i32_0 : i32, i32, i32
  }
  func.func @transform_1(%arg0: i32, %arg1: i32) -> (i32, i32, i32) {
    %c0_i32 = arith.constant 0 : i32
    %c0_i32_0 = arith.constant 0 : i32
    %c0_i32_1 = arith.constant 0 : i32
    return %arg0, %c0_i32, %c0_i32_0 : i32, i32, i32
  }
  func.func @transform_2(%arg0: i32, %arg1: i32) -> (i32, i32, i32) {
    %c0_i32 = arith.constant 0 : i32
    %c0_i32_0 = arith.constant 0 : i32
    %c0_i32_1 = arith.constant 0 : i32
    return %arg1, %c0_i32, %c0_i32_0 : i32, i32, i32
  }
  func.func @transform_3(%arg0: i32, %arg1: i32) -> (i32, i32, i32) {
    %c0_i32 = arith.constant 0 : i32
    %c0_i32_0 = arith.constant 0 : i32
    %c0_i32_1 = arith.constant 0 : i32
    return %arg1, %c0_i32, %c0_i32_0 : i32, i32, i32
  }
  func.func @transform_4(%arg0: i32, %arg1: i32) -> (i32, i32, i32) {
    %c0_i32 = arith.constant 0 : i32
    %c0_i32_0 = arith.constant 0 : i32
    %c0_i32_1 = arith.constant 0 : i32
    return %arg1, %c0_i32, %c0_i32_0 : i32, i32, i32
  }
  func.func @transform_5(%arg0: i32, %arg1: i32) -> (i32, i32, i32) {
    %c0_i32 = arith.constant 0 : i32
    %c0_i32_0 = arith.constant 0 : i32
    %c0_i32_1 = arith.constant 0 : i32
    return %arg1, %c0_i32, %c0_i32_0 : i32, i32, i32
  }
  func.func @transform_6(%arg0: i32, %arg1: i32) -> (i32, i32, i32) {
    %c0_i32 = arith.constant 0 : i32
    %c0_i32_0 = arith.constant 0 : i32
    %c0_i32_1 = arith.constant 0 : i32
    return %arg1, %c0_i32, %c0_i32_0 : i32, i32, i32
  }
  func.func @transform_7(%arg0: i32, %arg1: i32) -> (i32, i32, i32) {
    %c0_i32 = arith.constant 0 : i32
    %c0_i32_0 = arith.constant 0 : i32
    %c0_i32_1 = arith.constant 0 : i32
    return %arg1, %c0_i32, %c0_i32_0 : i32, i32, i32
  }
  func.func @transform_8(%arg0: i32, %arg1: i32) -> (i32, i32, i32) {
    %c0_i32 = arith.constant 0 : i32
    %c0_i32_0 = arith.constant 0 : i32
    %c0_i32_1 = arith.constant 0 : i32
    return %arg1, %c0_i32, %c0_i32_0 : i32, i32, i32
  }
  func.func @transform_9(%arg0: i32, %arg1: i32) -> (i32, i32, i32) {
    %c0_i32 = arith.constant 0 : i32
    %c0_i32_0 = arith.constant 0 : i32
    %c0_i32_1 = arith.constant 0 : i32
    return %arg1, %c0_i32, %c0_i32_0 : i32, i32, i32
  }
  func.func @transform_10(%arg0: i32, %arg1: i32) -> (i32, i32, i32) {
    %c0_i32 = arith.constant 0 : i32
    %c0_i32_0 = arith.constant 0 : i32
    %c0_i32_1 = arith.constant 0 : i32
    return %arg1, %c0_i32, %c0_i32_0 : i32, i32, i32
  }
  func.func @transform_11(%arg0: i32, %arg1: i32) -> (i32, i32, i32) {
    %c0_i32 = arith.constant 0 : i32
    %c0_i32_0 = arith.constant 0 : i32
    %c0_i32_1 = arith.constant 0 : i32
    return %arg1, %c0_i32, %c0_i32_0 : i32, i32, i32
  }
  func.func @transform_12(%arg0: i32, %arg1: i32) -> (i32, i32, i32) {
    %c0_i32 = arith.constant 0 : i32
    %c0_i32_0 = arith.constant 0 : i32
    %c0_i32_1 = arith.constant 0 : i32
    return %arg1, %c0_i32, %c0_i32_0 : i32, i32, i32
  }
  func.func @transform_13(%arg0: i32, %arg1: i32) -> (i32, i32, i32) {
    %c0_i32 = arith.constant 0 : i32
    %c0_i32_0 = arith.constant 0 : i32
    %c0_i32_1 = arith.constant 0 : i32
    return %arg1, %c0_i32, %c0_i32_0 : i32, i32, i32
  }
  func.func @transform_14(%arg0: i32, %arg1: i32) -> (i32, i32, i32) {
    %c0_i32 = arith.constant 0 : i32
    %c0_i32_0 = arith.constant 0 : i32
    %c0_i32_1 = arith.constant 0 : i32
    return %arg1, %c0_i32, %c0_i32_0 : i32, i32, i32
  }
  func.func @transform_15(%arg0: i32, %arg1: i32) -> (i32, i32, i32) {
    %c0_i32 = arith.constant 0 : i32
    %c0_i32_0 = arith.constant 0 : i32
    %c0_i32_1 = arith.constant 0 : i32
    return %arg1, %c0_i32, %c0_i32_0 : i32, i32, i32
  }
  func.func @transform_16(%arg0: i32, %arg1: i32) -> (i32, i32, i32) {
    %c0_i32 = arith.constant 0 : i32
    %c0_i32_0 = arith.constant 0 : i32
    %c0_i32_1 = arith.constant 0 : i32
    return %arg1, %c0_i32, %c0_i32_0 : i32, i32, i32
  }
  func.func @transform_17(%arg0: i32, %arg1: i32) -> (i32, i32, i32) {
    %c0_i32 = arith.constant 0 : i32
    %c0_i32_0 = arith.constant 0 : i32
    %c0_i32_1 = arith.constant 0 : i32
    return %arg1, %c0_i32, %c0_i32_0 : i32, i32, i32
  }
  func.func @transform_18(%arg0: i32, %arg1: i32) -> (i32, i32) {
    %c0_i32 = arith.constant 0 : i32
    %c0_i32_0 = arith.constant 0 : i32
    %c0_i32_1 = arith.constant 0 : i32
    return %c0_i32, %c0_i32_0 : i32, i32
  }
  func.func @transform_19(%arg0: i32, %arg1: i32) -> (i32, i32) {
    %c0_i32 = arith.constant 0 : i32
    %c0_i32_0 = arith.constant 0 : i32
    %c0_i32_1 = arith.constant 0 : i32
    return %c0_i32, %c0_i32_0 : i32, i32
  }
  func.func @transform_20(%arg0: i32, %arg1: i32) -> (i32, i32, i32) {
    %c0_i32 = arith.constant 0 : i32
    %c0_i32_0 = arith.constant 0 : i32
    %c0_i32_1 = arith.constant 0 : i32
    return %arg0, %c0_i32, %c0_i32_0 : i32, i32, i32
  }
}

module attributes {stable_mosaic.version = 11 : i64} {
  func.func @_decoder_stack_kernel(%arg0: i32, %arg1: i32, %arg2: memref<1x8x32xf32, #tpu.memory_space<vmem>>, %arg3: memref<1x8x32xf32, #tpu.memory_space<vmem>>, %arg4: memref<1x1x8xf32, #tpu.memory_space<vmem>>, %arg5: memref<1x1x8xf32, #tpu.memory_space<vmem>>, %arg6: memref<1x32x32xbf16, #tpu.memory_space<vmem>>, %arg7: memref<1x32x32xbf16, #tpu.memory_space<vmem>>, %arg8: memref<1x32x32xbf16, #tpu.memory_space<vmem>>, %arg9: memref<1x1x32xf32, #tpu.memory_space<vmem>>, %arg10: memref<1x1x32xf32, #tpu.memory_space<vmem>>, %arg11: memref<1x1x32xf32, #tpu.memory_space<vmem>>, %arg12: memref<1x32x32xbf16, #tpu.memory_space<vmem>>, %arg13: memref<1x1x32xf32, #tpu.memory_space<vmem>>, %arg14: memref<1x32x32xbf16, #tpu.memory_space<vmem>>, %arg15: memref<1x32x32xbf16, #tpu.memory_space<vmem>>, %arg16: memref<1x32x32xbf16, #tpu.memory_space<vmem>>, %arg17: memref<1x1x32xf32, #tpu.memory_space<vmem>>, %arg18: memref<1x1x32xf32, #tpu.memory_space<vmem>>, %arg19: memref<1x1x32xf32, #tpu.memory_space<vmem>>, %arg20: memref<1x32x32xbf16, #tpu.memory_space<vmem>>, %arg21: memref<1x1x32xf32, #tpu.memory_space<vmem>>, %arg22: memref<1x32x64xbf16, #tpu.memory_space<vmem>>, %arg23: memref<1x1x64xf32, #tpu.memory_space<vmem>>, %arg24: memref<1x64x32xbf16, #tpu.memory_space<vmem>>, %arg25: memref<1x1x32xf32, #tpu.memory_space<vmem>>, %arg26: memref<1x1x32xf32, #tpu.memory_space<vmem>>, %arg27: memref<1x1x32xf32, #tpu.memory_space<vmem>>, %arg28: memref<1x1x32xf32, #tpu.memory_space<vmem>>, %arg29: memref<1x1x32xf32, #tpu.memory_space<vmem>>, %arg30: memref<1x1x32xf32, #tpu.memory_space<vmem>>, %arg31: memref<1x1x32xf32, #tpu.memory_space<vmem>>, %arg32: memref<1x8x32xf32, #tpu.memory_space<vmem>>, %arg33: memref<8x32xf32, #tpu.memory_space<vmem>>) attributes {dimension_semantics = [#tpu.dimension_semantics<parallel>, #tpu.dimension_semantics<arbitrary>], iteration_bounds = array<i64: 2, 2>, scalar_prefetch = 0 : i64, scratch_operands = 1 : i64, tpu.core_type = #tpu.core_type<tc>, window_params = [{transform_indices = @transform_0, window_bounds = array<i64: 1, 8, 32>}, {transform_indices = @transform_1, window_bounds = array<i64: 1, 8, 32>}, {transform_indices = @transform_2, window_bounds = array<i64: 1, 1, 8>}, {transform_indices = @transform_3, window_bounds = array<i64: 1, 1, 8>}, {transform_indices = @transform_4, window_bounds = array<i64: 1, 32, 32>}, {transform_indices = @transform_5, window_bounds = array<i64: 1, 32, 32>}, {transform_indices = @transform_6, window_bounds = array<i64: 1, 32, 32>}, {transform_indices = @transform_7, window_bounds = array<i64: 1, 1, 32>}, {transform_indices = @transform_8, window_bounds = array<i64: 1, 1, 32>}, {transform_indices = @transform_9, window_bounds = array<i64: 1, 1, 32>}, {transform_indices = @transform_10, window_bounds = array<i64: 1, 32, 32>}, {transform_indices = @transform_11, window_bounds = array<i64: 1, 1, 32>}, {transform_indices = @transform_12, window_bounds = array<i64: 1, 32, 32>}, {transform_indices = @transform_13, window_bounds = array<i64: 1, 32, 32>}, {transform_indices = @transform_14, window_bounds = array<i64: 1, 32, 32>}, {transform_indices = @transform_15, window_bounds = array<i64: 1, 1, 32>}, {transform_indices = @transform_16, window_bounds = array<i64: 1, 1, 32>}, {transform_indices = @transform_17, window_bounds = array<i64: 1, 1, 32>}, {transform_indices = @transform_18, window_bounds = array<i64: 1, 32, 32>}, {transform_indices = @transform_19, window_bounds = array<i64: 1, 1, 32>}, {transform_indices = @transform_20, window_bounds = array<i64: 1, 32, 64>}, {transform_indices = @transform_21, window_bounds = array<i64: 1, 1, 64>}, {transform_indices = @transform_22, window_bounds = array<i64: 1, 64, 32>}, {transform_indices = @transform_23, window_bounds = array<i64: 1, 1, 32>}, {transform_indices = @transform_24, window_bounds = array<i64: 1, 1, 32>}, {transform_indices = @transform_25, window_bounds = array<i64: 1, 1, 32>}, {transform_indices = @transform_26, window_bounds = array<i64: 1, 1, 32>}, {transform_indices = @transform_27, window_bounds = array<i64: 1, 1, 32>}, {transform_indices = @transform_28, window_bounds = array<i64: 1, 1, 32>}, {transform_indices = @transform_29, window_bounds = array<i64: 1, 1, 32>}, {transform_indices = @transform_30, window_bounds = array<i64: 1, 8, 32>}]} {
    %c0_i32 = arith.constant 0 : i32
    %0 = arith.cmpi eq, %arg1, %c0_i32 : i32
    %1 = arith.extui %0 : i1 to i32
    %c0_i32_0 = arith.constant 0 : i32
    %2 = arith.cmpi ne, %1, %c0_i32_0 : i32
    scf.if %2 {
      %c0_153 = arith.constant 0 : index
      %c0_154 = arith.constant 0 : index
      %c0_155 = arith.constant 0 : index
      %344 = vector.load %arg2[%c0_153, %c0_154, %c0_155] : memref<1x8x32xf32, #tpu.memory_space<vmem>>, vector<1x8x32xf32>
      %345 = vector.shape_cast %344 : vector<1x8x32xf32> to vector<8x32xf32>
      %c0_156 = arith.constant 0 : index
      %c0_157 = arith.constant 0 : index
      %346 = vector.load %arg33[%c0_156, %c0_157] : memref<8x32xf32, #tpu.memory_space<vmem>>, vector<8x32xf32>
      tpu.vector_store %arg33[%c0_156, %c0_157], %345 {strides = array<i32>} : memref<8x32xf32, #tpu.memory_space<vmem>>, vector<8x32xf32>,
    } else {
    }
    %3 = tpu.iota {dimensions = array<i32: 0>} : vector<8x8xi32>
    %4 = tpu.iota {dimensions = array<i32: 1>} : vector<8x8xi32>
    %5 = arith.cmpi sgt, %4, %3 : vector<8x8xi32>
    %cst = arith.constant -1.000000e+30 : f32
    %cst_1 = arith.constant 0.000000e+00 : f32
    %6 = vector.broadcast %cst : f32 to vector<8x8xf32>
    %7 = vector.broadcast %cst_1 : f32 to vector<8x8xf32>
    %8 = arith.select %5, %6, %7 : vector<8x8xi1>, vector<8x8xf32>
    %c0 = arith.constant 0 : index
    %c0_2 = arith.constant 0 : index
    %c0_3 = arith.constant 0 : index
    %9 = vector.load %arg4[%c0, %c0_2, %c0_3] : memref<1x1x8xf32, #tpu.memory_space<vmem>>, vector<1x1x8xf32>
    %10 = vector.shape_cast %9 : vector<1x1x8xf32> to vector<1x8xf32>
    %11 = vector.broadcast %10 : vector<1x8xf32> to vector<8x8xf32>
    %12 = arith.addf %8, %11 : vector<8x8xf32>
    %c0_4 = arith.constant 0 : index
    %c0_5 = arith.constant 0 : index
    %13 = vector.load %arg33[%c0_4, %c0_5] : memref<8x32xf32, #tpu.memory_space<vmem>>, vector<8x32xf32>
    %14 = arith.truncf %13 : vector<8x32xf32> to vector<8x32xbf16>
    %c0_6 = arith.constant 0 : index
    %c0_7 = arith.constant 0 : index
    %c0_8 = arith.constant 0 : index
    %15 = vector.load %arg6[%c0_6, %c0_7, %c0_8] : memref<1x32x32xbf16, #tpu.memory_space<vmem>>, vector<1x32x32xbf16>
    %16 = vector.shape_cast %15 : vector<1x32x32xbf16> to vector<32x32xbf16>
    %cst_9 = arith.constant dense<0.000000e+00> : vector<8x32xf32>
    %17 = tpu.matmul %14, %16, %cst_9 {dimension_numbers = #tpu.dot_dimension_numbers<[1], [0], [0], [1], [0, 0, 1, 1], [], []>} : vector<8x32xbf16>, vector<32x32xbf16>, vector<8x32xf32> -> vector<8x32xf32>
    %c0_10 = arith.constant 0 : index
    %c0_11 = arith.constant 0 : index
    %c0_12 = arith.constant 0 : index
    %18 = vector.load %arg9[%c0_10, %c0_11, %c0_12] : memref<1x1x32xf32, #tpu.memory_space<vmem>>, vector<1x1x32xf32>
    %19 = vector.shape_cast %18 : vector<1x1x32xf32> to vector<1x32xf32>
    %20 = vector.broadcast %19 : vector<1x32xf32> to vector<8x32xf32>
    %21 = arith.addf %17, %20 : vector<8x32xf32>
    %cst_13 = arith.constant 0.353553385 : f32
    %22 = vector.broadcast %cst_13 : f32 to vector<8x32xf32>
    %23 = arith.mulf %21, %22 : vector<8x32xf32>
    %c0_14 = arith.constant 0 : index
    %c0_15 = arith.constant 0 : index
    %c0_16 = arith.constant 0 : index
    %24 = vector.load %arg7[%c0_14, %c0_15, %c0_16] : memref<1x32x32xbf16, #tpu.memory_space<vmem>>, vector<1x32x32xbf16>
    %25 = vector.shape_cast %24 : vector<1x32x32xbf16> to vector<32x32xbf16>
    %cst_17 = arith.constant dense<0.000000e+00> : vector<8x32xf32>
    %26 = tpu.matmul %14, %25, %cst_17 {dimension_numbers = #tpu.dot_dimension_numbers<[1], [0], [0], [1], [0, 0, 1, 1], [], []>} : vector<8x32xbf16>, vector<32x32xbf16>, vector<8x32xf32> -> vector<8x32xf32>
    %c0_18 = arith.constant 0 : index
    %c0_19 = arith.constant 0 : index
    %c0_20 = arith.constant 0 : index
    %27 = vector.load %arg10[%c0_18, %c0_19, %c0_20] : memref<1x1x32xf32, #tpu.memory_space<vmem>>, vector<1x1x32xf32>
    %28 = vector.shape_cast %27 : vector<1x1x32xf32> to vector<1x32xf32>
    %29 = vector.broadcast %28 : vector<1x32xf32> to vector<8x32xf32>
    %30 = arith.addf %26, %29 : vector<8x32xf32>
    %c0_21 = arith.constant 0 : index
    %c0_22 = arith.constant 0 : index
    %c0_23 = arith.constant 0 : index
    %31 = vector.load %arg8[%c0_21, %c0_22, %c0_23] : memref<1x32x32xbf16, #tpu.memory_space<vmem>>, vector<1x32x32xbf16>
    %32 = vector.shape_cast %31 : vector<1x32x32xbf16> to vector<32x32xbf16>
    %cst_24 = arith.constant dense<0.000000e+00> : vector<8x32xf32>
    %33 = tpu.matmul %14, %32, %cst_24 {dimension_numbers = #tpu.dot_dimension_numbers<[1], [0], [0], [1], [0, 0, 1, 1], [], []>} : vector<8x32xbf16>, vector<32x32xbf16>, vector<8x32xf32> -> vector<8x32xf32>
    %c0_25 = arith.constant 0 : index
    %c0_26 = arith.constant 0 : index
    %c0_27 = arith.constant 0 : index
    %34 = vector.load %arg11[%c0_25, %c0_26, %c0_27] : memref<1x1x32xf32, #tpu.memory_space<vmem>>, vector<1x1x32xf32>
    %35 = vector.shape_cast %34 : vector<1x1x32xf32> to vector<1x32xf32>
    %36 = vector.broadcast %35 : vector<1x32xf32> to vector<8x32xf32>
    %37 = arith.addf %33, %36 : vector<8x32xf32>
    %c0_28 = arith.constant 0 : index
    %c0_29 = arith.constant 0 : index
    %c0_30 = arith.constant 0 : index
    %38 = vector.load %arg12[%c0_28, %c0_29, %c0_30] : memref<1x32x32xbf16, #tpu.memory_space<vmem>>, vector<1x32x32xbf16>
    %39 = vector.shape_cast %38 : vector<1x32x32xbf16> to vector<32x32xbf16>
    %c0_31 = arith.constant 0 : index
    %c0_32 = arith.constant 0 : index
    %c0_33 = arith.constant 0 : index
    %40 = vector.load %arg13[%c0_31, %c0_32, %c0_33] : memref<1x1x32xf32, #tpu.memory_space<vmem>>, vector<1x1x32xf32>
    %41 = vector.shape_cast %40 : vector<1x1x32xf32> to vector<1x32xf32>
    %42 = vector.extract_strided_slice %23 {offsets = [0, 0], sizes = [8, 8], strides = [1, 1]} : vector<8x32xf32> to vector<8x8xf32>
    %43 = arith.truncf %42 : vector<8x8xf32> to vector<8x8xbf16>
    %44 = vector.extract_strided_slice %30 {offsets = [0, 0], sizes = [8, 8], strides = [1, 1]} : vector<8x32xf32> to vector<8x8xf32>
    %45 = arith.truncf %44 : vector<8x8xf32> to vector<8x8xbf16>
    %46 = vector.extract_strided_slice %37 {offsets = [0, 0], sizes = [8, 8], strides = [1, 1]} : vector<8x32xf32> to vector<8x8xf32>
    %47 = arith.truncf %46 : vector<8x8xf32> to vector<8x8xbf16>
    %cst_34 = arith.constant dense<0.000000e+00> : vector<8x8xf32>
    %48 = tpu.matmul %43, %45, %cst_34 {dimension_numbers = #tpu.dot_dimension_numbers<[1], [1], [0], [0], [0, 0, 1, 0], [], []>} : vector<8x8xbf16>, vector<8x8xbf16>, vector<8x8xf32> -> vector<8x8xf32>
    %49 = arith.addf %48, %12 : vector<8x8xf32>
    %cst_35 = arith.constant dense<0xFF800000> : vector<8xf32>
    %50 = vector.multi_reduction <maximumf>, %49, %cst_35 [1] : vector<8x8xf32> to vector<8xf32>
    %51 = vector.shape_cast %50 : vector<8xf32> to vector<8x1xf32>
    %52 = vector.broadcast %51 : vector<8x1xf32> to vector<8x8xf32>
    %53 = arith.subf %49, %52 : vector<8x8xf32>
    %54 = math.exp %53 : vector<8x8xf32>
    %cst_36 = arith.constant dense<0.000000e+00> : vector<8xf32>
    %55 = vector.multi_reduction <add>, %54, %cst_36 [1] : vector<8x8xf32> to vector<8xf32>
    %56 = vector.shape_cast %55 : vector<8xf32> to vector<8x1xf32>
    %57 = vector.broadcast %56 : vector<8x1xf32> to vector<8x8xf32>
    %58 = arith.divf %54, %57 : vector<8x8xf32>
    %59 = arith.truncf %58 : vector<8x8xf32> to vector<8x8xbf16>
    %cst_37 = arith.constant dense<0.000000e+00> : vector<8x8xf32>
    %60 = tpu.matmul %59, %47, %cst_37 {dimension_numbers = #tpu.dot_dimension_numbers<[1], [0], [0], [1], [0, 0, 1, 1], [], []>} : vector<8x8xbf16>, vector<8x8xbf16>, vector<8x8xf32> -> vector<8x8xf32>
    %61 = vector.extract_strided_slice %23 {offsets = [0, 8], sizes = [8, 8], strides = [1, 1]} : vector<8x32xf32> to vector<8x8xf32>
    %62 = arith.truncf %61 : vector<8x8xf32> to vector<8x8xbf16>
    %63 = vector.extract_strided_slice %30 {offsets = [0, 8], sizes = [8, 8], strides = [1, 1]} : vector<8x32xf32> to vector<8x8xf32>
    %64 = arith.truncf %63 : vector<8x8xf32> to vector<8x8xbf16>
    %65 = vector.extract_strided_slice %37 {offsets = [0, 8], sizes = [8, 8], strides = [1, 1]} : vector<8x32xf32> to vector<8x8xf32>
    %66 = arith.truncf %65 : vector<8x8xf32> to vector<8x8xbf16>
    %cst_38 = arith.constant dense<0.000000e+00> : vector<8x8xf32>
    %67 = tpu.matmul %62, %64, %cst_38 {dimension_numbers = #tpu.dot_dimension_numbers<[1], [1], [0], [0], [0, 0, 1, 0], [], []>} : vector<8x8xbf16>, vector<8x8xbf16>, vector<8x8xf32> -> vector<8x8xf32>
    %68 = arith.addf %67, %12 : vector<8x8xf32>
    %cst_39 = arith.constant dense<0xFF800000> : vector<8xf32>
    %69 = vector.multi_reduction <maximumf>, %68, %cst_39 [1] : vector<8x8xf32> to vector<8xf32>
    %70 = vector.shape_cast %69 : vector<8xf32> to vector<8x1xf32>
    %71 = vector.broadcast %70 : vector<8x1xf32> to vector<8x8xf32>
    %72 = arith.subf %68, %71 : vector<8x8xf32>
    %73 = math.exp %72 : vector<8x8xf32>
    %cst_40 = arith.constant dense<0.000000e+00> : vector<8xf32>
    %74 = vector.multi_reduction <add>, %73, %cst_40 [1] : vector<8x8xf32> to vector<8xf32>
    %75 = vector.shape_cast %74 : vector<8xf32> to vector<8x1xf32>
    %76 = vector.broadcast %75 : vector<8x1xf32> to vector<8x8xf32>
    %77 = arith.divf %73, %76 : vector<8x8xf32>
    %78 = arith.truncf %77 : vector<8x8xf32> to vector<8x8xbf16>
    %cst_41 = arith.constant dense<0.000000e+00> : vector<8x8xf32>
    %79 = tpu.matmul %78, %66, %cst_41 {dimension_numbers = #tpu.dot_dimension_numbers<[1], [0], [0], [1], [0, 0, 1, 1], [], []>} : vector<8x8xbf16>, vector<8x8xbf16>, vector<8x8xf32> -> vector<8x8xf32>
    %80 = vector.extract_strided_slice %23 {offsets = [0, 16], sizes = [8, 8], strides = [1, 1]} : vector<8x32xf32> to vector<8x8xf32>
    %81 = arith.truncf %80 : vector<8x8xf32> to vector<8x8xbf16>
    %82 = vector.extract_strided_slice %30 {offsets = [0, 16], sizes = [8, 8], strides = [1, 1]} : vector<8x32xf32> to vector<8x8xf32>
    %83 = arith.truncf %82 : vector<8x8xf32> to vector<8x8xbf16>
    %84 = vector.extract_strided_slice %37 {offsets = [0, 16], sizes = [8, 8], strides = [1, 1]} : vector<8x32xf32> to vector<8x8xf32>
    %85 = arith.truncf %84 : vector<8x8xf32> to vector<8x8xbf16>
    %cst_42 = arith.constant dense<0.000000e+00> : vector<8x8xf32>
    %86 = tpu.matmul %81, %83, %cst_42 {dimension_numbers = #tpu.dot_dimension_numbers<[1], [1], [0], [0], [0, 0, 1, 0], [], []>} : vector<8x8xbf16>, vector<8x8xbf16>, vector<8x8xf32> -> vector<8x8xf32>
    %87 = arith.addf %86, %12 : vector<8x8xf32>
    %cst_43 = arith.constant dense<0xFF800000> : vector<8xf32>
    %88 = vector.multi_reduction <maximumf>, %87, %cst_43 [1] : vector<8x8xf32> to vector<8xf32>
    %89 = vector.shape_cast %88 : vector<8xf32> to vector<8x1xf32>
    %90 = vector.broadcast %89 : vector<8x1xf32> to vector<8x8xf32>
    %91 = arith.subf %87, %90 : vector<8x8xf32>
    %92 = math.exp %91 : vector<8x8xf32>
    %cst_44 = arith.constant dense<0.000000e+00> : vector<8xf32>
    %93 = vector.multi_reduction <add>, %92, %cst_44 [1] : vector<8x8xf32> to vector<8xf32>
    %94 = vector.shape_cast %93 : vector<8xf32> to vector<8x1xf32>
    %95 = vector.broadcast %94 : vector<8x1xf32> to vector<8x8xf32>
    %96 = arith.divf %92, %95 : vector<8x8xf32>
    %97 = arith.truncf %96 : vector<8x8xf32> to vector<8x8xbf16>
    %cst_45 = arith.constant dense<0.000000e+00> : vector<8x8xf32>
    %98 = tpu.matmul %97, %85, %cst_45 {dimension_numbers = #tpu.dot_dimension_numbers<[1], [0], [0], [1], [0, 0, 1, 1], [], []>} : vector<8x8xbf16>, vector<8x8xbf16>, vector<8x8xf32> -> vector<8x8xf32>
    %99 = vector.extract_strided_slice %23 {offsets = [0, 24], sizes = [8, 8], strides = [1, 1]} : vector<8x32xf32> to vector<8x8xf32>
    %100 = arith.truncf %99 : vector<8x8xf32> to vector<8x8xbf16>
    %101 = vector.extract_strided_slice %30 {offsets = [0, 24], sizes = [8, 8], strides = [1, 1]} : vector<8x32xf32> to vector<8x8xf32>
    %102 = arith.truncf %101 : vector<8x8xf32> to vector<8x8xbf16>
    %103 = vector.extract_strided_slice %37 {offsets = [0, 24], sizes = [8, 8], strides = [1, 1]} : vector<8x32xf32> to vector<8x8xf32>
    %104 = arith.truncf %103 : vector<8x8xf32> to vector<8x8xbf16>
    %cst_46 = arith.constant dense<0.000000e+00> : vector<8x8xf32>
    %105 = tpu.matmul %100, %102, %cst_46 {dimension_numbers = #tpu.dot_dimension_numbers<[1], [1], [0], [0], [0, 0, 1, 0], [], []>} : vector<8x8xbf16>, vector<8x8xbf16>, vector<8x8xf32> -> vector<8x8xf32>
    %106 = arith.addf %105, %12 : vector<8x8xf32>
    %cst_47 = arith.constant dense<0xFF800000> : vector<8xf32>
    %107 = vector.multi_reduction <maximumf>, %106, %cst_47 [1] : vector<8x8xf32> to vector<8xf32>
    %108 = vector.shape_cast %107 : vector<8xf32> to vector<8x1xf32>
    %109 = vector.broadcast %108 : vector<8x1xf32> to vector<8x8xf32>
    %110 = arith.subf %106, %109 : vector<8x8xf32>
    %111 = math.exp %110 : vector<8x8xf32>
    %cst_48 = arith.constant dense<0.000000e+00> : vector<8xf32>
    %112 = vector.multi_reduction <add>, %111, %cst_48 [1] : vector<8x8xf32> to vector<8xf32>
    %113 = vector.shape_cast %112 : vector<8xf32> to vector<8x1xf32>
    %114 = vector.broadcast %113 : vector<8x1xf32> to vector<8x8xf32>
    %115 = arith.divf %111, %114 : vector<8x8xf32>
    %116 = arith.truncf %115 : vector<8x8xf32> to vector<8x8xbf16>
    %cst_49 = arith.constant dense<0.000000e+00> : vector<8x8xf32>
    %117 = tpu.matmul %116, %104, %cst_49 {dimension_numbers = #tpu.dot_dimension_numbers<[1], [0], [0], [1], [0, 0, 1, 1], [], []>} : vector<8x8xbf16>, vector<8x8xbf16>, vector<8x8xf32> -> vector<8x8xf32>
    %118 = tpu.concatenate %60, %79, %98, %117 in 1 : vector<8x8xf32>, vector<8x8xf32>, vector<8x8xf32>, vector<8x8xf32> -> vector<8x32xf32>
    %119 = arith.truncf %118 : vector<8x32xf32> to vector<8x32xbf16>
    %cst_50 = arith.constant dense<0.000000e+00> : vector<8x32xf32>
    %120 = tpu.matmul %119, %39, %cst_50 {dimension_numbers = #tpu.dot_dimension_numbers<[1], [0], [0], [1], [0, 0, 1, 1], [], []>} : vector<8x32xbf16>, vector<32x32xbf16>, vector<8x32xf32> -> vector<8x32xf32>
    %121 = vector.broadcast %41 : vector<1x32xf32> to vector<8x32xf32>
    %122 = arith.addf %120, %121 : vector<8x32xf32>
    %123 = arith.addf %13, %122 : vector<8x32xf32>
    %c0_51 = arith.constant 0 : index
    %c0_52 = arith.constant 0 : index
    %c0_53 = arith.constant 0 : index
    %124 = vector.load %arg26[%c0_51, %c0_52, %c0_53] : memref<1x1x32xf32, #tpu.memory_space<vmem>>, vector<1x1x32xf32>
    %125 = vector.shape_cast %124 : vector<1x1x32xf32> to vector<1x32xf32>
    %c0_54 = arith.constant 0 : index
    %c0_55 = arith.constant 0 : index
    %c0_56 = arith.constant 0 : index
    %126 = vector.load %arg27[%c0_54, %c0_55, %c0_56] : memref<1x1x32xf32, #tpu.memory_space<vmem>>, vector<1x1x32xf32>
    %127 = vector.shape_cast %126 : vector<1x1x32xf32> to vector<1x32xf32>
    %cst_57 = arith.constant dense<0.000000e+00> : vector<8xf32>
    %128 = vector.multi_reduction <add>, %123, %cst_57 [1] : vector<8x32xf32> to vector<8xf32>
    %129 = vector.shape_cast %128 : vector<8xf32> to vector<8x1xf32>
    %cst_58 = arith.constant 3.200000e+01 : f32
    %130 = vector.broadcast %cst_58 : f32 to vector<8x1xf32>
    %131 = arith.divf %129, %130 : vector<8x1xf32>
    %132 = vector.broadcast %131 : vector<8x1xf32> to vector<8x32xf32>
    %133 = arith.subf %123, %132 : vector<8x32xf32>
    %134 = arith.mulf %133, %133 : vector<8x32xf32>
    %cst_59 = arith.constant dense<0.000000e+00> : vector<8xf32>
    %135 = vector.multi_reduction <add>, %134, %cst_59 [1] : vector<8x32xf32> to vector<8xf32>
    %136 = vector.shape_cast %135 : vector<8xf32> to vector<8x1xf32>
    %cst_60 = arith.constant 3.200000e+01 : f32
    %137 = vector.broadcast %cst_60 : f32 to vector<8x1xf32>
    %138 = arith.divf %136, %137 : vector<8x1xf32>
    %139 = vector.broadcast %131 : vector<8x1xf32> to vector<8x32xf32>
    %140 = arith.subf %123, %139 : vector<8x32xf32>
    %cst_61 = arith.constant 9.99999974E-6 : f32
    %141 = vector.broadcast %cst_61 : f32 to vector<8x1xf32>
    %142 = arith.addf %138, %141 : vector<8x1xf32>
    %143 = math.rsqrt %142 : vector<8x1xf32>
    %144 = vector.broadcast %143 : vector<8x1xf32> to vector<8x32xf32>
    %145 = arith.mulf %140, %144 : vector<8x32xf32>
    %146 = vector.broadcast %125 : vector<1x32xf32> to vector<8x32xf32>
    %147 = arith.mulf %145, %146 : vector<8x32xf32>
    %148 = vector.broadcast %127 : vector<1x32xf32> to vector<8x32xf32>
    %149 = arith.addf %147, %148 : vector<8x32xf32>
    %c0_62 = arith.constant 0 : index
    %c0_63 = arith.constant 0 : index
    %c0_64 = arith.constant 0 : index
    %150 = vector.load %arg3[%c0_62, %c0_63, %c0_64] : memref<1x8x32xf32, #tpu.memory_space<vmem>>, vector<1x8x32xf32>
    %151 = vector.shape_cast %150 : vector<1x8x32xf32> to vector<8x32xf32>
    %152 = arith.truncf %151 : vector<8x32xf32> to vector<8x32xbf16>
    %153 = arith.truncf %149 : vector<8x32xf32> to vector<8x32xbf16>
    %c0_65 = arith.constant 0 : index
    %c0_66 = arith.constant 0 : index
    %c0_67 = arith.constant 0 : index
    %154 = vector.load %arg14[%c0_65, %c0_66, %c0_67] : memref<1x32x32xbf16, #tpu.memory_space<vmem>>, vector<1x32x32xbf16>
    %155 = vector.shape_cast %154 : vector<1x32x32xbf16> to vector<32x32xbf16>
    %cst_68 = arith.constant dense<0.000000e+00> : vector<8x32xf32>
    %156 = tpu.matmul %153, %155, %cst_68 {dimension_numbers = #tpu.dot_dimension_numbers<[1], [0], [0], [1], [0, 0, 1, 1], [], []>} : vector<8x32xbf16>, vector<32x32xbf16>, vector<8x32xf32> -> vector<8x32xf32>
    %c0_69 = arith.constant 0 : index
    %c0_70 = arith.constant 0 : index
    %c0_71 = arith.constant 0 : index
    %157 = vector.load %arg17[%c0_69, %c0_70, %c0_71] : memref<1x1x32xf32, #tpu.memory_space<vmem>>, vector<1x1x32xf32>
    %158 = vector.shape_cast %157 : vector<1x1x32xf32> to vector<1x32xf32>
    %159 = vector.broadcast %158 : vector<1x32xf32> to vector<8x32xf32>
    %160 = arith.addf %156, %159 : vector<8x32xf32>
    %cst_72 = arith.constant 0.353553385 : f32
    %161 = vector.broadcast %cst_72 : f32 to vector<8x32xf32>
    %162 = arith.mulf %160, %161 : vector<8x32xf32>
    %c0_73 = arith.constant 0 : index
    %c0_74 = arith.constant 0 : index
    %c0_75 = arith.constant 0 : index
    %163 = vector.load %arg15[%c0_73, %c0_74, %c0_75] : memref<1x32x32xbf16, #tpu.memory_space<vmem>>, vector<1x32x32xbf16>
    %164 = vector.shape_cast %163 : vector<1x32x32xbf16> to vector<32x32xbf16>
    %cst_76 = arith.constant dense<0.000000e+00> : vector<8x32xf32>
    %165 = tpu.matmul %152, %164, %cst_76 {dimension_numbers = #tpu.dot_dimension_numbers<[1], [0], [0], [1], [0, 0, 1, 1], [], []>} : vector<8x32xbf16>, vector<32x32xbf16>, vector<8x32xf32> -> vector<8x32xf32>
    %c0_77 = arith.constant 0 : index
    %c0_78 = arith.constant 0 : index
    %c0_79 = arith.constant 0 : index
    %166 = vector.load %arg18[%c0_77, %c0_78, %c0_79] : memref<1x1x32xf32, #tpu.memory_space<vmem>>, vector<1x1x32xf32>
    %167 = vector.shape_cast %166 : vector<1x1x32xf32> to vector<1x32xf32>
    %168 = vector.broadcast %167 : vector<1x32xf32> to vector<8x32xf32>
    %169 = arith.addf %165, %168 : vector<8x32xf32>
    %c0_80 = arith.constant 0 : index
    %c0_81 = arith.constant 0 : index
    %c0_82 = arith.constant 0 : index
    %170 = vector.load %arg16[%c0_80, %c0_81, %c0_82] : memref<1x32x32xbf16, #tpu.memory_space<vmem>>, vector<1x32x32xbf16>
    %171 = vector.shape_cast %170 : vector<1x32x32xbf16> to vector<32x32xbf16>
    %cst_83 = arith.constant dense<0.000000e+00> : vector<8x32xf32>
    %172 = tpu.matmul %152, %171, %cst_83 {dimension_numbers = #tpu.dot_dimension_numbers<[1], [0], [0], [1], [0, 0, 1, 1], [], []>} : vector<8x32xbf16>, vector<32x32xbf16>, vector<8x32xf32> -> vector<8x32xf32>
    %c0_84 = arith.constant 0 : index
    %c0_85 = arith.constant 0 : index
    %c0_86 = arith.constant 0 : index
    %173 = vector.load %arg19[%c0_84, %c0_85, %c0_86] : memref<1x1x32xf32, #tpu.memory_space<vmem>>, vector<1x1x32xf32>
    %174 = vector.shape_cast %173 : vector<1x1x32xf32> to vector<1x32xf32>
    %175 = vector.broadcast %174 : vector<1x32xf32> to vector<8x32xf32>
    %176 = arith.addf %172, %175 : vector<8x32xf32>
    %c0_87 = arith.constant 0 : index
    %c0_88 = arith.constant 0 : index
    %c0_89 = arith.constant 0 : index
    %177 = vector.load %arg5[%c0_87, %c0_88, %c0_89] : memref<1x1x8xf32, #tpu.memory_space<vmem>>, vector<1x1x8xf32>
    %178 = vector.shape_cast %177 : vector<1x1x8xf32> to vector<1x8xf32>
    %c0_90 = arith.constant 0 : index
    %c0_91 = arith.constant 0 : index
    %c0_92 = arith.constant 0 : index
    %179 = vector.load %arg20[%c0_90, %c0_91, %c0_92] : memref<1x32x32xbf16, #tpu.memory_space<vmem>>, vector<1x32x32xbf16>
    %180 = vector.shape_cast %179 : vector<1x32x32xbf16> to vector<32x32xbf16>
    %c0_93 = arith.constant 0 : index
    %c0_94 = arith.constant 0 : index
    %c0_95 = arith.constant 0 : index
    %181 = vector.load %arg21[%c0_93, %c0_94, %c0_95] : memref<1x1x32xf32, #tpu.memory_space<vmem>>, vector<1x1x32xf32>
    %182 = vector.shape_cast %181 : vector<1x1x32xf32> to vector<1x32xf32>
    %183 = vector.extract_strided_slice %162 {offsets = [0, 0], sizes = [8, 8], strides = [1, 1]} : vector<8x32xf32> to vector<8x8xf32>
    %184 = arith.truncf %183 : vector<8x8xf32> to vector<8x8xbf16>
    %185 = vector.extract_strided_slice %169 {offsets = [0, 0], sizes = [8, 8], strides = [1, 1]} : vector<8x32xf32> to vector<8x8xf32>
    %186 = arith.truncf %185 : vector<8x8xf32> to vector<8x8xbf16>
    %187 = vector.extract_strided_slice %176 {offsets = [0, 0], sizes = [8, 8], strides = [1, 1]} : vector<8x32xf32> to vector<8x8xf32>
    %188 = arith.truncf %187 : vector<8x8xf32> to vector<8x8xbf16>
    %cst_96 = arith.constant dense<0.000000e+00> : vector<8x8xf32>
    %189 = tpu.matmul %184, %186, %cst_96 {dimension_numbers = #tpu.dot_dimension_numbers<[1], [1], [0], [0], [0, 0, 1, 0], [], []>} : vector<8x8xbf16>, vector<8x8xbf16>, vector<8x8xf32> -> vector<8x8xf32>
    %190 = vector.broadcast %178 : vector<1x8xf32> to vector<8x8xf32>
    %191 = arith.addf %189, %190 : vector<8x8xf32>
    %cst_97 = arith.constant dense<0xFF800000> : vector<8xf32>
    %192 = vector.multi_reduction <maximumf>, %191, %cst_97 [1] : vector<8x8xf32> to vector<8xf32>
    %193 = vector.shape_cast %192 : vector<8xf32> to vector<8x1xf32>
    %194 = vector.broadcast %193 : vector<8x1xf32> to vector<8x8xf32>
    %195 = arith.subf %191, %194 : vector<8x8xf32>
    %196 = math.exp %195 : vector<8x8xf32>
    %cst_98 = arith.constant dense<0.000000e+00> : vector<8xf32>
    %197 = vector.multi_reduction <add>, %196, %cst_98 [1] : vector<8x8xf32> to vector<8xf32>
    %198 = vector.shape_cast %197 : vector<8xf32> to vector<8x1xf32>
    %199 = vector.broadcast %198 : vector<8x1xf32> to vector<8x8xf32>
    %200 = arith.divf %196, %199 : vector<8x8xf32>
    %201 = arith.truncf %200 : vector<8x8xf32> to vector<8x8xbf16>
    %cst_99 = arith.constant dense<0.000000e+00> : vector<8x8xf32>
    %202 = tpu.matmul %201, %188, %cst_99 {dimension_numbers = #tpu.dot_dimension_numbers<[1], [0], [0], [1], [0, 0, 1, 1], [], []>} : vector<8x8xbf16>, vector<8x8xbf16>, vector<8x8xf32> -> vector<8x8xf32>
    %203 = vector.extract_strided_slice %162 {offsets = [0, 8], sizes = [8, 8], strides = [1, 1]} : vector<8x32xf32> to vector<8x8xf32>
    %204 = arith.truncf %203 : vector<8x8xf32> to vector<8x8xbf16>
    %205 = vector.extract_strided_slice %169 {offsets = [0, 8], sizes = [8, 8], strides = [1, 1]} : vector<8x32xf32> to vector<8x8xf32>
    %206 = arith.truncf %205 : vector<8x8xf32> to vector<8x8xbf16>
    %207 = vector.extract_strided_slice %176 {offsets = [0, 8], sizes = [8, 8], strides = [1, 1]} : vector<8x32xf32> to vector<8x8xf32>
    %208 = arith.truncf %207 : vector<8x8xf32> to vector<8x8xbf16>
    %cst_100 = arith.constant dense<0.000000e+00> : vector<8x8xf32>
    %209 = tpu.matmul %204, %206, %cst_100 {dimension_numbers = #tpu.dot_dimension_numbers<[1], [1], [0], [0], [0, 0, 1, 0], [], []>} : vector<8x8xbf16>, vector<8x8xbf16>, vector<8x8xf32> -> vector<8x8xf32>
    %210 = vector.broadcast %178 : vector<1x8xf32> to vector<8x8xf32>
    %211 = arith.addf %209, %210 : vector<8x8xf32>
    %cst_101 = arith.constant dense<0xFF800000> : vector<8xf32>
    %212 = vector.multi_reduction <maximumf>, %211, %cst_101 [1] : vector<8x8xf32> to vector<8xf32>
    %213 = vector.shape_cast %212 : vector<8xf32> to vector<8x1xf32>
    %214 = vector.broadcast %213 : vector<8x1xf32> to vector<8x8xf32>
    %215 = arith.subf %211, %214 : vector<8x8xf32>
    %216 = math.exp %215 : vector<8x8xf32>
    %cst_102 = arith.constant dense<0.000000e+00> : vector<8xf32>
    %217 = vector.multi_reduction <add>, %216, %cst_102 [1] : vector<8x8xf32> to vector<8xf32>
    %218 = vector.shape_cast %217 : vector<8xf32> to vector<8x1xf32>
    %219 = vector.broadcast %218 : vector<8x1xf32> to vector<8x8xf32>
    %220 = arith.divf %216, %219 : vector<8x8xf32>
    %221 = arith.truncf %220 : vector<8x8xf32> to vector<8x8xbf16>
    %cst_103 = arith.constant dense<0.000000e+00> : vector<8x8xf32>
    %222 = tpu.matmul %221, %208, %cst_103 {dimension_numbers = #tpu.dot_dimension_numbers<[1], [0], [0], [1], [0, 0, 1, 1], [], []>} : vector<8x8xbf16>, vector<8x8xbf16>, vector<8x8xf32> -> vector<8x8xf32>
    %223 = vector.extract_strided_slice %162 {offsets = [0, 16], sizes = [8, 8], strides = [1, 1]} : vector<8x32xf32> to vector<8x8xf32>
    %224 = arith.truncf %223 : vector<8x8xf32> to vector<8x8xbf16>
    %225 = vector.extract_strided_slice %169 {offsets = [0, 16], sizes = [8, 8], strides = [1, 1]} : vector<8x32xf32> to vector<8x8xf32>
    %226 = arith.truncf %225 : vector<8x8xf32> to vector<8x8xbf16>
    %227 = vector.extract_strided_slice %176 {offsets = [0, 16], sizes = [8, 8], strides = [1, 1]} : vector<8x32xf32> to vector<8x8xf32>
    %228 = arith.truncf %227 : vector<8x8xf32> to vector<8x8xbf16>
    %cst_104 = arith.constant dense<0.000000e+00> : vector<8x8xf32>
    %229 = tpu.matmul %224, %226, %cst_104 {dimension_numbers = #tpu.dot_dimension_numbers<[1], [1], [0], [0], [0, 0, 1, 0], [], []>} : vector<8x8xbf16>, vector<8x8xbf16>, vector<8x8xf32> -> vector<8x8xf32>
    %230 = vector.broadcast %178 : vector<1x8xf32> to vector<8x8xf32>
    %231 = arith.addf %229, %230 : vector<8x8xf32>
    %cst_105 = arith.constant dense<0xFF800000> : vector<8xf32>
    %232 = vector.multi_reduction <maximumf>, %231, %cst_105 [1] : vector<8x8xf32> to vector<8xf32>
    %233 = vector.shape_cast %232 : vector<8xf32> to vector<8x1xf32>
    %234 = vector.broadcast %233 : vector<8x1xf32> to vector<8x8xf32>
    %235 = arith.subf %231, %234 : vector<8x8xf32>
    %236 = math.exp %235 : vector<8x8xf32>
    %cst_106 = arith.constant dense<0.000000e+00> : vector<8xf32>
    %237 = vector.multi_reduction <add>, %236, %cst_106 [1] : vector<8x8xf32> to vector<8xf32>
    %238 = vector.shape_cast %237 : vector<8xf32> to vector<8x1xf32>
    %239 = vector.broadcast %238 : vector<8x1xf32> to vector<8x8xf32>
    %240 = arith.divf %236, %239 : vector<8x8xf32>
    %241 = arith.truncf %240 : vector<8x8xf32> to vector<8x8xbf16>
    %cst_107 = arith.constant dense<0.000000e+00> : vector<8x8xf32>
    %242 = tpu.matmul %241, %228, %cst_107 {dimension_numbers = #tpu.dot_dimension_numbers<[1], [0], [0], [1], [0, 0, 1, 1], [], []>} : vector<8x8xbf16>, vector<8x8xbf16>, vector<8x8xf32> -> vector<8x8xf32>
    %243 = vector.extract_strided_slice %162 {offsets = [0, 24], sizes = [8, 8], strides = [1, 1]} : vector<8x32xf32> to vector<8x8xf32>
    %244 = arith.truncf %243 : vector<8x8xf32> to vector<8x8xbf16>
    %245 = vector.extract_strided_slice %169 {offsets = [0, 24], sizes = [8, 8], strides = [1, 1]} : vector<8x32xf32> to vector<8x8xf32>
    %246 = arith.truncf %245 : vector<8x8xf32> to vector<8x8xbf16>
    %247 = vector.extract_strided_slice %176 {offsets = [0, 24], sizes = [8, 8], strides = [1, 1]} : vector<8x32xf32> to vector<8x8xf32>
    %248 = arith.truncf %247 : vector<8x8xf32> to vector<8x8xbf16>
    %cst_108 = arith.constant dense<0.000000e+00> : vector<8x8xf32>
    %249 = tpu.matmul %244, %246, %cst_108 {dimension_numbers = #tpu.dot_dimension_numbers<[1], [1], [0], [0], [0, 0, 1, 0], [], []>} : vector<8x8xbf16>, vector<8x8xbf16>, vector<8x8xf32> -> vector<8x8xf32>
    %250 = vector.broadcast %178 : vector<1x8xf32> to vector<8x8xf32>
    %251 = arith.addf %249, %250 : vector<8x8xf32>
    %cst_109 = arith.constant dense<0xFF800000> : vector<8xf32>
    %252 = vector.multi_reduction <maximumf>, %251, %cst_109 [1] : vector<8x8xf32> to vector<8xf32>
    %253 = vector.shape_cast %252 : vector<8xf32> to vector<8x1xf32>
    %254 = vector.broadcast %253 : vector<8x1xf32> to vector<8x8xf32>
    %255 = arith.subf %251, %254 : vector<8x8xf32>
    %256 = math.exp %255 : vector<8x8xf32>
    %cst_110 = arith.constant dense<0.000000e+00> : vector<8xf32>
    %257 = vector.multi_reduction <add>, %256, %cst_110 [1] : vector<8x8xf32> to vector<8xf32>
    %258 = vector.shape_cast %257 : vector<8xf32> to vector<8x1xf32>
    %259 = vector.broadcast %258 : vector<8x1xf32> to vector<8x8xf32>
    %260 = arith.divf %256, %259 : vector<8x8xf32>
    %261 = arith.truncf %260 : vector<8x8xf32> to vector<8x8xbf16>
    %cst_111 = arith.constant dense<0.000000e+00> : vector<8x8xf32>
    %262 = tpu.matmul %261, %248, %cst_111 {dimension_numbers = #tpu.dot_dimension_numbers<[1], [0], [0], [1], [0, 0, 1, 1], [], []>} : vector<8x8xbf16>, vector<8x8xbf16>, vector<8x8xf32> -> vector<8x8xf32>
    %263 = tpu.concatenate %202, %222, %242, %262 in 1 : vector<8x8xf32>, vector<8x8xf32>, vector<8x8xf32>, vector<8x8xf32> -> vector<8x32xf32>
    %264 = arith.truncf %263 : vector<8x32xf32> to vector<8x32xbf16>
    %cst_112 = arith.constant dense<0.000000e+00> : vector<8x32xf32>
    %265 = tpu.matmul %264, %180, %cst_112 {dimension_numbers = #tpu.dot_dimension_numbers<[1], [0], [0], [1], [0, 0, 1, 1], [], []>} : vector<8x32xbf16>, vector<32x32xbf16>, vector<8x32xf32> -> vector<8x32xf32>
    %266 = vector.broadcast %182 : vector<1x32xf32> to vector<8x32xf32>
    %267 = arith.addf %265, %266 : vector<8x32xf32>
    %268 = arith.addf %149, %267 : vector<8x32xf32>
    %c0_113 = arith.constant 0 : index
    %c0_114 = arith.constant 0 : index
    %c0_115 = arith.constant 0 : index
    %269 = vector.load %arg28[%c0_113, %c0_114, %c0_115] : memref<1x1x32xf32, #tpu.memory_space<vmem>>, vector<1x1x32xf32>
    %270 = vector.shape_cast %269 : vector<1x1x32xf32> to vector<1x32xf32>
    %c0_116 = arith.constant 0 : index
    %c0_117 = arith.constant 0 : index
    %c0_118 = arith.constant 0 : index
    %271 = vector.load %arg29[%c0_116, %c0_117, %c0_118] : memref<1x1x32xf32, #tpu.memory_space<vmem>>, vector<1x1x32xf32>
    %272 = vector.shape_cast %271 : vector<1x1x32xf32> to vector<1x32xf32>
    %cst_119 = arith.constant dense<0.000000e+00> : vector<8xf32>
    %273 = vector.multi_reduction <add>, %268, %cst_119 [1] : vector<8x32xf32> to vector<8xf32>
    %274 = vector.shape_cast %273 : vector<8xf32> to vector<8x1xf32>
    %cst_120 = arith.constant 3.200000e+01 : f32
    %275 = vector.broadcast %cst_120 : f32 to vector<8x1xf32>
    %276 = arith.divf %274, %275 : vector<8x1xf32>
    %277 = vector.broadcast %276 : vector<8x1xf32> to vector<8x32xf32>
    %278 = arith.subf %268, %277 : vector<8x32xf32>
    %279 = arith.mulf %278, %278 : vector<8x32xf32>
    %cst_121 = arith.constant dense<0.000000e+00> : vector<8xf32>
    %280 = vector.multi_reduction <add>, %279, %cst_121 [1] : vector<8x32xf32> to vector<8xf32>
    %281 = vector.shape_cast %280 : vector<8xf32> to vector<8x1xf32>
    %cst_122 = arith.constant 3.200000e+01 : f32
    %282 = vector.broadcast %cst_122 : f32 to vector<8x1xf32>
    %283 = arith.divf %281, %282 : vector<8x1xf32>
    %284 = vector.broadcast %276 : vector<8x1xf32> to vector<8x32xf32>
    %285 = arith.subf %268, %284 : vector<8x32xf32>
    %cst_123 = arith.constant 9.99999974E-6 : f32
    %286 = vector.broadcast %cst_123 : f32 to vector<8x1xf32>
    %287 = arith.addf %283, %286 : vector<8x1xf32>
    %288 = math.rsqrt %287 : vector<8x1xf32>
    %289 = vector.broadcast %288 : vector<8x1xf32> to vector<8x32xf32>
    %290 = arith.mulf %285, %289 : vector<8x32xf32>
    %291 = vector.broadcast %270 : vector<1x32xf32> to vector<8x32xf32>
    %292 = arith.mulf %290, %291 : vector<8x32xf32>
    %293 = vector.broadcast %272 : vector<1x32xf32> to vector<8x32xf32>
    %294 = arith.addf %292, %293 : vector<8x32xf32>
    %295 = arith.truncf %294 : vector<8x32xf32> to vector<8x32xbf16>
    %c0_124 = arith.constant 0 : index
    %c0_125 = arith.constant 0 : index
    %c0_126 = arith.constant 0 : index
    %296 = vector.load %arg22[%c0_124, %c0_125, %c0_126] : memref<1x32x64xbf16, #tpu.memory_space<vmem>>, vector<1x32x64xbf16>
    %297 = vector.shape_cast %296 : vector<1x32x64xbf16> to vector<32x64xbf16>
    %cst_127 = arith.constant dense<0.000000e+00> : vector<8x64xf32>
    %298 = tpu.matmul %295, %297, %cst_127 {dimension_numbers = #tpu.dot_dimension_numbers<[1], [0], [0], [1], [0, 0, 1, 1], [], []>} : vector<8x32xbf16>, vector<32x64xbf16>, vector<8x64xf32> -> vector<8x64xf32>
    %c0_128 = arith.constant 0 : index
    %c0_129 = arith.constant 0 : index
    %c0_130 = arith.constant 0 : index
    %299 = vector.load %arg23[%c0_128, %c0_129, %c0_130] : memref<1x1x64xf32, #tpu.memory_space<vmem>>, vector<1x1x64xf32>
    %300 = vector.shape_cast %299 : vector<1x1x64xf32> to vector<1x64xf32>
    %301 = vector.broadcast %300 : vector<1x64xf32> to vector<8x64xf32>
    %302 = arith.addf %298, %301 : vector<8x64xf32>
    %cst_131 = arith.constant 0.000000e+00 : f32
    %303 = vector.broadcast %cst_131 : f32 to vector<8x64xf32>
    %304 = arith.maximumf %302, %303 : vector<8x64xf32>
    %305 = arith.truncf %304 : vector<8x64xf32> to vector<8x64xbf16>
    %c0_132 = arith.constant 0 : index
    %c0_133 = arith.constant 0 : index
    %c0_134 = arith.constant 0 : index
    %306 = vector.load %arg24[%c0_132, %c0_133, %c0_134] : memref<1x64x32xbf16, #tpu.memory_space<vmem>>, vector<1x64x32xbf16>
    %307 = vector.shape_cast %306 : vector<1x64x32xbf16> to vector<64x32xbf16>
    %cst_135 = arith.constant dense<0.000000e+00> : vector<8x32xf32>
    %308 = tpu.matmul %305, %307, %cst_135 {dimension_numbers = #tpu.dot_dimension_numbers<[1], [0], [0], [1], [0, 0, 1, 1], [], []>} : vector<8x64xbf16>, vector<64x32xbf16>, vector<8x32xf32> -> vector<8x32xf32>
    %c0_136 = arith.constant 0 : index
    %c0_137 = arith.constant 0 : index
    %c0_138 = arith.constant 0 : index
    %309 = vector.load %arg25[%c0_136, %c0_137, %c0_138] : memref<1x1x32xf32, #tpu.memory_space<vmem>>, vector<1x1x32xf32>
    %310 = vector.shape_cast %309 : vector<1x1x32xf32> to vector<1x32xf32>
    %311 = vector.broadcast %310 : vector<1x32xf32> to vector<8x32xf32>
    %312 = arith.addf %308, %311 : vector<8x32xf32>
    %313 = arith.addf %294, %312 : vector<8x32xf32>
    %c0_139 = arith.constant 0 : index
    %c0_140 = arith.constant 0 : index
    %c0_141 = arith.constant 0 : index
    %314 = vector.load %arg30[%c0_139, %c0_140, %c0_141] : memref<1x1x32xf32, #tpu.memory_space<vmem>>, vector<1x1x32xf32>
    %315 = vector.shape_cast %314 : vector<1x1x32xf32> to vector<1x32xf32>
    %c0_142 = arith.constant 0 : index
    %c0_143 = arith.constant 0 : index
    %c0_144 = arith.constant 0 : index
    %316 = vector.load %arg31[%c0_142, %c0_143, %c0_144] : memref<1x1x32xf32, #tpu.memory_space<vmem>>, vector<1x1x32xf32>
    %317 = vector.shape_cast %316 : vector<1x1x32xf32> to vector<1x32xf32>
    %cst_145 = arith.constant dense<0.000000e+00> : vector<8xf32>
    %318 = vector.multi_reduction <add>, %313, %cst_145 [1] : vector<8x32xf32> to vector<8xf32>
    %319 = vector.shape_cast %318 : vector<8xf32> to vector<8x1xf32>
    %cst_146 = arith.constant 3.200000e+01 : f32
    %320 = vector.broadcast %cst_146 : f32 to vector<8x1xf32>
    %321 = arith.divf %319, %320 : vector<8x1xf32>
    %322 = vector.broadcast %321 : vector<8x1xf32> to vector<8x32xf32>
    %323 = arith.subf %313, %322 : vector<8x32xf32>
    %324 = arith.mulf %323, %323 : vector<8x32xf32>
    %cst_147 = arith.constant dense<0.000000e+00> : vector<8xf32>
    %325 = vector.multi_reduction <add>, %324, %cst_147 [1] : vector<8x32xf32> to vector<8xf32>
    %326 = vector.shape_cast %325 : vector<8xf32> to vector<8x1xf32>
    %cst_148 = arith.constant 3.200000e+01 : f32
    %327 = vector.broadcast %cst_148 : f32 to vector<8x1xf32>
    %328 = arith.divf %326, %327 : vector<8x1xf32>
    %329 = vector.broadcast %321 : vector<8x1xf32> to vector<8x32xf32>
    %330 = arith.subf %313, %329 : vector<8x32xf32>
    %cst_149 = arith.constant 9.99999974E-6 : f32
    %331 = vector.broadcast %cst_149 : f32 to vector<8x1xf32>
    %332 = arith.addf %328, %331 : vector<8x1xf32>
    %333 = math.rsqrt %332 : vector<8x1xf32>
    %334 = vector.broadcast %333 : vector<8x1xf32> to vector<8x32xf32>
    %335 = arith.mulf %330, %334 : vector<8x32xf32>
    %336 = vector.broadcast %315 : vector<1x32xf32> to vector<8x32xf32>
    %337 = arith.mulf %335, %336 : vector<8x32xf32>
    %338 = vector.broadcast %317 : vector<1x32xf32> to vector<8x32xf32>
    %339 = arith.addf %337, %338 : vector<8x32xf32>
    %c0_150 = arith.constant 0 : index
    %c0_151 = arith.constant 0 : index
    %340 = vector.load %arg33[%c0_150, %c0_151] : memref<8x32xf32, #tpu.memory_space<vmem>>, vector<8x32xf32>
    tpu.vector_store %arg33[%c0_150, %c0_151], %339 {strides = array<i32>} : memref<8x32xf32, #tpu.memory_space<vmem>>, vector<8x32xf32>,
    %c1_i32 = arith.constant 1 : i32
    %341 = arith.cmpi eq, %arg1, %c1_i32 : i32
    %342 = arith.extui %341 : i1 to i32
    %c0_i32_152 = arith.constant 0 : i32
    %343 = arith.cmpi ne, %342, %c0_i32_152 : i32
    scf.if %343 {
      %344 = vector.shape_cast %339 : vector<8x32xf32> to vector<1x8x32xf32>
      %c0_153 = arith.constant 0 : index
      %c0_154 = arith.constant 0 : index
      %c0_155 = arith.constant 0 : index
      %345 = vector.load %arg32[%c0_153, %c0_154, %c0_155] : memref<1x8x32xf32, #tpu.memory_space<vmem>>, vector<1x8x32xf32>
      tpu.vector_store %arg32[%c0_153, %c0_154, %c0_155], %344 {strides = array<i32>} : memref<1x8x32xf32, #tpu.memory_space<vmem>>, vector<1x8x32xf32>,
    } else {
    }
    return
  }
  func.func @transform_0(%arg0: i32, %arg1: i32) -> (i32, i32, i32) {
    %c0_i32 = arith.constant 0 : i32
    %c0_i32_0 = arith.constant 0 : i32
    %c0_i32_1 = arith.constant 0 : i32
    return %arg0, %c0_i32, %c0_i32_0 : i32, i32, i32
  }
  func.func @transform_1(%arg0: i32, %arg1: i32) -> (i32, i32, i32) {
    %c0_i32 = arith.constant 0 : i32
    %c0_i32_0 = arith.constant 0 : i32
    %c0_i32_1 = arith.constant 0 : i32
    return %arg0, %c0_i32, %c0_i32_0 : i32, i32, i32
  }
  func.func @transform_2(%arg0: i32, %arg1: i32) -> (i32, i32, i32) {
    %c0_i32 = arith.constant 0 : i32
    %c0_i32_0 = arith.constant 0 : i32
    %c0_i32_1 = arith.constant 0 : i32
    return %arg0, %c0_i32, %c0_i32_0 : i32, i32, i32
  }
  func.func @transform_3(%arg0: i32, %arg1: i32) -> (i32, i32, i32) {
    %c0_i32 = arith.constant 0 : i32
    %c0_i32_0 = arith.constant 0 : i32
    %c0_i32_1 = arith.constant 0 : i32
    return %arg0, %c0_i32, %c0_i32_0 : i32, i32, i32
  }
  func.func @transform_4(%arg0: i32, %arg1: i32) -> (i32, i32, i32) {
    %c0_i32 = arith.constant 0 : i32
    %c0_i32_0 = arith.constant 0 : i32
    %c0_i32_1 = arith.constant 0 : i32
    return %arg1, %c0_i32, %c0_i32_0 : i32, i32, i32
  }
  func.func @transform_5(%arg0: i32, %arg1: i32) -> (i32, i32, i32) {
    %c0_i32 = arith.constant 0 : i32
    %c0_i32_0 = arith.constant 0 : i32
    %c0_i32_1 = arith.constant 0 : i32
    return %arg1, %c0_i32, %c0_i32_0 : i32, i32, i32
  }
  func.func @transform_6(%arg0: i32, %arg1: i32) -> (i32, i32, i32) {
    %c0_i32 = arith.constant 0 : i32
    %c0_i32_0 = arith.constant 0 : i32
    %c0_i32_1 = arith.constant 0 : i32
    return %arg1, %c0_i32, %c0_i32_0 : i32, i32, i32
  }
  func.func @transform_7(%arg0: i32, %arg1: i32) -> (i32, i32, i32) {
    %c0_i32 = arith.constant 0 : i32
    %c0_i32_0 = arith.constant 0 : i32
    %c0_i32_1 = arith.constant 0 : i32
    return %arg1, %c0_i32, %c0_i32_0 : i32, i32, i32
  }
  func.func @transform_8(%arg0: i32, %arg1: i32) -> (i32, i32, i32) {
    %c0_i32 = arith.constant 0 : i32
    %c0_i32_0 = arith.constant 0 : i32
    %c0_i32_1 = arith.constant 0 : i32
    return %arg1, %c0_i32, %c0_i32_0 : i32, i32, i32
  }
  func.func @transform_9(%arg0: i32, %arg1: i32) -> (i32, i32, i32) {
    %c0_i32 = arith.constant 0 : i32
    %c0_i32_0 = arith.constant 0 : i32
    %c0_i32_1 = arith.constant 0 : i32
    return %arg1, %c0_i32, %c0_i32_0 : i32, i32, i32
  }
  func.func @transform_10(%arg0: i32, %arg1: i32) -> (i32, i32, i32) {
    %c0_i32 = arith.constant 0 : i32
    %c0_i32_0 = arith.constant 0 : i32
    %c0_i32_1 = arith.constant 0 : i32
    return %arg1, %c0_i32, %c0_i32_0 : i32, i32, i32
  }
  func.func @transform_11(%arg0: i32, %arg1: i32) -> (i32, i32, i32) {
    %c0_i32 = arith.constant 0 : i32
    %c0_i32_0 = arith.constant 0 : i32
    %c0_i32_1 = arith.constant 0 : i32
    return %arg1, %c0_i32, %c0_i32_0 : i32, i32, i32
  }
  func.func @transform_12(%arg0: i32, %arg1: i32) -> (i32, i32, i32) {
    %c0_i32 = arith.constant 0 : i32
    %c0_i32_0 = arith.constant 0 : i32
    %c0_i32_1 = arith.constant 0 : i32
    return %arg1, %c0_i32, %c0_i32_0 : i32, i32, i32
  }
  func.func @transform_13(%arg0: i32, %arg1: i32) -> (i32, i32, i32) {
    %c0_i32 = arith.constant 0 : i32
    %c0_i32_0 = arith.constant 0 : i32
    %c0_i32_1 = arith.constant 0 : i32
    return %arg1, %c0_i32, %c0_i32_0 : i32, i32, i32
  }
  func.func @transform_14(%arg0: i32, %arg1: i32) -> (i32, i32, i32) {
    %c0_i32 = arith.constant 0 : i32
    %c0_i32_0 = arith.constant 0 : i32
    %c0_i32_1 = arith.constant 0 : i32
    return %arg1, %c0_i32, %c0_i32_0 : i32, i32, i32
  }
  func.func @transform_15(%arg0: i32, %arg1: i32) -> (i32, i32, i32) {
    %c0_i32 = arith.constant 0 : i32
    %c0_i32_0 = arith.constant 0 : i32
    %c0_i32_1 = arith.constant 0 : i32
    return %arg1, %c0_i32, %c0_i32_0 : i32, i32, i32
  }
  func.func @transform_16(%arg0: i32, %arg1: i32) -> (i32, i32, i32) {
    %c0_i32 = arith.constant 0 : i32
    %c0_i32_0 = arith.constant 0 : i32
    %c0_i32_1 = arith.constant 0 : i32
    return %arg1, %c0_i32, %c0_i32_0 : i32, i32, i32
  }
  func.func @transform_17(%arg0: i32, %arg1: i32) -> (i32, i32, i32) {
    %c0_i32 = arith.constant 0 : i32
    %c0_i32_0 = arith.constant 0 : i32
    %c0_i32_1 = arith.constant 0 : i32
    return %arg1, %c0_i32, %c0_i32_0 : i32, i32, i32
  }
  func.func @transform_18(%arg0: i32, %arg1: i32) -> (i32, i32, i32) {
    %c0_i32 = arith.constant 0 : i32
    %c0_i32_0 = arith.constant 0 : i32
    %c0_i32_1 = arith.constant 0 : i32
    return %arg1, %c0_i32, %c0_i32_0 : i32, i32, i32
  }
  func.func @transform_19(%arg0: i32, %arg1: i32) -> (i32, i32, i32) {
    %c0_i32 = arith.constant 0 : i32
    %c0_i32_0 = arith.constant 0 : i32
    %c0_i32_1 = arith.constant 0 : i32
    return %arg1, %c0_i32, %c0_i32_0 : i32, i32, i32
  }
  func.func @transform_20(%arg0: i32, %arg1: i32) -> (i32, i32, i32) {
    %c0_i32 = arith.constant 0 : i32
    %c0_i32_0 = arith.constant 0 : i32
    %c0_i32_1 = arith.constant 0 : i32
    return %arg1, %c0_i32, %c0_i32_0 : i32, i32, i32
  }
  func.func @transform_21(%arg0: i32, %arg1: i32) -> (i32, i32, i32) {
    %c0_i32 = arith.constant 0 : i32
    %c0_i32_0 = arith.constant 0 : i32
    %c0_i32_1 = arith.constant 0 : i32
    return %arg1, %c0_i32, %c0_i32_0 : i32, i32, i32
  }
  func.func @transform_22(%arg0: i32, %arg1: i32) -> (i32, i32, i32) {
    %c0_i32 = arith.constant 0 : i32
    %c0_i32_0 = arith.constant 0 : i32
    %c0_i32_1 = arith.constant 0 : i32
    return %arg1, %c0_i32, %c0_i32_0 : i32, i32, i32
  }
  func.func @transform_23(%arg0: i32, %arg1: i32) -> (i32, i32, i32) {
    %c0_i32 = arith.constant 0 : i32
    %c0_i32_0 = arith.constant 0 : i32
    %c0_i32_1 = arith.constant 0 : i32
    return %arg1, %c0_i32, %c0_i32_0 : i32, i32, i32
  }
  func.func @transform_24(%arg0: i32, %arg1: i32) -> (i32, i32, i32) {
    %c0_i32 = arith.constant 0 : i32
    %c0_i32_0 = arith.constant 0 : i32
    %c0_i32_1 = arith.constant 0 : i32
    return %arg1, %c0_i32, %c0_i32_0 : i32, i32, i32
  }
  func.func @transform_25(%arg0: i32, %arg1: i32) -> (i32, i32, i32) {
    %c0_i32 = arith.constant 0 : i32
    %c0_i32_0 = arith.constant 0 : i32
    %c0_i32_1 = arith.constant 0 : i32
    return %arg1, %c0_i32, %c0_i32_0 : i32, i32, i32
  }
  func.func @transform_26(%arg0: i32, %arg1: i32) -> (i32, i32, i32) {
    %c0_i32 = arith.constant 0 : i32
    %c0_i32_0 = arith.constant 0 : i32
    %c0_i32_1 = arith.constant 0 : i32
    return %arg1, %c0_i32, %c0_i32_0 : i32, i32, i32
  }
  func.func @transform_27(%arg0: i32, %arg1: i32) -> (i32, i32, i32) {
    %c0_i32 = arith.constant 0 : i32
    %c0_i32_0 = arith.constant 0 : i32
    %c0_i32_1 = arith.constant 0 : i32
    return %arg1, %c0_i32, %c0_i32_0 : i32, i32, i32
  }
  func.func @transform_28(%arg0: i32, %arg1: i32) -> (i32, i32, i32) {
    %c0_i32 = arith.constant 0 : i32
    %c0_i32_0 = arith.constant 0 : i32
    %c0_i32_1 = arith.constant 0 : i32
    return %arg1, %c0_i32, %c0_i32_0 : i32, i32, i32
  }
  func.func @transform_29(%arg0: i32, %arg1: i32) -> (i32, i32, i32) {
    %c0_i32 = arith.constant 0 : i32
    %c0_i32_0 = arith.constant 0 : i32
    %c0_i32_1 = arith.constant 0 : i32
    return %arg1, %c0_i32, %c0_i32_0 : i32, i32, i32
  }
  func.func @transform_30(%arg0: i32, %arg1: i32) -> (i32, i32, i32) {
    %c0_i32 = arith.constant 0 : i32
    %c0_i32_0 = arith.constant 0 : i32
    %c0_i32_1 = arith.constant 0 : i32
    return %arg0, %c0_i32, %c0_i32_0 : i32, i32, i32
  }
}

</mosaic_0001>

<bundles_post_ra>
// kernel: mini_transformer_forward.5
= control target key start
LH: loop header
LB: loop body
LE: loop exit
PB: predicated region body
PF: predicated region fallthrough
CT: control target
= control target key end

     0   :  { %10 = vsyncpa [#allocation3], 0  ;;  %s678_s0 = inlined_call_operand.vmem [shape: f32[2,8,32], index: 0, kind: input, shape index: {}]   ;;  %s679_s1 = inlined_call_operand.vmem [shape: f32[1,32], index: 1, kind: input, shape index: {}]   ;;  %s680_s2 = inlined_call_operand.vmem [shape: f32[1,32], index: 2, kind: input, shape index: {}]   ;;  %s681_s3 = inlined_call_operand.vmem [shape: bf16[32,128], index: 3, kind: input, shape index: {}]   ;;  %s682_s4 = inlined_call_operand.vmem [shape: f32[1,128], index: 4, kind: input, shape index: {}]   ;;  %s683_s5 = inlined_call_operand.hbm [shape: f32[2,8,128], index: 5, kind: output, shape index: {}]  }
   0x1   :  { %12 = vsyncpa [#allocation3 + $0x1], 0  ;;  %s561_s18 = smov 0   ;;  %s563_s19 = smov 0  }
   0x2   :  { %s565_s20 = smov 0   ;;  %s567_s21 = smov 0  }
   0x3 LB: > { %s582_s22 = sadd.s32 4294967295, %s526_s21   ;;  %s394_s23 = sadd.s32 4294967294, %s526_s21   ;;  %s526_s21 = sphi %s567_s21, %s689_s21   ;;  %s522_s20 = sphi %s565_s20, %s688_s20   ;;  %s518_s19 = sphi %s563_s19, %s687_s19   ;;  %s514_s18 = sphi %s561_s18, %s686_s18  }
   0x4   : > { %s586_s24 = sadd.s32 1, %s526_s21   ;;  %s135_s25 = sadd.s32 1, %s522_s20 }
   0x5   : > { %s132_s26 = ssub.s32 %s526_s21, %s586_s24  ;;  %p145_p0 = scmp.ne.s32.totalorder %s522_s20, %s518_s19 }
   0x6   : > { %p133_p1 = scmp.eq.s32.totalorder %s132_s26, 0  ;;  %p146_p2 = scmp.eq.s32.totalorder %s582_s22, 1 }
   0x7   : > { %p151_p3 = scmp.ne.s32.totalorder %s518_s19, %s514_s18  ;;  %p152_p4 = scmp.eq.s32.totalorder %s394_s23, 1 }
   0x8   : > { %s597_s27 = scalar_select %p133_p1, %s522_s20, %s135_s25  }
   0x9   : > { %p599_p5 = por %p146_p2, %p145_p0  ;;  %p603_p6 = por %p152_p4, %p151_p3 }
   0xa   : > { %p397_p7 = scmp.ge.s32.totalorder %s526_s21, 1  ;;  %p189_p8 = scmp.lt.s32.totalorder %s526_s21, 3 }
   0xc   : > { %p190_p9 = pnand %p397_p7, %p189_p8 }
   0xd   : > { %p216_p10 = scmp.lt.s32.totalorder (!%p190_p9), %s582_s22, 1  ;;  %s213_s23 = sand.u32 (!%p190_p9), 1, %s518_s19  }
   0xe   : > { %193 = sbr.rel (%p190_p9) target bundleno = 543 (0x21f), region = 40  ;;  %s398_s25 = sshll.u32 (!%p190_p9), %s213_s23, 3 }
   0xf   : > { %s215_s7 = scalar_lea.vmem (!%p190_p9), [#allocation2], %s398_s25  ;;  %s322_s12 = scalar_lea.sflag (!%p190_p9), [#allocation3], %s213_s23 }
  0x10   : > { %s335_s8 = sshll.u32 (!%p190_p9), %s215_s7, 4  ;;  %s639_s8 = int_to_ptr.vmem [resolvable:$true] %s335_s8 }
  0x11   : > { %s466_s13 = scalar_lea.vmem (!%p190_p9), %s639_s8, 128 }
  0x12   : > { %p467_p11 = scmp.ne.s32.totalorder (!%p190_p9), %s639_s8, %s466_s13 }
  0x13   : > { %s217_s30 = scalar_select %p216_p10, %s582_s22, 1  ;;  %vm224_vm0 = vcmask 261120   ;;  %v462_v7 = vld [vmem:[%s681_s3 + $0x8] sm:$0xff]   ;;  %v528_v8 = vmov 0.0   ;;  %vm529_vm1 = vmmov 0   ;;  %v463_v9 = vld [vmem:[%s681_s3] sm:$0xff]  }
  0x14   : > { %413 = vmatprep.subr.bf16.mxu0 %v528_v8  ;;  %417 = vmatprep.mubr.msk.bf16.mxu0 %vm529_vm1, %v528_v8  ;;  %v400_v14 = vld [vmem:[%s679_s1] ss:$0 sm:$0xff]  ;;  %p468_p12 = pnand %p467_p11, %p599_p5 }
  0x15   : > { %s399_s6 = sshll.u32 %s217_s30, 3  ;;  %414 = vmatpush3.bf16.msra.mxu0 %v462_v7  ;;  %v401_v16 = vld [vmem:[%s680_s2] ss:$0 sm:$0xff] }
  0x16   : > { %s219_s9 = scalar_lea.vmem %s678_s0, %s399_s6  ;;  %415 = vmatprep.subr.bf16.mxu0 %v528_v8  ;;  %v402_v20 = vld [vmem:[%s682_s4] ss:$0 sm:$0xff]  ;;  %s407_s6 = sshll.u32 %s582_s22, 7 }
  0x17   : > { %v221_v0 = vld [vmem:[%s219_s9] sm:$0xff]  ;;  %s637_s11 = scalar_lea.hbm %s683_s5, %s407_s6  ;;  %p469_p13 = pneg %p468_p12 }
  0x18   : > { %v225_v1 = vsel %vm224_vm0, %v221_v0, 0.0  ;;  %s530_s22 = smov [#allocation2]  }
  0x19   : > { %226 = vadd.xlane.f32.xlu0 %v225_v1  ;;  %416 = vmatpush3.bf16.msra.mxu0 %v463_v9  ;;  %s470_s14 = sshll.u32 %s530_s22, 4  ;;  %s471_s14 = int_to_ptr.vmem [resolvable:$false] %s470_s14 }
  0x1a   : > { %s472_s15 = scalar_lea.vmem %s471_s14, 256  ;;  %p473_p0 = scmp.lt.s32.totalorder %s639_s8, %s471_s14 }
  0x1b   : > { %p474_p1 = scmp.lt.s32.totalorder %s472_s15, %s466_s13 }
  0x1d   : > { %p475_p2 = por %p474_p1, %p473_p0 }
  0x1f   : > { %p476_p3 = pnand %p475_p2, %p469_p13 }
  0xa2   : > { %v227_v2 = vpop.xlane.xlu0 %226 }
  0xa3   : > { %v229_v3 = vmul.f32 0.03125, %v227_v2 }
  0xa5   : > { %v230_v4 = vsub.f32 %v221_v0, %v229_v3 }
  0xa7   : > { %v231_v5 = vmul.f32 %v230_v4, %v230_v4 }
  0xa9   : > { %v232_v6 = vsel %vm224_vm0, %v231_v5, 0.0 }
  0xaa   : > { %233 = vadd.xlane.f32.xlu0 %v232_v6 }
 0x133   : > { %v234_v10 = vpop.xlane.xlu0 %233 }
 0x134   : > { %v235_v11 = vmul.f32 0.03125, %v234_v10 }
 0x136   : > { %v236_v12 = vadd.f32 1e-05, %v235_v11 }
 0x138   : > { %464 = vrsqrt.f32 %v236_v12 }
 0x145   : > { %v465_v13 = vpop.eup %464 }
 0x146   : > { %v238_v15 = vmul.f32 %v465_v13, %v230_v4 }
 0x148   : > { %v245_v17 = vmul.f32 %v400_v14, %v238_v15 }
 0x14a   : > { %v252_v18 = vadd.f32 %v401_v16, %v245_v17 }
 0x14c   : > { %v253_v19 = vpack.c.bf16 %v252_v18, %v252_v18 }
 0x14e   : > { %418 = vmatmul.mubr.msk.bf16.vlgmr.msra.gmra.mxu0 %vm224_vm0, %v253_v19 }
 0x20e   : > { %v314_v21 = vpop.f32.mrf.mxu0 }
 0x20f   : > { %v315_v22 = vadd.f32 %v402_v20, %v314_v21 }
 0x210   : > { %v419_v23 = vpop.f32.mrf.mxu0 }
 0x211   : > { %320 = vst [vmem:[%s215_s7] sm:$0xff] %v315_v22 }
 0x212   : > { %v317_v24 = vpop.f32.mrf.mxu0 }
 0x213   : > { %479 = shalt.err (!%p476_p3)
}
 0x214   : > { %s480_s16 = scalar_lea.hbm %s637_s11, 128  ;;  %s484_s25 = scalar_lea.hbm %s683_s5, 256 }
 0x215   : > { %p481_p4 = scmp.ne.s32.totalorder %s637_s11, %s480_s16  ;;  %p485_p9 = scmp.lt.s32.totalorder %s637_s11, %s683_s5 }
 0x216   : > { %p486_p10 = scmp.lt.s32.totalorder %s484_s25, %s480_s16 }
 0x217   : > { %p482_p7 = pnand %p481_p4, %p599_p5 }
 0x218   : > { %p487_p11 = por %p486_p10, %p485_p9 }
 0x219   : > { %p483_p8 = pneg %p482_p7 }
 0x21b   : > { %p488_p12 = pnand %p487_p11, %p483_p8 }
 0x21d   : > { %491 = shalt.err (!%p488_p12)
}
 0x21e   : > { %421 = dma.vmem_to_hbm [thread:$0]  (%p599_p5), %s639_s8, 128, %s637_s11, %s322_s12   ;;  %v420_v25 = vpop.f32.mrf.mxu0 }
 0x21f PF: > { %p427_p13 = scmp.ge.s32.totalorder %s526_s21, 2  ;;  %s347_s6 = sand.u32 1, %s514_s18  }
 0x220   : > { %s348_s7 = scalar_lea.sflag [#allocation3], %s347_s6 }
 0x221   : > { %p424_p0 = pnand %p427_p13, %p603_p6 }
 0x223   : > { %p425_p1 = pneg %p424_p0 }
 0x225   : > { %509 = dma.done.wait (%p425_p1), %s348_s7, 128  }
 0x226   : > { %511 = vsyncadd (%p425_p1), %s348_s7, 4294967168  ;;  %p15_p2 = scmp.ge.s32.totalorder %s586_s24, 4   ;;  %s686_s18 = smov %s518_s19 }
 0x227   : > { %s687_s19 = smov %s522_s20  ;;  %s688_s20 = smov %s597_s27 }
 0x228   : > { %s689_s21 = smov %s586_s24  ;;  %17 = sbr.rel (!%p15_p2) target bundleno = 3 (0x3), region = 75 }
 0x22d   :  { %353 = vsyncpa [#allocation3], 1 }
 0x22e   :  { %355 = vsyncpa [#allocation3 + $0x1], 1 }

// kernel: mini_transformer_forward.3
= control target key start
LH: loop header
LB: loop body
LE: loop exit
PB: predicated region body
PF: predicated region fallthrough
CT: control target
= control target key end

     0   :  { %s2576_s22 = smov 0   ;;  %s2578_s23 = smov 0   ;;  %s2888_s0 = inlined_call_operand.vmem [shape: f32[2,8,32], index: 0, kind: input, shape index: {}]   ;;  %s2889_s1 = inlined_call_operand.vmem [shape: f32[2,1,8], index: 1, kind: input, shape index: {}]   ;;  %s2890_s2 = inlined_call_operand.vmem [shape: bf16[2,32,32], index: 2, kind: input, shape index: {}]   ;;  %s2891_s3 = inlined_call_operand.vmem [shape: bf16[2,32,32], index: 3, kind: input, shape index: {}]   ;;  %s2892_s4 = inlined_call_operand.vmem [shape: bf16[2,32,32], index: 4, kind: input, shape index: {}]   ;;  %s2893_s5 = inlined_call_operand.vmem [shape: f32[2,1,32], index: 5, kind: input, shape index: {}]   ;;  %s2894_s6 = inlined_call_operand.vmem [shape: f32[2,1,32], index: 6, kind: input, shape index: {}]   ;;  %s2895_s7 = inlined_call_operand.vmem [shape: f32[2,1,32], index: 7, kind: input, shape index: {}]   ;;  %s2896_s8 = inlined_call_operand.vmem [shape: bf16[2,32,32], index: 8, kind: input, shape index: {}]   ;;  %s2897_s9 = inlined_call_operand.vmem [shape: f32[2,1,32], index: 9, kind: input, shape index: {}]   ;;  %s2898_s10 = inlined_call_operand.vmem [shape: bf16[2,32,64], index: 10, kind: input, shape index: {}]   ;;  %s2899_s11 = inlined_call_operand.vmem [shape: f32[2,1,64], index: 11, kind: input, shape index: {}]   ;;  %s2900_s12 = inlined_call_operand.vmem [shape: bf16[2,64,32], index: 12, kind: input, shape index: {}]   ;;  %s2901_s13 = inlined_call_operand.vmem [shape: f32[2,1,32], index: 13, kind: input, shape index: {}]   ;;  %s2902_s14 = inlined_call_operand.vmem [shape: f32[2,1,32], index: 14, kind: input, shape index: {}]   ;;  %s2903_s15 = inlined_call_operand.vmem [shape: f32[2,1,32], index: 15, kind: input, shape index: {}]   ;;  %s2904_s16 = inlined_call_operand.vmem [shape: f32[2,1,32], index: 16, kind: input, shape index: {}]   ;;  %s2905_s17 = inlined_call_operand.vmem [shape: f32[2,1,32], index: 17, kind: input, shape index: {}]   ;;  %s2906_s18 = inlined_call_operand.vmem [shape: f32[1,32], index: 18, kind: input, shape index: {}]   ;;  %s2907_s19 = inlined_call_operand.vmem [shape: f32[1,32], index: 19, kind: input, shape index: {}]   ;;  %s2908_s20 = inlined_call_operand.vmem [shape: f32[2,8,32], index: 20, kind: output, shape index: {}]  }
   0x1   :  { %2917 = sst [smem:[#allocation13_spill]] %s2888_s0  ;;  %s2580_s24 = smov 0  }
   0x2   :  { %2918 = sst [smem:[#allocation14_spill]] %s2889_s1  ;;  %s2574_s1 = smov 0  }
   0x3   :  { %2919 = sst [smem:[#allocation15_spill]] %s2890_s2  ;;  %s2582_s2 = smov 0  }
   0x4   :  { %2920 = sst [smem:[#allocation16_spill]] %s2891_s3 }
   0x5   :  { %2921 = sst [smem:[#allocation17_spill]] %s2892_s4 }
   0x6   :  { %2922 = sst [smem:[#allocation18_spill]] %s2896_s8 }
   0x7   :  { %2923 = sst [smem:[#allocation19_spill]] %s2898_s10 }
   0x8   :  { %2924 = sst [smem:[#allocation20_spill]] %s2899_s11 }
   0x9   :  { %2925 = sst [smem:[#allocation21_spill]] %s2900_s12 }
   0xa   :  { %2926 = sst [smem:[#allocation22_spill]] %s2901_s13 }
   0xb   :  { %2927 = sst [smem:[#allocation23_spill]] %s2903_s15 }
   0xc   :  { %2928 = sst [smem:[#allocation24_spill]] %s2904_s16 }
   0xd   :  { %2929 = sst [smem:[#allocation25_spill]] %s2905_s17 }
   0xe   :  { %2930 = sst [smem:[#allocation26_spill]] %s2906_s18 }
   0xf   :  { %2931 = sst [smem:[#allocation27_spill]] %s2907_s19 }
  0x10   :  { %2932 = sst [smem:[#allocation28_spill]] %s2908_s20 }
  0x11 LB: > { %2933 = sst [smem:[#allocation3_spill]] %s2443_s1  ;;  %s39_s25 = sadd.s32 1, %s2451_s23  ;;  %s2459_s2 = sphi %s2582_s2, %s30_s2   ;;  %s2455_s24 = sphi %s2580_s24, %s2982_s24   ;;  %s2451_s23 = sphi %s2578_s23, %s2981_s23   ;;  %s2447_s22 = sphi %s2576_s22, %s2980_s22   ;;  %s2443_s1 = sphi %s2574_s1, %s2979_s1  }
  0x12   : > { %2934 = sst [smem:[#allocation4_spill]] %s2451_s23  ;;  %s42_s3 = sadd.s32 1, %s2455_s24 }
  0x13   : > { %2935 = sst [smem:[#allocation5_spill]] %s2455_s24  ;;  %p40_p0 = scmp.ge.s32.totalorder %s39_s25, 2 }
  0x14   : > { %2936 = sst [smem:[#allocation6_spill]] %s2459_s2  ;;  %p2135_p1 = scmp.ge.s32.totalorder %s2459_s2, 1 }
  0x15   : > { %p721_p2 = scmp.lt.s32.totalorder %s2459_s2, 5  ;;  %s2984_s25 = smov (%p40_p0, %s39_s25), 0 }
  0x16   : > { %2937 = sst [smem:[#allocation7_spill]] %s2984_s25  ;;  %s2986_s3 = smov (!%p40_p0, %s42_s3), %s2455_s24 }
  0x17   : > { %p722_p3 = pnand %p2135_p1, %p721_p2  ;;  %p44_p4 = scmp.ge.s32.totalorder %s2986_s3, 2 }
  0x19   : > { %s2988_s3 = smov (%p44_p4, %s2986_s3), 0  ;;  %725 = sbr.rel (%p722_p3) target bundleno = 2754 (0xac2), region = 100 }
  0x1a   : > { %2938 = sst [smem:[#allocation8_spill]] %s2988_s3 }
  0x1e   : > { %p840_p5 = scmp.lt.s32.totalorder %s2447_s22, 1  ;;  %p847_p6 = scmp.lt.s32.totalorder %s2443_s1, 1 }
  0x1f   : > { %s2941_s3 = sld [smem:[#allocation13_spill]] }
  0x20   : > { %s2990_s22 = smov (!%p840_p5, %s2447_s22), 1  ;;  %s2942_s19 = sld [smem:[#allocation15_spill]] }
  0x21   : > { %2939 = sst [smem:[#allocation9_spill]] %s2990_s22  ;;  %s2136_s27 = sshll.u32 %s2990_s22, 3 }
  0x22   : > { %s2610_s26 = scalar_select %p847_p6, %s2443_s1, 1 }
  0x23   : > { %s2943_s17 = sld [smem:[#allocation16_spill]] }
  0x24   : > { %s2195_s24 = sshll.u32 %s2610_s26, 4  ;;  %s2945_s29 = sld [smem:[#allocation17_spill]] }
  0x25   : > { %s843_s25 = scalar_lea.vmem %s2941_s3, %s2136_s27  ;;  %s2947_s8 = sld [smem:[#allocation18_spill]] }
  0x26   : > { %s851_s18 = scalar_lea.vmem %s2942_s19, %s2195_s24  ;;  %s2948_s10 = sld [smem:[#allocation19_spill]] }
  0x27   : > { %s2200_s19 = sshll.u32 %s2610_s26, 5  ;;  %s2952_s12 = sld [smem:[#allocation21_spill]] }
  0x28   : > { %s2954_s23 = sld [smem:[#allocation24_spill]] }
  0x29   : > { %s2627_s16 = scalar_lea.vmem %s2943_s17, %s2195_s24  ;;  %s2955_s2 = sld [smem:[#allocation25_spill]] }
  0x2a   : > { %2944 = sst [smem:[#allocation10_spill]] %s2627_s16  ;;  %s2632_s30 = scalar_lea.vmem %s2945_s29, %s2195_s24 }
  0x2b   : > { %2946 = sst [smem:[#allocation11_spill]] %s2632_s30  ;;  %s2649_s16 = scalar_lea.vmem %s2947_s8, %s2195_s24 }
  0x2c   : > { %s2658_s3 = scalar_lea.vmem %s2948_s10, %s2195_s24  ;;  %s897_s30 = scalar_lea.vmem %s2902_s14, %s2610_s26 }
  0x2d   : > { %2949 = sst [smem:[#allocation12_spill]] %s2658_s3  ;;  %s2672_s8 = scalar_lea.vmem %s2952_s12, %s2200_s19 }
  0x2e   : > { %s2953_s29 = sld [smem:[#allocation23_spill]]  ;;  %s903_s11 = scalar_lea.vmem %s2954_s23, %s2610_s26 }
  0x2f   : > { %s906_s1 = scalar_lea.vmem %s2955_s2, %s2610_s26  ;;  %s2956_s19 = sld [smem:[#allocation28_spill]] }
  0x30   : > { %s2957_s12 = sld [smem:[#allocation3_spill]] }
  0x34   : > { %s900_s10 = scalar_lea.vmem %s2953_s29, %s2610_s26 }
  0x35   : > { %s2693_s17 = scalar_lea.vmem %s2956_s19, %s2136_s27 }
  0x36   : > { %p2150_p7 = scmp.ne.s32.totalorder %s2957_s12, 0 }
  0x38   : > { %915 = sbr.rel (%p2150_p7) target bundleno = 63 (0x3f), region = 104 }
  0x3d   : > { %v916_v0 = vld [vmem:[%s843_s25] sm:$0xff]  ;;  %vm917_vm0 = vcmask 261120  }
  0x3e   : > { %918 = vst.msk [vmem:[#allocation2] sm:$0xff] %vm917_vm0, %v916_v0 }
  0x3f PF: > { %v2385_v1 = vld [vmem:[%s851_s18 + $0x8] sm:$0xff]   ;;  %s2958_s29 = sld [smem:[#allocation10_spill]]  ;;  %v2461_v2 = vmov 0.0   ;;  %v2387_v4 = vld [vmem:[%s851_s18] sm:$0xff]   ;;  %vm2462_vm1 = vmmov 0   ;;  %vm944_vm2 = vcmask 261120   ;;  %s2959_s18 = scalar_lea.vmem %s2893_s5, %s2610_s26 }
  0x40   : > { %2237 = vmatprep.subr.bf16.mxu0 %v2461_v2  ;;  %2245 = vmatprep.subr.bf16.mxu1 %v2461_v2  ;;  %v2151_v8 = vld [vmem:[%s2959_s18] ss:$0 sm:$0xff]  ;;  %s2960_s23 = scalar_lea.vmem %s2894_s6, %s2610_s26  ;;  %vm1130_vm3 = vcmask 64512   ;;  %s2463_s3 = smov 112   ;;  %vm1192_vm4 = vcmask 1043456   ;;  %vm1582_vm5 = vcmask 130048  }
  0x41   : > { %2238 = vmatpush3.bf16.msra.mxu0 %v2385_v1  ;;  %2241 = vmatprep.mubr.msk.bf16.mxu0 %vm2462_vm1, %v2461_v2  ;;  %v2155_v9 = vld [vmem:[%s2960_s23] ss:$0 sm:$0xff]  ;;  %s2961_s28 = sld [smem:[#allocation11_spill]]  ;;  %s2464_s4 = smov 120   ;;  %vm1584_vm6 = vcmask 195584   ;;  %vm1787_vm7 = vcmask 523264  }
  0x42   : > { %2239 = vmatprep.subr.bf16.mxu0 %v2461_v2  ;;  %2249 = vmatprep.mubr.msk.bf16.mxu1 %vm2462_vm1, %v2461_v2  ;;  %s2465_s24 = smov 104   ;;  %s2962_s0 = sld [smem:[#allocation9_spill]] }
  0x43   : > { %s2963_s20 = sld [smem:[#allocation14_spill]]  ;;  %s2466_s12 = smov 8  }
  0x44   : > { %s2467_s13 = smov 16   ;;  %s2468_s18 = smov 24  }
  0x45   : > { %v2386_v3 = vld [vmem:[%s2958_s29 + $0x8] sm:$0xff]   ;;  %v2388_v5 = vld [vmem:[%s2958_s29] sm:$0xff]   ;;  %2240 = vmatpush3.bf16.msra.mxu0 %v2387_v4  ;;  %s2965_s29 = scalar_lea.vmem %s2895_s7, %s2610_s26  ;;  %s2966_s27 = scalar_lea.vmem %s2897_s9, %s2610_s26 }
  0x46   : > { %2246 = vmatpush3.bf16.msra.mxu1 %v2386_v3  ;;  %v2706_v6 = vld [vmem:[#allocation2] sm:$0xff]  ;;  %2253 = vmatprep.subr.bf16.mxu0 %v2461_v2  ;;  %s2967_s23 = sld [smem:[#allocation12_spill]] }
  0x47   : > { %2247 = vmatprep.subr.bf16.mxu1 %v2461_v2  ;;  %v920_v7 = vpack.c.bf16 %v2706_v6, %v2706_v6  ;;  %v2389_v24 = vld [vmem:[%s2961_s28 + $0x8] sm:$0xff]   ;;  %v2390_v25 = vld [vmem:[%s2961_s28] sm:$0xff]   ;;  %s2969_s22 = sld [smem:[#allocation20_spill]] }
  0x48   : > { %v2159_v42 = vld [vmem:[%s2965_s29] ss:$0 sm:$0xff]  ;;  %s2971_s21 = sld [smem:[#allocation22_spill]] }
  0x49   : > { %2242 = vmatmul.mubr.msk.bf16.vlgmr.msra.gmra.mxu0 %vm944_vm2, %v920_v7  ;;  %s2964_s2 = scalar_lea.vmem %s2963_s20, %s2962_s0  ;;  %s2975_s25 = sld [smem:[#allocation3_spill]] }
  0x4a   : > { %2248 = vmatpush3.bf16.msra.mxu1 %v2388_v5  ;;  %2257 = vmatprep.mubr.msk.bf16.mxu0 %vm2462_vm1, %v2461_v2  ;;  %v2163_v35 = vld [vmem:[%s2964_s2] ss:$0 sm:$0xff] }
  0x4b   : > { %2261 = vmatprep.subr.bf16.mxu1 %v2461_v2  ;;  %2254 = vmatpush3.bf16.msra.mxu0 %v2389_v24 }
  0x4c   : > { %2255 = vmatprep.subr.bf16.mxu0 %v2461_v2 }
  0x4d   : > { %2250 = vmatmul.mubr.msk.bf16.vlgmr.msra.gmra.mxu1 %vm944_vm2, %v920_v7  ;;  %s2970_s20 = scalar_lea.vmem %s2969_s22, %s2610_s26 }
  0x4e   : > { %2263 = vmatprep.mubr.msk.bf16.mxu1 %vm2462_vm1, %v2461_v2  ;;  %s2972_s19 = scalar_lea.vmem %s2971_s21, %s2610_s26 }
  0x4f   : > { %2256 = vmatpush3.bf16.msra.mxu0 %v2390_v25  ;;  %p2190_p8 = scmp.ne.s32.totalorder %s2975_s25, 1 }
  0x50   : > { %2267 = vmatprep.subr.bf16.mxu0 %v2461_v2 }
  0x52   : > { %2258 = vmatmul.mubr.msk.bf16.vlgmr.msra.gmra.mxu0 %vm944_vm2, %v920_v7 }
  0x53   : > { %2269 = vmatprep.mubr.msk.bf16.mxu0 %vm2462_vm1, %v2461_v2 }
 0x109   : > { %v982_v10 = vpop.f32.mrf.mxu0 }
 0x10a   : > { %v983_v11 = vadd.f32 %v2151_v8, %v982_v10 }
 0x10b   : > { %v2243_v14 = vpop.f32.mrf.mxu0 }
 0x10c   : > { %v988_v15 = vmul.f32 0.35355338, %v983_v11 }
 0x10d   : > { %v1046_v12 = vpop.f32.mrf.mxu1  ;;  %v985_v18 = vpop.f32.mrf.mxu0 }
 0x10e   : > { %v1047_v13 = vadd.f32 %v2155_v9, %v1046_v12  ;;  %v1121_v20 = vpack.c.bf16 %v988_v15, %v988_v15 }
 0x10f   : > { %v2251_v16 = vpop.f32.mrf.mxu1  ;;  %v2244_v21 = vpop.f32.mrf.mxu0 }
 0x110   : > { %v1122_v17 = vpack.c.bf16 %v1047_v13, %v1047_v13 }
 0x111   : > { %v1049_v19 = vpop.f32.mrf.mxu1 }
 0x112   : > { %1351 = vrot.lane.b32.xlu1 %v1122_v17, %s2463_s3  ;;  %1240 = vrot.lane.b32.xlu0 %v1122_v17, %s2464_s4  ;;  %v1135_v22 = vsel %vm1130_vm3, %v1122_v17, 0  ;;  %v1109_v43 = vpop.f32.mrf.mxu0 }
 0x113   : > { %v2252_v23 = vpop.f32.mrf.mxu1  ;;  %2262 = vmatpush3.bf16.xpose.msra.mxu1 %v1135_v22  ;;  %v1110_v44 = vadd.f32 %v2159_v42, %v1109_v43 }
 0x114   : > { %2273 = vmatprep.subr.bf16.mxu1 %v2461_v2  ;;  %v2259_v45 = vpop.f32.mrf.mxu0 }
 0x115   : > { %v1123_v46 = vpack.c.bf16 %v1110_v44, %v1110_v44 }
 0x116   : > { %1349 = vrot.lane.b32.xlu1 %v1121_v20, %s2463_s3  ;;  %1237 = vrot.lane.b32.xlu0 %v1121_v20, %s2464_s4  ;;  %v1112_v47 = vpop.f32.mrf.mxu0 }
 0x117   : > { %v1194_v48 = vsel %vm1192_vm4, %v1123_v46, 0 }
 0x118   : > { %v2260_v49 = vpop.f32.mrf.mxu0  ;;  %2268 = vmatpush3.bf16.msra.mxu0 %v1194_v48 }
 0x119   : > { %2279 = vmatprep.subr.bf16.mxu0 %v2461_v2 }
 0x11a   : > { %1459 = vrot.lane.b32.xlu1 %v1121_v20, %s2465_s24  ;;  %1461 = vrot.lane.b32.xlu0 %v1122_v17, %s2465_s24 }
 0x11b   : > { %2264 = vmatmul.mubr.msk.bf16.vlgmr.msra.gmra.mxu1 %vm1130_vm3, %v1121_v20 }
 0x11c   : > { %2275 = vmatprep.mubr.msk.bf16.mxu1 %vm2462_vm1, %v2461_v2 }
 0x184   : > { %v1241_v26 = vpop.permute.xlu0 %1240  ;;  %v1352_v28 = vpop.permute.xlu1 %1351 }
 0x185   : > { %v1246_v27 = vsel %vm1130_vm3, %v1241_v26, 0  ;;  %v1357_v30 = vsel %vm1130_vm3, %v1352_v28, 0 }
 0x186   : > { %2274 = vmatpush3.bf16.xpose.msra.mxu1 %v1246_v27 }
 0x187   : > { %2285 = vmatprep.subr.bf16.mxu1 %v2461_v2 }
 0x188   : > { %v1238_v29 = vpop.permute.xlu0 %1237  ;;  %v1350_v32 = vpop.permute.xlu1 %1349 }
 0x18c   : > { %v1462_v31 = vpop.permute.xlu0 %1461  ;;  %v1460_v34 = vpop.permute.xlu1 %1459 }
 0x18d   : > { %2276 = vmatmul.mubr.msk.bf16.vlgmr.msra.gmra.mxu1 %vm1130_vm3, %v1238_v29  ;;  %v1467_v33 = vsel %vm1130_vm3, %v1462_v31, 0 }
 0x18e   : > { %2286 = vmatpush3.bf16.xpose.msra.mxu1 %v1357_v30  ;;  %2287 = vmatprep.mubr.msk.bf16.mxu1 %vm2462_vm1, %v2461_v2 }
 0x18f   : > { %2297 = vmatprep.subr.bf16.mxu1 %v2461_v2 }
 0x195   : > { %2288 = vmatmul.mubr.msk.bf16.vlgmr.msra.gmra.mxu1 %vm1130_vm3, %v1350_v32 }
 0x196   : > { %2298 = vmatpush3.bf16.xpose.msra.mxu1 %v1467_v33  ;;  %2299 = vmatprep.mubr.msk.bf16.mxu1 %vm2462_vm1, %v2461_v2 }
 0x197   : > { %2309 = vmatprep.subr.bf16.mxu1 %v2461_v2 }
 0x19d   : > { %2300 = vmatmul.mubr.msk.bf16.vlgmr.msra.gmra.mxu1 %vm1130_vm3, %v1460_v34 }
 0x19e   : > { %2313 = vmatprep.mubr.msk.bf16.mxu1 %vm2462_vm1, %v2461_v2 }
 0x1db   : > { %v1171_v36 = vpop.f32.mrf.mxu1 }
 0x1dc   : > { %v1172_v37 = vadd.f32 %v2163_v35, %v1171_v36 }
 0x1dd   : > { %v2265_v38 = vpop.f32.mrf.mxu1 }
 0x1de   : > { %v1177_v39 = vsel %vm1130_vm3, %v1172_v37, -inf }
 0x1df   : > { %1178 = vmax.xlane.f32.xlu0 %v1177_v39  ;;  %v1174_v40 = vpop.f32.mrf.mxu1 }
 0x1e1   : > { %v2266_v41 = vpop.f32.mrf.mxu1 }
 0x24d   : > { %v1282_v50 = vpop.f32.mrf.mxu1 }
 0x24e   : > { %v1283_v51 = vadd.f32 %v2163_v35, %v1282_v50 }
 0x24f   : > { %v2277_v52 = vpop.f32.mrf.mxu1 }
 0x250   : > { %v1288_v53 = vsel %vm1130_vm3, %v1283_v51, -inf  ;;  %v2391_v52 = vld [vmem:[%s2649_s16 + $0x8] sm:$0xff]  }
 0x251   : > { %1289 = vmax.xlane.f32.xlu1 %v1288_v53  ;;  %v1285_v54 = vpop.f32.mrf.mxu1  ;;  %2310 = vmatpush3.bf16.msra.mxu1 %v2391_v52 }
 0x252   : > { %2311 = vmatprep.subr.bf16.mxu1 %v2461_v2 }
 0x253   : > { %v2278_v55 = vpop.f32.mrf.mxu1 }
 0x254   : > { %v2392_v55 = vld [vmem:[%s2649_s16] sm:$0xff]  }
 0x255   : > { %v1393_v56 = vpop.f32.mrf.mxu1  ;;  %2312 = vmatpush3.bf16.msra.mxu1 %v2392_v55 }
 0x256   : > { %v1394_v57 = vadd.f32 %v2163_v35, %v1393_v56  ;;  %2325 = vmatprep.subr.bf16.mxu1 %v2461_v2 }
 0x257   : > { %v2289_v58 = vpop.f32.mrf.mxu1 }
 0x258   : > { %v1399_v59 = vsel %vm1130_vm3, %v1394_v57, -inf }
 0x259   : > { %1400 = vmax.xlane.f32.xlu0 %v1399_v59  ;;  %v1396_v60 = vpop.f32.mrf.mxu1 }
 0x25b   : > { %v2290_v61 = vpop.f32.mrf.mxu1 }
 0x25d   : > { %v1503_v62 = vpop.f32.mrf.mxu1 }
 0x25e   : > { %v1504_v63 = vadd.f32 %v2163_v35, %v1503_v62 }
 0x25f   : > { %v2301_v0 = vpop.f32.mrf.mxu1 }
 0x260   : > { %v1509_v1 = vsel %vm1130_vm3, %v1504_v63, -inf }
 0x261   : > { %1510 = vmax.xlane.f32.xlu0 %v1509_v1  ;;  %v1506_v3 = vpop.f32.mrf.mxu1 }
 0x263   : > { %v2302_v4 = vpop.f32.mrf.mxu1 }
 0x268   : > { %v1179_v5 = vpop.xlane.xlu0 %1178 }
 0x269   : > { %v1180_v7 = vsub.f32 %v1172_v37, %v1179_v5 }
 0x26b   : > { %v1181_v8 = vmul.f32 1.442695, %v1180_v7 }
 0x26d   : > { %2399 = vpow2.f32 %v1181_v8 }
 0x27a   : > { %v2400_v9 = vpop.eup %2399 }
 0x27b   : > { %v1183_v10 = vsel %vm1130_vm3, %v2400_v9, 0.0 }
 0x27c   : > { %1184 = vadd.xlane.f32.xlu1 %v1183_v10 }
 0x28d   : > { %1301 = vrot.lane.b32.xlu1 %v1123_v46, %s2464_s4 }
 0x2da   : > { %v1290_v11 = vpop.xlane.xlu1 %1289 }
 0x2db   : > { %v1291_v12 = vsub.f32 %v1283_v51, %v1290_v11  ;;  %v2172_v11 = vld [vmem:[%s2966_s27] ss:$0 sm:$0xff] }
 0x2dd   : > { %v1292_v13 = vmul.f32 1.442695, %v1291_v12 }
 0x2df   : > { %2401 = vpow2.f32 %v1292_v13 }
 0x2e2   : > { %v1401_v14 = vpop.xlane.xlu0 %1400 }
 0x2e3   : > { %v1402_v15 = vsub.f32 %v1394_v57, %v1401_v14 }
 0x2e5   : > { %v1403_v16 = vmul.f32 1.442695, %v1402_v15 }
 0x2e7   : > { %2403 = vpow2.f32 %v1403_v16 }
 0x2ea   : > { %v1511_v17 = vpop.xlane.xlu0 %1510 }
 0x2eb   : > { %v1512_v18 = vsub.f32 %v1504_v63, %v1511_v17 }
 0x2ec   : > { %v2402_v19 = vpop.eup %2401 }
 0x2ed   : > { %v1513_v20 = vmul.f32 1.442695, %v1512_v18  ;;  %v1294_v21 = vsel %vm1130_vm3, %v2402_v19, 0.0 }
 0x2ee   : > { %1295 = vadd.xlane.f32.xlu0 %v1294_v21 }
 0x2ef   : > { %2405 = vpow2.f32 %v1513_v20 }
 0x2f4   : > { %v2404_v22 = vpop.eup %2403 }
 0x2f5   : > { %v1405_v23 = vsel %vm1130_vm3, %v2404_v22, 0.0 }
 0x2f6   : > { %1406 = vadd.xlane.f32.xlu1 %v1405_v23 }
 0x2fc   : > { %v2406_v24 = vpop.eup %2405 }
 0x2fd   : > { %v1515_v25 = vsel %vm1130_vm3, %v2406_v24, 0.0 }
 0x2fe   : > { %1516 = vadd.xlane.f32.xlu0 %v1515_v25  ;;  %v2394_v25 = vld [vmem:[%s2967_s23] sm:$0xff]  }
 0x305   : > { %v1185_v26 = vpop.xlane.xlu1 %1184 }
 0x306   : > { %2407 = vrcp.f32 %v1185_v26  ;;  %v2396_v26 = vld [vmem:[%s2672_s8 + $0x10] sm:$0xff]  }
 0x307   : > { %1521 = vrot.lane.b32.xlu1 %v1123_v46, %s2465_s24 }
 0x309   : > { %v1302_v28 = vpop.permute.xlu1 %1301 }
 0x30a   : > { %v1307_v31 = vsel %vm1192_vm4, %v1302_v28, 0 }
 0x313   : > { %v2408_v27 = vpop.eup %2407 }
 0x314   : > { %1411 = vrot.lane.b32.xlu0 %v1123_v46, %s2463_s3  ;;  %v1187_v29 = vmul.f32 %v2408_v27, %v2400_v9  ;;  %s2977_s3 = sld [smem:[#allocation27_spill]] (!%p2190_p8) }
 0x316   : > { %v1188_v30 = vpack.c.bf16 %v1187_v29, %v1187_v29 }
 0x318   : > { %2270 = vmatmul.mubr.msk.bf16.vlgmr.msra.gmra.mxu0 %vm1130_vm3, %v1188_v30 }
 0x319   : > { %2280 = vmatpush3.bf16.msra.mxu0 %v1307_v31  ;;  %2281 = vmatprep.mubr.msk.bf16.mxu0 %vm2462_vm1, %v2461_v2  ;;  %v2176_v31 = vld [vmem:[%s897_s30] ss:$0 sm:$0xff] }
 0x31a   : > { %2291 = vmatprep.subr.bf16.mxu0 %v2461_v2 }
 0x377   : > { %v1296_v32 = vpop.xlane.xlu0 %1295 }
 0x378   : > { %2409 = vrcp.f32 %v1296_v32 }
 0x37f   : > { %v1407_v33 = vpop.xlane.xlu1 %1406 }
 0x380   : > { %2411 = vrcp.f32 %v1407_v33  ;;  %v2177_v33 = vld [vmem:[%s900_s10] ss:$0 sm:$0xff] }
 0x383   : > { %v1522_v42 = vpop.permute.xlu1 %1521 }
 0x384   : > { %v1527_v44 = vsel %vm1192_vm4, %v1522_v42, 0 }
 0x385   : > { %v2410_v34 = vpop.eup %2409 }
 0x386   : > { %v1298_v35 = vmul.f32 %v2410_v34, %v2402_v19 }
 0x387   : > { %v1517_v36 = vpop.xlane.xlu0 %1516 }
 0x388   : > { %2413 = vrcp.f32 %v1517_v36  ;;  %v1299_v37 = vpack.c.bf16 %v1298_v35, %v1298_v35 }
 0x38a   : > { %2282 = vmatmul.mubr.msk.bf16.vlgmr.msra.gmra.mxu0 %vm1130_vm3, %v1299_v37  ;;  %v2397_v37 = vld [vmem:[%s2672_s8 + $0x8] sm:$0xff]  }
 0x38b   : > { %v1412_v38 = vpop.permute.xlu0 %1411  ;;  %2293 = vmatprep.mubr.msk.bf16.mxu0 %vm2462_vm1, %v2461_v2 }
 0x38c   : > { %v1417_v39 = vsel %vm1192_vm4, %v1412_v38, 0  ;;  %v2398_v38 = vld [vmem:[%s2672_s8] sm:$0xff]  }
 0x38d   : > { %v2412_v40 = vpop.eup %2411  ;;  %2292 = vmatpush3.bf16.msra.mxu0 %v1417_v39  ;;  %v2178_v39 = vld [vmem:[%s2970_s20] ss:$0 sm:$0xff] }
 0x38e   : > { %2303 = vmatprep.subr.bf16.mxu0 %v2461_v2  ;;  %v1409_v41 = vmul.f32 %v2412_v40, %v2404_v22 }
 0x390   : > { %v1410_v43 = vpack.c.bf16 %v1409_v41, %v1409_v41 }
 0x392   : > { %2294 = vmatmul.mubr.msk.bf16.vlgmr.msra.gmra.mxu0 %vm1130_vm3, %v1410_v43 }
 0x393   : > { %2304 = vmatpush3.bf16.msra.mxu0 %v1527_v44  ;;  %2305 = vmatprep.mubr.msk.bf16.mxu0 %vm2462_vm1, %v2461_v2 }
 0x394   : > { %2317 = vmatprep.subr.bf16.mxu0 %v2461_v2 }
 0x395   : > { %v2414_v45 = vpop.eup %2413 }
 0x396   : > { %v1519_v46 = vmul.f32 %v2414_v45, %v2406_v24  ;;  %v2393_v24 = vld [vmem:[%s2967_s23 + $0x8] sm:$0xff]  }
 0x398   : > { %v1520_v47 = vpack.c.bf16 %v1519_v46, %v1519_v46 }
 0x39a   : > { %2306 = vmatmul.mubr.msk.bf16.vlgmr.msra.gmra.mxu0 %vm1130_vm3, %v1520_v47 }
 0x39b   : > { %2321 = vmatprep.mubr.msk.bf16.mxu0 %vm2462_vm1, %v2461_v2  ;;  %2318 = vmatpush3.bf16.msra.mxu0 %v2393_v24 }
 0x39c   : > { %2319 = vmatprep.subr.bf16.mxu0 %v2461_v2 }
 0x39f   : > { %2320 = vmatpush3.bf16.msra.mxu0 %v2394_v25 }
 0x3d8   : > { %v1230_v48 = vpop.f32.mrf.mxu0 }
 0x3da   : > { %v2271_v49 = vpop.f32.mrf.mxu0 }
 0x3dc   : > { %v1233_v50 = vpop.f32.mrf.mxu0 }
 0x3de   : > { %v2272_v51 = vpop.f32.mrf.mxu0 }
 0x44a   : > { %v1343_v53 = vpop.f32.mrf.mxu0 }
 0x44b   : > { %1570 = vrot.lane.b32.xlu1 %v1343_v53, %s2466_s12 }
 0x44c   : > { %v2283_v54 = vpop.f32.mrf.mxu0 }
 0x44e   : > { %v1346_v56 = vpop.f32.mrf.mxu0 }
 0x450   : > { %v2284_v57 = vpop.f32.mrf.mxu0 }
 0x452   : > { %v1453_v58 = vpop.f32.mrf.mxu0 }
 0x453   : > { %1574 = vrot.lane.b32.xlu0 %v1453_v58, %s2467_s13 }
 0x454   : > { %v2295_v59 = vpop.f32.mrf.mxu0 }
 0x456   : > { %v1456_v60 = vpop.f32.mrf.mxu0 }
 0x458   : > { %v2296_v61 = vpop.f32.mrf.mxu0 }
 0x45a   : > { %v1563_v62 = vpop.f32.mrf.mxu0 }
 0x45b   : > { %1578 = vrot.lane.b32.xlu1 %v1563_v62, %s2468_s18 }
 0x45c   : > { %v2307_v63 = vpop.f32.mrf.mxu0 }
 0x45d   : > { %v2188_v63 = vld [vmem:[%s903_s11] ss:$0 sm:$0xff] }
 0x45e   : > { %v1566_v0 = vpop.f32.mrf.mxu0 }
 0x460   : > { %v2308_v1 = vpop.f32.mrf.mxu0 }
 0x461   : > { %v2189_v1 = vld [vmem:[%s906_s1] ss:$0 sm:$0xff]  ;;  %s2976_s1 = sld [smem:[#allocation26_spill]] (!%p2190_p8) }
 0x4bd   : > { %v1571_v3 = vpop.permute.xlu1 %1570 }
 0x4be   : > { %v1581_v5 = vsel %vm1130_vm3, %v1230_v48, %v1571_v3 }
 0x4c5   : > { %v1575_v4 = vpop.permute.xlu0 %1574 }
 0x4c6   : > { %v1583_v7 = vsel %vm1582_vm5, %v1581_v5, %v1575_v4 }
 0x4cd   : > { %v1579_v8 = vpop.permute.xlu1 %1578 }
 0x4ce   : > { %v1585_v9 = vsel %vm1584_vm6, %v1583_v7, %v1579_v8 }
 0x4cf   : > { %v1586_v10 = vpack.c.bf16 %v1585_v9, %v1585_v9 }
 0x4d1   : > { %2314 = vmatmul.mubr.msk.bf16.vlgmr.msra.gmra.mxu1 %vm944_vm2, %v1586_v10 }
 0x4d2   : > { %2333 = vmatprep.mubr.msk.bf16.mxu1 %vm2462_vm1, %v2461_v2 }
 0x591   : > { %v1642_v12 = vpop.f32.mrf.mxu1 }
 0x592   : > { %v1643_v13 = vadd.f32 %v2172_v11, %v1642_v12 }
 0x593   : > { %v2315_v14 = vpop.f32.mrf.mxu1 }
 0x594   : > { %v1648_v15 = vadd.f32 %v1643_v13, %v2706_v6  ;;  %v2395_v6 = vld [vmem:[%s2672_s8 + $0x18] sm:$0xff]  }
 0x595   : > { %v1645_v16 = vpop.f32.mrf.mxu1  ;;  %2326 = vmatpush3.bf16.msra.mxu1 %v2395_v6 }
 0x596   : > { %v1651_v17 = vsel %vm944_vm2, %v1648_v15, 0.0  ;;  %2327 = vmatprep.subr.bf16.mxu1 %v2461_v2 }
 0x597   : > { %1652 = vadd.xlane.f32.xlu0 %v1651_v17  ;;  %v2316_v18 = vpop.f32.mrf.mxu1 }
 0x599   : > { %2328 = vmatpush3.bf16.msra.mxu1 %v2396_v26 }
 0x59a   : > { %2329 = vmatprep.subr.bf16.mxu1 %v2461_v2 }
 0x59d   : > { %2330 = vmatpush3.bf16.msra.mxu1 %v2397_v37 }
 0x59e   : > { %2331 = vmatprep.subr.bf16.mxu1 %v2461_v2  ;;  %v2182_v2 = vld [vmem:[%s2972_s19] ss:$0 sm:$0xff] }
 0x5a1   : > { %2332 = vmatpush3.bf16.msra.mxu1 %v2398_v38 }
 0x620   : > { %v1653_v19 = vpop.xlane.xlu0 %1652 }
 0x621   : > { %v1655_v20 = vmul.f32 0.03125, %v1653_v19 }
 0x623   : > { %v1656_v21 = vsub.f32 %v1648_v15, %v1655_v20 }
 0x625   : > { %v1657_v22 = vmul.f32 %v1656_v21, %v1656_v21 }
 0x627   : > { %v1658_v23 = vsel %vm944_vm2, %v1657_v22, 0.0 }
 0x628   : > { %1659 = vadd.xlane.f32.xlu1 %v1658_v23 }
 0x6b1   : > { %v1660_v27 = vpop.xlane.xlu1 %1659 }
 0x6b2   : > { %v1661_v28 = vmul.f32 0.03125, %v1660_v27 }
 0x6b4   : > { %v1662_v29 = vadd.f32 1e-05, %v1661_v28 }
 0x6b6   : > { %2415 = vrsqrt.f32 %v1662_v29 }
 0x6c3   : > { %v2416_v30 = vpop.eup %2415 }
 0x6c4   : > { %v1664_v32 = vmul.f32 %v2416_v30, %v1656_v21 }
 0x6c6   : > { %v1671_v34 = vmul.f32 %v2176_v31, %v1664_v32 }
 0x6c8   : > { %v1678_v35 = vadd.f32 %v2177_v33, %v1671_v34 }
 0x6ca   : > { %v1679_v36 = vpack.c.bf16 %v1678_v35, %v1678_v35 }
 0x6cc   : > { %2322 = vmatmul.mubr.msk.bf16.vlgmr.msra.gmra.mxu0 %vm944_vm2, %v1679_v36 }
 0x78c   : > { %v1740_v40 = vpop.f32.mrf.mxu0 }
 0x78d   : > { %v1741_v41 = vadd.f32 %v2178_v39, %v1740_v40 }
 0x78e   : > { %v2323_v42 = vpop.f32.mrf.mxu0 }
 0x78f   : > { %v1746_v43 = vmax.f32 %v1741_v41, 0.0 }
 0x790   : > { %v1743_v44 = vpop.f32.mrf.mxu0 }
 0x791   : > { %v1747_v45 = vpack.c.bf16 %v1746_v43, %v1746_v43 }
 0x792   : > { %v2324_v46 = vpop.f32.mrf.mxu0 }
 0x793   : > { %2334 = vmatmul.mubr.msk.bf16.vlgmr.msra.gmra.mxu1 %vm1787_vm7, %v1747_v45 }
 0x853   : > { %v1825_v47 = vpop.f32.mrf.mxu1 }
 0x854   : > { %v1826_v48 = vadd.f32 %v2182_v2, %v1825_v47 }
 0x855   : > { %v2335_v49 = vpop.f32.mrf.mxu1 }
 0x856   : > { %v1831_v50 = vadd.f32 %v1826_v48, %v1678_v35 }
 0x857   : > { %v1828_v51 = vpop.f32.mrf.mxu1 }
 0x858   : > { %v1834_v52 = vsel %vm944_vm2, %v1831_v50, 0.0 }
 0x859   : > { %1835 = vadd.xlane.f32.xlu0 %v1834_v52  ;;  %v2336_v53 = vpop.f32.mrf.mxu1 }
 0x8e2   : > { %v1836_v54 = vpop.xlane.xlu0 %1835 }
 0x8e3   : > { %v1837_v55 = vmul.f32 0.03125, %v1836_v54 }
 0x8e5   : > { %v1838_v56 = vsub.f32 %v1831_v50, %v1837_v55 }
 0x8e7   : > { %v1839_v57 = vmul.f32 %v1838_v56, %v1838_v56 }
 0x8e9   : > { %v1840_v58 = vsel %vm944_vm2, %v1839_v57, 0.0 }
 0x8ea   : > { %1841 = vadd.xlane.f32.xlu0 %v1840_v58 }
 0x973   : > { %v1842_v59 = vpop.xlane.xlu0 %1841 }
 0x974   : > { %v1843_v60 = vmul.f32 0.03125, %v1842_v59 }
 0x976   : > { %v1844_v61 = vadd.f32 1e-05, %v1843_v60 }
 0x978   : > { %2417 = vrsqrt.f32 %v1844_v61 }
 0x985   : > { %v2418_v62 = vpop.eup %2417 }
 0x986   : > { %v1846_v0 = vmul.f32 %v2418_v62, %v1838_v56 }
 0x988   : > { %v1853_v3 = vmul.f32 %v2188_v63, %v1846_v0  ;;  %1865 = sbr.rel (%p2190_p8) target bundleno = 2754 (0xac2), region = 108 }
 0x98a   : > { %v1860_v4 = vadd.f32 %v2189_v1, %v1853_v3 }
 0x98c   : > { %1861 = vst.msk [vmem:[#allocation2] sm:$0xff] %vm944_vm2, %v1860_v4 }
 0x98d   : > { %v1868_v5 = vsel %vm944_vm2, %v1860_v4, 0.0  ;;  %v2191_v16 = vld [vmem:[%s2976_s1] ss:$0 sm:$0xff] }
 0x98e   : > { %1869 = vadd.xlane.f32.xlu0 %v1868_v5  ;;  %v2192_v18 = vld [vmem:[%s2977_s3] ss:$0 sm:$0xff] }
 0xa17   : > { %v1870_v7 = vpop.xlane.xlu0 %1869 }
 0xa18   : > { %v1871_v8 = vmul.f32 0.03125, %v1870_v7 }
 0xa1a   : > { %v1872_v9 = vsub.f32 %v1860_v4, %v1871_v8 }
 0xa1c   : > { %v1873_v10 = vmul.f32 %v1872_v9, %v1872_v9 }
 0xa1e   : > { %v1874_v11 = vsel %vm944_vm2, %v1873_v10, 0.0 }
 0xa1f   : > { %1875 = vadd.xlane.f32.xlu0 %v1874_v11 }
 0xaa8   : > { %v1876_v12 = vpop.xlane.xlu0 %1875 }
 0xaa9   : > { %v1877_v13 = vmul.f32 0.03125, %v1876_v12 }
 0xaab   : > { %v1878_v14 = vadd.f32 1e-05, %v1877_v13 }
 0xaad   : > { %2419 = vrsqrt.f32 %v1878_v14 }
 0xaba   : > { %v2420_v15 = vpop.eup %2419 }
 0xabb   : > { %v1880_v17 = vmul.f32 %v2420_v15, %v1872_v9 }
 0xabd   : > { %v1887_v19 = vmul.f32 %v2191_v16, %v1880_v17 }
 0xabf   : > { %v1894_v20 = vadd.f32 %v2192_v18, %v1887_v19 }
 0xac1   : > { %1895 = vst.msk [vmem:[%s2693_s17] sm:$0xff] %vm944_vm2, %v1894_v20 }
 0xac2 PF: > { %s2978_s28 = sld [smem:[#allocation6_spill]] }
 0xac3   : > { %s2979_s1 = sld [smem:[#allocation4_spill]] }
 0xac4   : > { %s2980_s22 = sld [smem:[#allocation5_spill]] }
 0xac5   : > { %s2981_s23 = sld [smem:[#allocation7_spill]] }
 0xac6   : > { %s2982_s24 = sld [smem:[#allocation8_spill]] }
 0xac8   : > { %s30_s2 = sadd.s32 1, %s2978_s28  }
 0xac9   : > { %p27_p9 = scmp.ge.s32.totalorder %s30_s2, 6  }
 0xacb   :  { %29 = sbr.rel (!%p27_p9) target bundleno = 17 (0x11), region = 189 }

// kernel: mini_transformer_forward.4
= control target key start
LH: loop header
LB: loop body
LE: loop exit
PB: predicated region body
PF: predicated region fallthrough
CT: control target
= control target key end

     0   :  { %s4294_s6 = smov 1   ;;  %s4295_s10 = smov 2   ;;  %s5043_s0 = inlined_call_operand.smem [shape: u32[31], index: -1, kind: input, shape index: {}] }
   0x1   :  { %s4343_s5 = sld [smem:[%s5043_s0]]   ;;  %s4296_s14 = smov 3  }
   0x2   :  { %s4348_s9 = sld [smem:[%s5043_s0 + %s4294_s6]]   ;;  %s4297_s18 = smov 4  }
   0x3   :  { %s4353_s13 = sld [smem:[%s5043_s0 + %s4295_s10]]   ;;  %s4298_s22 = smov 5  }
   0x4   :  { %s4358_s17 = sld [smem:[%s5043_s0 + %s4296_s14]]   ;;  %s4299_s26 = smov 6  }
   0x5   :  { %s4363_s21 = sld [smem:[%s5043_s0 + %s4297_s18]]   ;;  %s4300_s30 = smov 7  }
   0x6   :  { %s4368_s25 = sld [smem:[%s5043_s0 + %s4298_s22]]   ;;  %s4301_s4 = smov 8  }
   0x7   :  { %5066 = sst [smem:[#allocation10_spill]] %s4343_s5  ;;  %s4302_s10 = smov 9  }
   0x8   :  { %5067 = sst [smem:[#allocation11_spill]] %s4348_s9  ;;  %s4303_s15 = smov 10  }
   0x9   :  { %5068 = sst [smem:[#allocation12_spill]] %s4353_s13  ;;  %s4304_s20 = smov 11  }
   0xa   :  { %5069 = sst [smem:[#allocation13_spill]] %s4358_s17  ;;  %s4306_s1 = smov 13  }
   0xb   :  { %5070 = sst [smem:[#allocation14_spill]] %s4363_s21  ;;  %s4307_s7 = smov 14  }
   0xc   :  { %5071 = sst [smem:[#allocation15_spill]] %s4368_s25  ;;  %s4309_s22 = smov 16  }
   0xd   :  { %s4373_s29 = sld [smem:[%s5043_s0 + %s4299_s26]]   ;;  %s4305_s26 = smov 12  }
   0xe   :  { %s4378_s3 = sld [smem:[%s5043_s0 + %s4300_s30]]   ;;  %s4310_s28 = smov 17  }
   0xf   :  { %s4383_s8 = sld [smem:[%s5043_s0 + %s4301_s4]]  }
  0x10   :  { %s4388_s14 = sld [smem:[%s5043_s0 + %s4302_s10]]  }
  0x11   :  { %s4393_s19 = sld [smem:[%s5043_s0 + %s4303_s15]]   ;;  %s4308_s15 = smov 15  }
  0x12   :  { %s4398_s24 = sld [smem:[%s5043_s0 + %s4304_s20]]  }
  0x13   :  { %5072 = sst [smem:[#allocation16_spill]] %s4373_s29 }
  0x14   :  { %5073 = sst [smem:[#allocation17_spill]] %s4378_s3 }
  0x15   :  { %5074 = sst [smem:[#allocation18_spill]] %s4383_s8 }
  0x16   :  { %5075 = sst [smem:[#allocation19_spill]] %s4388_s14 }
  0x17   :  { %5076 = sst [smem:[#allocation20_spill]] %s4393_s19 }
  0x18   :  { %5077 = sst [smem:[#allocation21_spill]] %s4398_s24 }
  0x19   :  { %s4403_s30 = sld [smem:[%s5043_s0 + %s4305_s26]]  }
  0x1a   :  { %s4408_s6 = sld [smem:[%s5043_s0 + %s4306_s1]]  }
  0x1b   :  { %s4413_s12 = sld [smem:[%s5043_s0 + %s4307_s7]]   ;;  %s4311_s7 = smov 18  }
  0x1c   :  { %s4418_s20 = sld [smem:[%s5043_s0 + %s4308_s15]]   ;;  %s4312_s15 = smov 19  }
  0x1d   :  { %s4423_s27 = sld [smem:[%s5043_s0 + %s4309_s22]]   ;;  %s4313_s22 = smov 20  }
  0x1e   :  { %s4428_s4 = sld [smem:[%s5043_s0 + %s4310_s28]]   ;;  %s4314_s28 = smov 21  }
  0x1f   :  { %5078 = sst [smem:[#allocation22_spill]] %s4403_s30 }
  0x20   :  { %5079 = sst [smem:[#allocation23_spill]] %s4408_s6 }
  0x21   :  { %5080 = sst [smem:[#allocation24_spill]] %s4413_s12 }
  0x22   :  { %5081 = sst [smem:[#allocation25_spill]] %s4418_s20 }
  0x23   :  { %5082 = sst [smem:[#allocation26_spill]] %s4423_s27 }
  0x24   :  { %5083 = sst [smem:[#allocation27_spill]] %s4428_s4 }
  0x25   :  { %s4433_s12 = sld [smem:[%s5043_s0 + %s4311_s7]]   ;;  %s4315_s7 = smov 22  }
  0x26   :  { %s4438_s20 = sld [smem:[%s5043_s0 + %s4312_s15]]   ;;  %s4316_s15 = smov 23  }
  0x27   :  { %s4443_s27 = sld [smem:[%s5043_s0 + %s4313_s22]]   ;;  %s4317_s22 = smov 24  }
  0x28   :  { %s4448_s4 = sld [smem:[%s5043_s0 + %s4314_s28]]   ;;  %s4318_s28 = smov 25  }
  0x2b   :  { %5084 = sst [smem:[#allocation28_spill]] %s4433_s12 }
  0x2c   :  { %5085 = sst [smem:[#allocation29_spill]] %s4438_s20 }
  0x2d   :  { %5086 = sst [smem:[#allocation30_spill]] %s4443_s27 }
  0x2e   :  { %5087 = sst [smem:[#allocation31_spill]] %s4448_s4 }
  0x2f   :  { %s4453_s12 = sld [smem:[%s5043_s0 + %s4315_s7]]   ;;  %s4319_s7 = smov 26  }
  0x30   :  { %s4458_s20 = sld [smem:[%s5043_s0 + %s4316_s15]]   ;;  %s4320_s15 = smov 27  }
  0x31   :  { %s4463_s27 = sld [smem:[%s5043_s0 + %s4317_s22]]   ;;  %s4321_s22 = smov 28  }
  0x32   :  { %s4468_s4 = sld [smem:[%s5043_s0 + %s4318_s28]]   ;;  %s4322_s28 = smov 29  }
  0x35   :  { %5088 = sst [smem:[#allocation32_spill]] %s4453_s12 }
  0x36   :  { %5089 = sst [smem:[#allocation33_spill]] %s4458_s20 }
  0x37   :  { %5090 = sst [smem:[#allocation34_spill]] %s4463_s27 }
  0x38   :  { %5091 = sst [smem:[#allocation35_spill]] %s4468_s4 }
  0x39   :  { %s4473_s12 = sld [smem:[%s5043_s0 + %s4319_s7]]   ;;  %s4323_s7 = smov 30  }
  0x3a   :  { %s4478_s20 = sld [smem:[%s5043_s0 + %s4320_s15]]  }
  0x3b   :  { %s4483_s27 = sld [smem:[%s5043_s0 + %s4321_s22]]  }
  0x3c   :  { %s4488_s4 = sld [smem:[%s5043_s0 + %s4322_s28]]  }
  0x3f   :  { %5092 = sst [smem:[#allocation36_spill]] %s4473_s12 }
  0x40   :  { %5093 = sst [smem:[#allocation37_spill]] %s4478_s20 }
  0x41   :  { %5094 = sst [smem:[#allocation38_spill]] %s4483_s27 }
  0x42   :  { %5095 = sst [smem:[#allocation39_spill]] %s4488_s4 }
  0x43   :  { %s4493_s12 = sld [smem:[%s5043_s0 + %s4323_s7]]  }
  0x49   :  { %5096 = sst [smem:[#allocation40_spill]] %s4493_s12 }
  0x4a   :  { %66 = vsyncpa [#allocation4], 0 }
  0x4b   :  { %68 = vsyncpa [#allocation4 + $0x1], 0 }
  0x4c   :  { %69 = vsyncpa [#allocation6], 0 }
  0x4d   :  { %71 = vsyncpa [#allocation6 + $0x1], 0  ;;  %s4495_s15 = smov 0   ;;  %s4497_s16 = smov 0  }
  0x4e   :  { %s4499_s18 = smov 0   ;;  %s4501_s22 = smov 0  }
  0x4f   :  { %s4503_s23 = smov 0   ;;  %s4505_s26 = smov 0  }
  0x50   :  { %s4507_s28 = smov 0   ;;  %s4509_s0 = smov 0  }
  0x51 LB: > { %s5097_s20 = sld [smem:[#allocation37_spill]]  ;;  %s86_s2 = sadd.s32 1, %s4284_s26  ;;  %s4272_s18 = sphi %s4499_s18, %s5200_s18   ;;  %s4268_s16 = sphi %s4497_s16, %s5199_s16   ;;  %s4264_s15 = sphi %s4495_s15, %s5198_s15   ;;  %s4292_s0 = sphi %s4509_s0, %s77_s0   ;;  %s4288_s28 = sphi %s4507_s28, %s5204_s28   ;;  %s4284_s26 = sphi %s4505_s26, %s5203_s26   ;;  %s4280_s23 = sphi %s4503_s23, %s5202_s23   ;;  %s4276_s22 = sphi %s4501_s22, %s5201_s22  }
  0x52   : > { %s5098_s4 = sld [smem:[#allocation39_spill]]  ;;  %p87_p0 = scmp.ge.s32.totalorder %s86_s2, 2 }
  0x53   : > { %s5099_s27 = sld [smem:[#allocation38_spill]]  ;;  %s89_s7 = sadd.s32 1, %s4288_s28 }
  0x54   : > { %5100 = sst [smem:[#allocation41_spill]] %s4268_s16  ;;  %s798_s10 = sadd.s32 1, %s4272_s18 }
  0x55   : > { %5101 = sst [smem:[#allocation42_spill]] %s4272_s18  ;;  %p805_p1 = scmp.ne.s32.totalorder %s4272_s18, %s4268_s16 }
  0x56   : > { %5102 = sst [smem:[#allocation43_spill]] %s4276_s22  ;;  %s5206_s2 = smov (%p87_p0, %s86_s2), 0 }
  0x57   : > { %5103 = sst [smem:[#allocation44_spill]] %s4284_s26  ;;  %s5208_s7 = smov (!%p87_p0, %s89_s7), %s4288_s28 }
  0x58   : > { %5104 = sst [smem:[#allocation45_spill]] %s4288_s28  ;;  %s795_s11 = ssub.s32 %s4284_s26, %s5206_s2 }
  0x59   : > { %5105 = sst [smem:[#allocation46_spill]] %s4292_s0  ;;  %p806_p2 = scmp.eq.s32.totalorder %s4292_s0, 0 }
  0x5a   : > { %5106 = sst [smem:[#allocation47_spill]] %s5206_s2  ;;  %p91_p3 = scmp.ge.s32.totalorder %s5208_s7, 2 }
  0x5b   : > { %p796_p4 = scmp.eq.s32.totalorder %s795_s11, 0  ;;  %p807_p5 = por %p806_p2, %p805_p1 }
  0x5c   : > { %p811_p6 = scmp.ne.s32.totalorder %s4268_s16, %s4264_s15  ;;  %s5210_s7 = smov (%p91_p3, %s5208_s7), 0 }
  0x5d   : > { %5107 = sst [smem:[#allocation48_spill]] %s5210_s7  ;;  %s5109_s12 = sadd.s32 4294967295, %s4292_s0  }
  0x5e   : > { %s4549_s1 = scalar_select %p796_p4, %s4272_s18, %s798_s10  }
  0x5f   : > { %p812_p7 = scmp.eq.s32.totalorder %s5109_s12, 0  ;;  %p3975_p8 = scmp.lt.s32.totalorder %s4292_s0, 4 }
  0x60   : > { %5108 = sst [smem:[#allocation49_spill]] %s4549_s1  ;;  %s4555_s6 = sand.u32 1, %s4272_s18  }
  0x61   : > { %p4557_p9 = por %p812_p7, %p811_p6  ;;  %s4562_s2 = sshll.u32 %s4284_s26, 4 }
  0x62   : > { %p4564_p10 = pnand %p3975_p8, %p807_p5  ;;  %s1114_s10 = sand.u32 1, %s4292_s0  }
  0x63   : > { %s5110_s28 = scalar_select %p4557_p9, 1, 0 }
  0x64   : > { %s4571_s12 = scalar_lea.hbm %s5099_s27, %s4562_s2  ;;  %s1117_s11 = scalar_lea.vmem [#allocation5], %s4555_s6 }
  0x65   : > { %s1124_s7 = sshll.u32 %s1117_s11, 4  ;;  %s4576_s26 = scalar_lea.sflag [#allocation6], %s1114_s10  ;;  %s1125_s7 = int_to_ptr.vmem [resolvable:$true] %s1124_s7 }
  0x66   : > { %s4138_s1 = scalar_lea.hbm %s4571_s12, 16  ;;  %p4582_p0 = pneg %p4564_p10 }
  0x67   : > { %p4139_p13 = scmp.ne.s32.totalorder %s4571_s12, %s4138_s1  ;;  %s4143_s30 = scalar_lea.hbm %s5099_s27, 32 }
  0x68   : > { %p4144_p3 = scmp.lt.s32.totalorder %s4571_s12, %s5099_s27  ;;  %p4145_p4 = scmp.lt.s32.totalorder %s4143_s30, %s4138_s1 }
  0x69   : > { %p4141_p1 = pnand %p4582_p0, %p4139_p13 }
  0x6a   : > { %p4146_p5 = por %p4145_p4, %p4144_p3 }
  0x6b   : > { %p4142_p2 = pneg %p4141_p1 }
  0x6d   : > { %p4147_p6 = pnand %p4146_p5, %p4142_p2 }
  0x6f   : > { %4150 = shalt.err (!%p4147_p6)
}
  0x70   : > { %s4151_s11 = scalar_lea.vmem %s1125_s7, 16  ;;  %s4324_s10 = smov [#allocation5]  }
  0x71   : > { %p4152_p7 = scmp.ne.s32.totalorder %s1125_s7, %s4151_s11  ;;  %s4156_s24 = sshll.u32 %s4324_s10, 4  ;;  %s4157_s24 = int_to_ptr.vmem [resolvable:$false] %s4156_s24 }
  0x72   : > { %s4158_s19 = scalar_lea.vmem %s4157_s24, 32  ;;  %p4159_p12 = scmp.lt.s32.totalorder %s1125_s7, %s4157_s24 }
  0x73   : > { %p4154_p8 = pnand %p4152_p7, %p4582_p0  ;;  %p4160_p9 = scmp.lt.s32.totalorder %s4158_s19, %s4151_s11 }
  0x75   : > { %p4155_p11 = pneg %p4154_p8  ;;  %p4161_p13 = por %p4160_p9, %p4159_p12 }
  0x77   : > { %p4162_p1 = pnand %p4161_p13, %p4155_p11 }
  0x79   : > { %4165 = shalt.err (!%p4162_p1)
}
  0x7a   : > { %3971 = dma.hbm_to_vmem [thread:$0]  (!%p4564_p10), %s4571_s12, 16, %s1125_s7, %s4576_s26  }
  0x7b   : > { %p5113_p2 = scmp.lt.s32.totalorder %s4292_s0, 5  ;;  %p5114_p9 = scmp.ge.s32.totalorder %s4292_s0, 1 }
  0x7c   : > { %s4607_s24 = scalar_lea.hbm %s5097_s20, %s4562_s2  ;;  %s1100_s30 = scalar_lea.vmem [#allocation3], %s4555_s6 }
  0x7d   : > { %p4601_p11 = pnand %p5114_p9, %p5113_p2  ;;  %s1107_s1 = sshll.u32 %s1100_s30, 4  ;;  %s1108_s1 = int_to_ptr.vmem [resolvable:$true] %s1107_s1 }
  0x7e   : > { %s4612_s11 = scalar_lea.hbm %s5098_s4, %s4562_s2  ;;  %s1098_s10 = scalar_lea.sflag [#allocation4], %s4555_s6 }
  0x7f   : > { %s5115_s19 = scalar_select %p4601_p11, 1, 0 }
  0x80   : > { %s4166_s27 = scalar_lea.hbm %s4607_s24, 16  ;;  %s4171_s7 = scalar_lea.hbm %s5097_s20, 32 }
  0x81   : > { %p4167_p12 = scmp.ne.s32.totalorder %s4607_s24, %s4166_s27  ;;  %p4172_p5 = scmp.lt.s32.totalorder %s4607_s24, %s5097_s20 }
  0x82   : > { %p4173_p6 = scmp.lt.s32.totalorder %s4171_s7, %s4166_s27 }
  0x83   : > { %p4169_p3 = pnand %p4167_p12, %p4582_p0 }
  0x84   : > { %p4174_p7 = por %p4173_p6, %p4172_p5 }
  0x85   : > { %p4170_p4 = pneg %p4169_p3 }
  0x87   : > { %p4175_p8 = pnand %p4174_p7, %p4170_p4 }
  0x89   : > { %4178 = shalt.err (!%p4175_p8)
}
  0x8a   : > { %s4179_s12 = scalar_lea.vmem %s1108_s1, 16  ;;  %s4325_s2 = smov [#allocation3]  }
  0x8b   : > { %p4180_p13 = scmp.ne.s32.totalorder %s1108_s1, %s4179_s12  ;;  %s4184_s30 = sshll.u32 %s4325_s2, 4  ;;  %s4185_s30 = int_to_ptr.vmem [resolvable:$false] %s4184_s30 }
  0x8c   : > { %s4186_s14 = scalar_lea.vmem %s4185_s30, 32  ;;  %p4187_p9 = scmp.lt.s32.totalorder %s1108_s1, %s4185_s30 }
  0x8d   : > { %p4182_p1 = pnand %p4180_p13, %p4582_p0  ;;  %p4188_p11 = scmp.lt.s32.totalorder %s4186_s14, %s4179_s12 }
  0x8f   : > { %p4183_p2 = pneg %p4182_p1  ;;  %p4189_p12 = por %p4188_p11, %p4187_p9 }
  0x91   : > { %p4190_p3 = pnand %p4189_p12, %p4183_p2 }
  0x93   : > { %4193 = shalt.err (!%p4190_p3)
}
  0x94   : > { %3968 = dma.hbm_to_vmem [thread:$0]  (!%p4564_p10), %s4607_s24, 16, %s1108_s1, %s1098_s10  }
  0x95   : > { %s1134_s27 = scalar_lea.vmem [#allocation7], %s4555_s6  ;;  %s4194_s2 = scalar_lea.hbm %s4612_s11, 16 }
  0x96   : > { %s1141_s7 = sshll.u32 %s1134_s27, 4  ;;  %p4195_p4 = scmp.ne.s32.totalorder %s4612_s11, %s4194_s2  ;;  %s1142_s7 = int_to_ptr.vmem [resolvable:$true] %s1141_s7 }
  0x97   : > { %s4199_s14 = scalar_lea.hbm %s5098_s4, 32  ;;  %p4200_p6 = scmp.lt.s32.totalorder %s4612_s11, %s5098_s4 }
  0x98   : > { %p4197_p11 = pnand %p4195_p4, %p4582_p0  ;;  %p4201_p7 = scmp.lt.s32.totalorder %s4199_s14, %s4194_s2 }
  0x9a   : > { %p4198_p5 = pneg %p4197_p11  ;;  %p4202_p8 = por %p4201_p7, %p4200_p6 }
  0x9c   : > { %p4203_p13 = pnand %p4202_p8, %p4198_p5 }
  0x9e   : > { %4206 = shalt.err (!%p4203_p13)
}
  0x9f   : > { %s4207_s12 = scalar_lea.vmem %s1142_s7, 16  ;;  %s4326_s6 = smov [#allocation7]  }
  0xa0   : > { %p4208_p1 = scmp.ne.s32.totalorder %s1142_s7, %s4207_s12  ;;  %s4212_s24 = sshll.u32 %s4326_s6, 4  ;;  %s4213_s24 = int_to_ptr.vmem [resolvable:$false] %s4212_s24 }
  0xa1   : > { %s4214_s1 = scalar_lea.vmem %s4213_s24, 32  ;;  %p4215_p12 = scmp.lt.s32.totalorder %s1142_s7, %s4213_s24 }
  0xa2   : > { %p4210_p2 = pnand %p4208_p1, %p4582_p0  ;;  %p4216_p3 = scmp.lt.s32.totalorder %s4214_s1, %s4207_s12 }
  0xa4   : > { %p4211_p9 = pneg %p4210_p2  ;;  %p4217_p4 = por %p4216_p3, %p4215_p12 }
  0xa6   : > { %p4218_p11 = pnand %p4217_p4, %p4211_p9 }
  0xa8   : > { %4221 = shalt.err (!%p4218_p11)
}
  0xa9   : > { %3974 = dma.hbm_to_vmem [thread:$0]  (!%p4564_p10), %s4612_s11, 16, %s1142_s7, %s4576_s26  }
  0xaa   : > { %p5116_p5 = scmp.ne.s32.totalorder %s5115_s19, 0 }
  0xac   : > { %1150 = sbr.rel (%p5116_p5) target bundleno = 4270 (0x10ae), region = 140 }
  0xb1   : > { %s4644_s18 = sand.u32 1, %s4268_s16   ;;  %p5118_p0 = scmp.ne.s32.totalorder %s5110_s28, 0 }
  0xb2   : > { %5117 = sst [smem:[#allocation50_spill]] %s4644_s18  ;;  %s1153_s10 = scalar_lea.sflag [#allocation4], %s4644_s18 }
  0xb3   : > { %4255 = dma.done.wait (%p5118_p0), %s1153_s10, 16  }
  0xb4   : > { %4257 = vsyncadd (%p5118_p0), %s1153_s10, 4294967280  ;;  %s5119_s15 = sadd.s32 4294967295, %s4292_s0  }
  0xb5   : > { %s1160_s26 = sand.u32 1, %s5119_s15  }
  0xb6   : > { %s1161_s19 = scalar_lea.sflag [#allocation6], %s1160_s26 }
  0xb7   : > { %4259 = dma.done.wait (%p5118_p0), %s1161_s19, 32  }
  0xb8   : > { %4261 = vsyncadd (%p5118_p0), %s1161_s19, 4294967264  ;;  %s5124_s21 = sld [smem:[#allocation14_spill]]  ;;  %p1357_p10 = scmp.lt.s32.totalorder %s4280_s23, 1 }
  0xb9   : > { %s5125_s25 = sld [smem:[#allocation15_spill]]  ;;  %p1371_p6 = scmp.lt.s32.totalorder %s4276_s22, 1 }
  0xba   : > { %s5126_s29 = sld [smem:[#allocation16_spill]]  ;;  %s5212_s23 = smov (!%p1357_p10, %s4280_s23), 1 }
  0xbb   : > { %s5130_s7 = sld [smem:[#allocation20_spill]]  ;;  %s4668_s6 = sshll.u32 %s5212_s23, 3 }
  0xbc   : > { %5132 = sst [smem:[#allocation51_spill]] %s5212_s23 }
  0xbd   : > { %s5133_s28 = sld [smem:[#allocation22_spill]] }
  0xbe   : > { %s4665_s14 = scalar_select %p1371_p6, %s4276_s22, 1 }
  0xbf   : > { %s5134_s12 = sld [smem:[#allocation23_spill]] }
  0xc0   : > { %s5135_s24 = sld [smem:[#allocation24_spill]]  ;;  %s3705_s20 = sshll.u32 %s4665_s14, 4 }
  0xc1   : > { %s5137_s26 = sld [smem:[#allocation26_spill]]  ;;  %s4680_s0 = scalar_lea.vmem %s5124_s21, %s3705_s20 }
  0xc2   : > { %s5138_s11 = sld [smem:[#allocation27_spill]]  ;;  %s4683_s18 = scalar_lea.vmem %s5125_s25, %s3705_s20 }
  0xc3   : > { %s5139_s4 = sld [smem:[#allocation28_spill]]  ;;  %s4686_s13 = scalar_lea.vmem %s5126_s29, %s3705_s20 }
  0xc4   : > { %s5140_s16 = sld [smem:[#allocation29_spill]]  ;;  %s4695_s23 = scalar_lea.vmem %s5130_s7, %s3705_s20 }
  0xc5   : > { %5141 = sst [smem:[#allocation52_spill]] %s4680_s0  ;;  %s3714_s0 = sshll.u32 %s4665_s14, 5 }
  0xc6   : > { %s5142_s22 = sld [smem:[#allocation30_spill]]  ;;  %s4706_s3 = scalar_lea.vmem %s5135_s24, %s3705_s20 }
  0xc7   : > { %5143 = sst [smem:[#allocation53_spill]] %s4683_s18  ;;  %s4700_s18 = scalar_lea.vmem %s5133_s28, %s3705_s20 }
  0xc8   : > { %s5144_s1 = sld [smem:[#allocation31_spill]]  ;;  %s1423_s27 = scalar_lea.vmem %s5137_s26, %s4665_s14 }
  0xc9   : > { %5145 = sst [smem:[#allocation54_spill]] %s4686_s13  ;;  %s4703_s13 = scalar_lea.vmem %s5134_s12, %s3705_s20 }
  0xca   : > { %s5146_s19 = sld [smem:[#allocation33_spill]]  ;;  %s1426_s30 = scalar_lea.vmem %s5138_s11, %s4665_s14 }
  0xcb   : > { %s5147_s5 = sld [smem:[#allocation32_spill]]  ;;  %s4715_s8 = scalar_lea.vmem %s5139_s4, %s3705_s20 }
  0xcc   : > { %s5148_s17 = sld [smem:[#allocation34_spill]]  ;;  %s1434_s7 = scalar_lea.vmem %s5140_s16, %s4665_s14 }
  0xcd   : > { %5149 = sst [smem:[#allocation55_spill]] %s4695_s23  ;;  %s4720_s23 = scalar_lea.vmem %s5142_s22, %s3705_s20 }
  0xce   : > { %s5150_s21 = sld [smem:[#allocation35_spill]]  ;;  %s1442_s2 = scalar_lea.vmem %s5144_s1, %s4665_s14 }
  0xcf   : > { %s5151_s25 = sld [smem:[#allocation36_spill]] }
  0xd0   : > { %5152 = sst [smem:[#allocation56_spill]] %s4700_s18  ;;  %s1450_s28 = scalar_lea.vmem %s5146_s19, %s4665_s14 }
  0xd1   : > { %s5153_s29 = sld [smem:[#allocation40_spill]]  ;;  %s4728_s18 = scalar_lea.vmem %s5147_s5, %s3714_s0 }
  0xd2   : > { %5154 = sst [smem:[#allocation57_spill]] %s4703_s13  ;;  %s1453_s12 = scalar_lea.vmem %s5148_s17, %s4665_s14 }
  0xd3   : > { %s5155_s15 = sld [smem:[#allocation50_spill]] }
  0xd4   : > { %5156 = sst [smem:[#allocation58_spill]] %s4706_s3  ;;  %s1456_s13 = scalar_lea.vmem %s5150_s21, %s4665_s14 }
  0xd5   : > { %s1459_s24 = scalar_lea.vmem %s5151_s25, %s4665_s14  ;;  %s5157_s10 = sld [smem:[#allocation43_spill]] }
  0xd7   : > { %s1463_s3 = scalar_lea.vmem %s5153_s29, %s4668_s6 }
  0xd9   : > { %s1171_s9 = scalar_lea.vmem [#allocation7], %s5155_s15 }
  0xdb   : > { %p3635_p7 = scmp.ne.s32.totalorder %s5157_s10, 0 }
  0xdc   : > { %s5158_s26 = sld [smem:[#allocation10_spill]] (!%p3635_p7) }
  0xdd   : > { %1468 = sbr.rel (%p3635_p7) target bundleno = 229 (0xe5), region = 156 }
  0xe2   : > { %s5159_s4 = scalar_lea.vmem %s5158_s26, %s4668_s6  ;;  %vm1470_vm0 = vcmask 261120  }
  0xe3   : > { %v1469_v0 = vld [vmem:[%s5159_s4] sm:$0xff] }
  0xe4   : > { %1471 = vst.msk [vmem:[#allocation2] sm:$0xff] %vm1470_vm0, %v1469_v0 }
  0xe5 PF: > { %s5160_s20 = sld [smem:[#allocation52_spill]]  ;;  %v4327_v2 = vmov 0.0   ;;  %vm4328_vm1 = vmmov 0   ;;  %vm1511_vm2 = vcmask 261120   ;;  %vm1690_vm3 = vcmask 64512   ;;  %s4329_s29 = smov 112  }
  0xe6   : > { %s5161_s16 = sld [smem:[#allocation53_spill]]  ;;  %3779 = vmatprep.subr.bf16.mxu0 %v4327_v2  ;;  %3787 = vmatprep.subr.bf16.mxu1 %v4327_v2  ;;  %s4330_s0 = smov 120   ;;  %v1472_v35 = vlaneseq  ;;  %vm1752_vm5 = vcmask 1043456   ;;  %vm2142_vm6 = vcmask 130048   ;;  %vm2144_vm7 = vcmask 195584  }
  0xe7   : > { %3783 = vmatprep.mubr.msk.bf16.mxu0 %vm4328_vm1, %v4327_v2  ;;  %s5162_s5 = sld [smem:[#allocation17_spill]]  ;;  %3791 = vmatprep.mubr.msk.bf16.mxu1 %vm4328_vm1, %v4327_v2  ;;  %s4331_s11 = smov 104   ;;  %vm3105_vm8 = vcmask 523264  }
  0xe8   : > { %s5163_s17 = sld [smem:[#allocation18_spill]]  ;;  %v1473_v36 = vshrl.u32 %v1472_v35, 7  ;;  %v1475_v37 = vand.u32 127, %v1472_v35 }
  0xe9   : > { %s5166_s22 = sld [smem:[#allocation54_spill]] }
  0xea   : > { %s5167_s1 = sld [smem:[#allocation12_spill]]  ;;  %vm1476_vm4 = vcmp.gt.s32.totalorder %v1475_v37, %v1473_v36 }
  0xeb   : > { %v4078_v1 = vld [vmem:[%s5160_s20 + $0x8] sm:$0xff]   ;;  %v4080_v4 = vld [vmem:[%s5160_s20] sm:$0xff]   ;;  %s5168_s15 = sld [smem:[#allocation51_spill]]  ;;  %v1477_v38 = vsel %vm1476_vm4, -1e+30, %v4327_v2  ;;  %s4332_s20 = smov 8  }
  0xec   : > { %v4079_v3 = vld [vmem:[%s5161_s16 + $0x8] sm:$0xff]   ;;  %3780 = vmatpush3.bf16.msra.mxu0 %v4078_v1  ;;  %v4081_v5 = vld [vmem:[%s5161_s16] sm:$0xff]   ;;  %s5169_s19 = sld [smem:[#allocation19_spill]]  ;;  %s4333_s16 = smov 16  }
  0xed   : > { %3788 = vmatpush3.bf16.msra.mxu1 %v4079_v3  ;;  %3781 = vmatprep.subr.bf16.mxu0 %v4327_v2  ;;  %v4755_v6 = vld [vmem:[#allocation2] sm:$0xff]  ;;  %s5164_s21 = scalar_lea.vmem %s5162_s5, %s4665_s14  ;;  %s5172_s4 = sld [smem:[#allocation55_spill]] }
  0xee   : > { %3789 = vmatprep.subr.bf16.mxu1 %v4327_v2  ;;  %v1487_v7 = vpack.c.bf16 %v4755_v6, %v4755_v6  ;;  %v3637_v8 = vld [vmem:[%s5164_s21] ss:$0 sm:$0xff]  ;;  %s5165_s25 = scalar_lea.vmem %s5163_s17, %s4665_s14  ;;  %s4334_s5 = smov 24  }
  0xef   : > { %v3641_v9 = vld [vmem:[%s5165_s25] ss:$0 sm:$0xff]  ;;  %v4082_v24 = vld [vmem:[%s5166_s22 + $0x8] sm:$0xff]   ;;  %s5173_s17 = sld [smem:[#allocation21_spill]] }
  0xf0   : > { %3782 = vmatpush3.bf16.msra.mxu0 %v4080_v4  ;;  %v4083_v25 = vld [vmem:[%s5166_s22] sm:$0xff]   ;;  %s5175_s25 = sld [smem:[#allocation57_spill]] }
  0xf1   : > { %3790 = vmatpush3.bf16.msra.mxu1 %v4081_v5  ;;  %3795 = vmatprep.subr.bf16.mxu0 %v4327_v2  ;;  %s5170_s10 = scalar_lea.vmem %s5167_s1, %s5168_s15  ;;  %s5176_s22 = sld [smem:[#allocation11_spill]] }
  0xf2   : > { %3803 = vmatprep.subr.bf16.mxu1 %v4327_v2  ;;  %v3636_v39 = vld [vmem:[%s5170_s10] ss:$0 sm:$0xff]  ;;  %s5171_s26 = scalar_lea.vmem %s5169_s19, %s4665_s14  ;;  %s5177_s1 = sld [smem:[#allocation56_spill]] }
  0xf3   : > { %3784 = vmatmul.mubr.msk.bf16.vlgmr.msra.gmra.mxu0 %vm1511_vm2, %v1487_v7  ;;  %v1485_v40 = vadd.f32 %v3636_v39, %v1477_v38  ;;  %v3645_v47 = vld [vmem:[%s5171_s26] ss:$0 sm:$0xff] }
  0xf4   : > { %3792 = vmatmul.mubr.msk.bf16.vlgmr.msra.gmra.mxu1 %vm1511_vm2, %v1487_v7  ;;  %3799 = vmatprep.mubr.msk.bf16.mxu0 %vm4328_vm1, %v4327_v2 }
  0xf5   : > { %3805 = vmatprep.mubr.msk.bf16.mxu1 %vm4328_vm1, %v4327_v2  ;;  %3796 = vmatpush3.bf16.msra.mxu0 %v4082_v24  ;;  %s5174_s21 = scalar_lea.vmem %s5173_s17, %s4665_s14  ;;  %s5182_s17 = sld [smem:[#allocation25_spill]] }
  0xf6   : > { %3797 = vmatprep.subr.bf16.mxu0 %v4327_v2 }
  0xf7   : > { %s5178_s19 = scalar_lea.vmem %s5176_s22, %s4668_s6 }
  0xf9   : > { %3798 = vmatpush3.bf16.msra.mxu0 %v4083_v25 }
  0xfa   : > { %3809 = vmatprep.subr.bf16.mxu0 %v4327_v2 }
  0xfc   : > { %3800 = vmatmul.mubr.msk.bf16.vlgmr.msra.gmra.mxu0 %vm1511_vm2, %v1487_v7 }
  0xfd   : > { %3811 = vmatprep.mubr.msk.bf16.mxu0 %vm4328_vm1, %v4327_v2 }
 0x1b3   : > { %v1549_v10 = vpop.f32.mrf.mxu0 }
 0x1b4   : > { %v1550_v11 = vadd.f32 %v3637_v8, %v1549_v10  ;;  %v1613_v12 = vpop.f32.mrf.mxu1 }
 0x1b5   : > { %v1614_v13 = vadd.f32 %v3641_v9, %v1613_v12  ;;  %v3785_v14 = vpop.f32.mrf.mxu0 }
 0x1b6   : > { %v1555_v15 = vmul.f32 0.35355338, %v1550_v11  ;;  %v3793_v16 = vpop.f32.mrf.mxu1 }
 0x1b7   : > { %v1688_v17 = vpack.c.bf16 %v1614_v13, %v1614_v13  ;;  %v1552_v18 = vpop.f32.mrf.mxu0 }
 0x1b8   : > { %v1616_v19 = vpop.f32.mrf.mxu1  ;;  %v1687_v20 = vpack.c.bf16 %v1555_v15, %v1555_v15 }
 0x1b9   : > { %1911 = vrot.lane.b32.xlu1 %v1688_v17, %s4329_s29  ;;  %1800 = vrot.lane.b32.xlu0 %v1688_v17, %s4330_s0  ;;  %v3786_v21 = vpop.f32.mrf.mxu0  ;;  %v1695_v22 = vsel %vm1690_vm3, %v1688_v17, 0 }
 0x1ba   : > { %v3794_v23 = vpop.f32.mrf.mxu1  ;;  %3804 = vmatpush3.bf16.xpose.msra.mxu1 %v1695_v22 }
 0x1bb   : > { %3815 = vmatprep.subr.bf16.mxu1 %v4327_v2 }
 0x1bc   : > { %v1676_v48 = vpop.f32.mrf.mxu0 }
 0x1bd   : > { %1909 = vrot.lane.b32.xlu1 %v1687_v20, %s4329_s29  ;;  %1797 = vrot.lane.b32.xlu0 %v1687_v20, %s4330_s0  ;;  %v1677_v49 = vadd.f32 %v3645_v47, %v1676_v48 }
 0x1be   : > { %v3801_v50 = vpop.f32.mrf.mxu0 }
 0x1bf   : > { %v1689_v51 = vpack.c.bf16 %v1677_v49, %v1677_v49 }
 0x1c0   : > { %v1679_v52 = vpop.f32.mrf.mxu0 }
 0x1c1   : > { %2019 = vrot.lane.b32.xlu1 %v1687_v20, %s4331_s11  ;;  %2021 = vrot.lane.b32.xlu0 %v1688_v17, %s4331_s11  ;;  %v1754_v53 = vsel %vm1752_vm5, %v1689_v51, 0 }
 0x1c2   : > { %3806 = vmatmul.mubr.msk.bf16.vlgmr.msra.gmra.mxu1 %vm1690_vm3, %v1687_v20  ;;  %v3802_v54 = vpop.f32.mrf.mxu0  ;;  %3810 = vmatpush3.bf16.msra.mxu0 %v1754_v53 }
 0x1c3   : > { %3817 = vmatprep.mubr.msk.bf16.mxu1 %vm4328_vm1, %v4327_v2  ;;  %3821 = vmatprep.subr.bf16.mxu0 %v4327_v2 }
 0x22b   : > { %v1801_v26 = vpop.permute.xlu0 %1800  ;;  %v1912_v28 = vpop.permute.xlu1 %1911 }
 0x22c   : > { %v1806_v27 = vsel %vm1690_vm3, %v1801_v26, 0  ;;  %v1917_v30 = vsel %vm1690_vm3, %v1912_v28, 0 }
 0x22d   : > { %3816 = vmatpush3.bf16.xpose.msra.mxu1 %v1806_v27 }
 0x22e   : > { %3827 = vmatprep.subr.bf16.mxu1 %v4327_v2 }
 0x22f   : > { %v1798_v29 = vpop.permute.xlu0 %1797  ;;  %v1910_v32 = vpop.permute.xlu1 %1909 }
 0x233   : > { %v2022_v31 = vpop.permute.xlu0 %2021  ;;  %v2020_v34 = vpop.permute.xlu1 %2019 }
 0x234   : > { %3818 = vmatmul.mubr.msk.bf16.vlgmr.msra.gmra.mxu1 %vm1690_vm3, %v1798_v29  ;;  %v2027_v33 = vsel %vm1690_vm3, %v2022_v31, 0 }
 0x235   : > { %3828 = vmatpush3.bf16.xpose.msra.mxu1 %v1917_v30  ;;  %3829 = vmatprep.mubr.msk.bf16.mxu1 %vm4328_vm1, %v4327_v2 }
 0x236   : > { %3839 = vmatprep.subr.bf16.mxu1 %v4327_v2 }
 0x23c   : > { %3830 = vmatmul.mubr.msk.bf16.vlgmr.msra.gmra.mxu1 %vm1690_vm3, %v1910_v32 }
 0x23d   : > { %3840 = vmatpush3.bf16.xpose.msra.mxu1 %v2027_v33  ;;  %3841 = vmatprep.mubr.msk.bf16.mxu1 %vm4328_vm1, %v4327_v2 }
 0x23e   : > { %3851 = vmatprep.subr.bf16.mxu1 %v4327_v2 }
 0x244   : > { %3842 = vmatmul.mubr.msk.bf16.vlgmr.msra.gmra.mxu1 %vm1690_vm3, %v2020_v34 }
 0x245   : > { %3855 = vmatprep.mubr.msk.bf16.mxu1 %vm4328_vm1, %v4327_v2 }
 0x282   : > { %v1731_v41 = vpop.f32.mrf.mxu1 }
 0x283   : > { %v1732_v42 = vadd.f32 %v1731_v41, %v1485_v40 }
 0x284   : > { %v3807_v43 = vpop.f32.mrf.mxu1 }
 0x285   : > { %v1737_v44 = vsel %vm1690_vm3, %v1732_v42, -inf }
 0x286   : > { %v1734_v45 = vpop.f32.mrf.mxu1  ;;  %1738 = vmax.xlane.f32.xlu0 %v1737_v44 }
 0x288   : > { %v3808_v46 = vpop.f32.mrf.mxu1 }
 0x2f4   : > { %v1842_v55 = vpop.f32.mrf.mxu1 }
 0x2f5   : > { %v1843_v56 = vadd.f32 %v1842_v55, %v1485_v40 }
 0x2f6   : > { %v3819_v57 = vpop.f32.mrf.mxu1 }
 0x2f7   : > { %v1848_v58 = vsel %vm1690_vm3, %v1843_v56, -inf  ;;  %v4084_v57 = vld [vmem:[%s5172_s4 + $0x8] sm:$0xff]  }
 0x2f8   : > { %v1845_v59 = vpop.f32.mrf.mxu1  ;;  %1849 = vmax.xlane.f32.xlu1 %v1848_v58  ;;  %3852 = vmatpush3.bf16.msra.mxu1 %v4084_v57 }
 0x2f9   : > { %3853 = vmatprep.subr.bf16.mxu1 %v4327_v2 }
 0x2fa   : > { %v3820_v60 = vpop.f32.mrf.mxu1 }
 0x2fb   : > { %v4085_v60 = vld [vmem:[%s5172_s4] sm:$0xff]  }
 0x2fc   : > { %v1953_v61 = vpop.f32.mrf.mxu1  ;;  %3854 = vmatpush3.bf16.msra.mxu1 %v4085_v60 }
 0x2fd   : > { %v1954_v62 = vadd.f32 %v1953_v61, %v1485_v40  ;;  %3867 = vmatprep.subr.bf16.mxu1 %v4327_v2 }
 0x2fe   : > { %v3831_v63 = vpop.f32.mrf.mxu1 }
 0x2ff   : > { %v1959_v0 = vsel %vm1690_vm3, %v1954_v62, -inf }
 0x300   : > { %v1956_v1 = vpop.f32.mrf.mxu1  ;;  %1960 = vmax.xlane.f32.xlu0 %v1959_v0 }
 0x302   : > { %v3832_v3 = vpop.f32.mrf.mxu1 }
 0x304   : > { %v2063_v4 = vpop.f32.mrf.mxu1 }
 0x305   : > { %v2064_v5 = vadd.f32 %v2063_v4, %v1485_v40 }
 0x306   : > { %v3843_v7 = vpop.f32.mrf.mxu1 }
 0x307   : > { %v2069_v8 = vsel %vm1690_vm3, %v2064_v5, -inf }
 0x308   : > { %v2066_v9 = vpop.f32.mrf.mxu1  ;;  %2070 = vmax.xlane.f32.xlu0 %v2069_v8 }
 0x30a   : > { %v3844_v10 = vpop.f32.mrf.mxu1 }
 0x30f   : > { %v1739_v11 = vpop.xlane.xlu0 %1738 }
 0x310   : > { %v1740_v12 = vsub.f32 %v1732_v42, %v1739_v11 }
 0x312   : > { %v1741_v13 = vmul.f32 1.442695, %v1740_v12 }
 0x314   : > { %4100 = vpow2.f32 %v1741_v13 }
 0x321   : > { %v4101_v14 = vpop.eup %4100 }
 0x322   : > { %v1743_v15 = vsel %vm1690_vm3, %v4101_v14, 0.0 }
 0x323   : > { %1744 = vadd.xlane.f32.xlu1 %v1743_v15 }
 0x334   : > { %1861 = vrot.lane.b32.xlu1 %v1689_v51, %s4330_s0 }
 0x381   : > { %v1850_v16 = vpop.xlane.xlu1 %1849 }
 0x382   : > { %v1851_v17 = vsub.f32 %v1843_v56, %v1850_v16  ;;  %v3657_v16 = vld [vmem:[%s5174_s21] ss:$0 sm:$0xff] }
 0x384   : > { %v1852_v18 = vmul.f32 1.442695, %v1851_v17 }
 0x386   : > { %4102 = vpow2.f32 %v1852_v18 }
 0x389   : > { %v1961_v19 = vpop.xlane.xlu0 %1960 }
 0x38a   : > { %v1962_v20 = vsub.f32 %v1954_v62, %v1961_v19 }
 0x38c   : > { %v1963_v21 = vmul.f32 1.442695, %v1962_v20 }
 0x38e   : > { %4104 = vpow2.f32 %v1963_v21 }
 0x391   : > { %v2071_v22 = vpop.xlane.xlu0 %2070 }
 0x392   : > { %v2072_v23 = vsub.f32 %v2064_v5, %v2071_v22 }
 0x393   : > { %v4103_v24 = vpop.eup %4102 }
 0x394   : > { %v2073_v25 = vmul.f32 1.442695, %v2072_v23  ;;  %v1854_v26 = vsel %vm1690_vm3, %v4103_v24, 0.0 }
 0x395   : > { %1855 = vadd.xlane.f32.xlu0 %v1854_v26 }
 0x396   : > { %4106 = vpow2.f32 %v2073_v25 }
 0x39b   : > { %v4105_v27 = vpop.eup %4104 }
 0x39c   : > { %v1965_v28 = vsel %vm1690_vm3, %v4105_v27, 0.0 }
 0x39d   : > { %1966 = vadd.xlane.f32.xlu1 %v1965_v28 }
 0x3a3   : > { %v4107_v29 = vpop.eup %4106 }
 0x3a4   : > { %v2075_v30 = vsel %vm1690_vm3, %v4107_v29, 0.0 }
 0x3a5   : > { %2076 = vadd.xlane.f32.xlu0 %v2075_v30  ;;  %v2239_v30 = vld [vmem:[%s5178_s19] sm:$0xff] }
 0x3ac   : > { %v1745_v31 = vpop.xlane.xlu1 %1744 }
 0x3ad   : > { %4108 = vrcp.f32 %v1745_v31  ;;  %v2240_v31 = vpack.c.bf16 %v2239_v30, %v2239_v30 }
 0x3ae   : > { %2081 = vrot.lane.b32.xlu1 %v1689_v51, %s4331_s11 }
 0x3b0   : > { %v1862_v33 = vpop.permute.xlu1 %1861 }
 0x3b1   : > { %v1867_v36 = vsel %vm1752_vm5, %v1862_v33, 0  ;;  %v4089_v33 = vld [vmem:[%s5177_s1] sm:$0xff]  }
 0x3ba   : > { %v4109_v32 = vpop.eup %4108 }
 0x3bb   : > { %1971 = vrot.lane.b32.xlu0 %v1689_v51, %s4329_s29  ;;  %v1747_v34 = vmul.f32 %v4109_v32, %v4101_v14  ;;  %v4088_v32 = vld [vmem:[%s5177_s1 + $0x8] sm:$0xff]  }
 0x3bd   : > { %v1748_v35 = vpack.c.bf16 %v1747_v34, %v1747_v34 }
 0x3bf   : > { %3812 = vmatmul.mubr.msk.bf16.vlgmr.msra.gmra.mxu0 %vm1690_vm3, %v1748_v35 }
 0x3c0   : > { %3822 = vmatpush3.bf16.msra.mxu0 %v1867_v36  ;;  %3823 = vmatprep.mubr.msk.bf16.mxu0 %vm4328_vm1, %v4327_v2 }
 0x3c1   : > { %3833 = vmatprep.subr.bf16.mxu0 %v4327_v2 }
 0x41e   : > { %v1856_v37 = vpop.xlane.xlu0 %1855 }
 0x41f   : > { %4110 = vrcp.f32 %v1856_v37 }
 0x426   : > { %v1967_v38 = vpop.xlane.xlu1 %1966 }
 0x427   : > { %4112 = vrcp.f32 %v1967_v38  ;;  %v3661_v38 = vld [vmem:[%s1453_s12] ss:$0 sm:$0xff]  ;;  %s5185_s12 = sld [smem:[#allocation13_spill]] }
 0x42a   : > { %v2082_v47 = vpop.permute.xlu1 %2081 }
 0x42b   : > { %v2087_v49 = vsel %vm1752_vm5, %v2082_v47, 0 }
 0x42c   : > { %v4111_v39 = vpop.eup %4110 }
 0x42d   : > { %v1858_v40 = vmul.f32 %v4111_v39, %v4103_v24 }
 0x42e   : > { %v2077_v41 = vpop.xlane.xlu0 %2076 }
 0x42f   : > { %4114 = vrcp.f32 %v2077_v41  ;;  %v1859_v42 = vpack.c.bf16 %v1858_v40, %v1858_v40  ;;  %v3662_v40 = vld [vmem:[%s1456_s13] ss:$0 sm:$0xff]  ;;  %s5183_s13 = scalar_lea.vmem %s5182_s17, %s4665_s14  ;;  %s5195_s14 = sld [smem:[#allocation43_spill]] }
 0x431   : > { %3824 = vmatmul.mubr.msk.bf16.vlgmr.msra.gmra.mxu0 %vm1690_vm3, %v1859_v42 }
 0x432   : > { %v1972_v43 = vpop.permute.xlu0 %1971  ;;  %3835 = vmatprep.mubr.msk.bf16.mxu0 %vm4328_vm1, %v4327_v2 }
 0x433   : > { %v1977_v44 = vsel %vm1752_vm5, %v1972_v43, 0 }
 0x434   : > { %v4113_v45 = vpop.eup %4112  ;;  %3834 = vmatpush3.bf16.msra.mxu0 %v1977_v44  ;;  %v3667_v44 = vld [vmem:[%s1423_s27] ss:$0 sm:$0xff]  ;;  %s5184_s27 = sld [smem:[#allocation58_spill]] }
 0x435   : > { %3845 = vmatprep.subr.bf16.mxu0 %v4327_v2  ;;  %v1969_v46 = vmul.f32 %v4113_v45, %v4105_v27  ;;  %p3702_p8 = scmp.ne.s32.totalorder %s5195_s14, 1 }
 0x437   : > { %v1970_v48 = vpack.c.bf16 %v1969_v46, %v1969_v46 }
 0x439   : > { %3836 = vmatmul.mubr.msk.bf16.vlgmr.msra.gmra.mxu0 %vm1690_vm3, %v1970_v48 }
 0x43a   : > { %3846 = vmatpush3.bf16.msra.mxu0 %v2087_v49  ;;  %3847 = vmatprep.mubr.msk.bf16.mxu0 %vm4328_vm1, %v4327_v2 }
 0x43b   : > { %3859 = vmatprep.subr.bf16.mxu0 %v4327_v2 }
 0x43c   : > { %v4115_v50 = vpop.eup %4114 }
 0x43d   : > { %v2079_v51 = vmul.f32 %v4115_v50, %v4107_v29  ;;  %v4086_v29 = vld [vmem:[%s5175_s25 + $0x8] sm:$0xff]  }
 0x43f   : > { %v2080_v52 = vpack.c.bf16 %v2079_v51, %v2079_v51 }
 0x441   : > { %3848 = vmatmul.mubr.msk.bf16.vlgmr.msra.gmra.mxu0 %vm1690_vm3, %v2080_v52  ;;  %v3663_v52 = vld [vmem:[%s5183_s13] ss:$0 sm:$0xff] }
 0x442   : > { %3863 = vmatprep.mubr.msk.bf16.mxu0 %vm4328_vm1, %v4327_v2  ;;  %3860 = vmatpush3.bf16.msra.mxu0 %v4088_v32 }
 0x443   : > { %3861 = vmatprep.subr.bf16.mxu0 %v4327_v2 }
 0x446   : > { %3862 = vmatpush3.bf16.msra.mxu0 %v4089_v33 }
 0x447   : > { %3875 = vmatprep.subr.bf16.mxu0 %v4327_v2 }
 0x47f   : > { %v1790_v53 = vpop.f32.mrf.mxu0 }
 0x481   : > { %v3813_v54 = vpop.f32.mrf.mxu0 }
 0x483   : > { %v1793_v55 = vpop.f32.mrf.mxu0 }
 0x485   : > { %v3814_v56 = vpop.f32.mrf.mxu0 }
 0x4f1   : > { %v1903_v58 = vpop.f32.mrf.mxu0 }
 0x4f2   : > { %2130 = vrot.lane.b32.xlu1 %v1903_v58, %s4332_s20 }
 0x4f3   : > { %v3825_v59 = vpop.f32.mrf.mxu0 }
 0x4f5   : > { %v1906_v61 = vpop.f32.mrf.mxu0 }
 0x4f7   : > { %v3826_v62 = vpop.f32.mrf.mxu0 }
 0x4f8   : > { %v4090_v62 = vld [vmem:[%s5184_s27 + $0x8] sm:$0xff]  }
 0x4f9   : > { %v2013_v63 = vpop.f32.mrf.mxu0 }
 0x4fa   : > { %2134 = vrot.lane.b32.xlu0 %v2013_v63, %s4333_s16  ;;  %v4091_v63 = vld [vmem:[%s5184_s27] sm:$0xff]  }
 0x4fb   : > { %v3837_v0 = vpop.f32.mrf.mxu0 }
 0x4fd   : > { %v2016_v1 = vpop.f32.mrf.mxu0 }
 0x4ff   : > { %v3838_v3 = vpop.f32.mrf.mxu0 }
 0x501   : > { %v2123_v4 = vpop.f32.mrf.mxu0 }
 0x502   : > { %2138 = vrot.lane.b32.xlu1 %v2123_v4, %s4334_s5 }
 0x503   : > { %v3849_v5 = vpop.f32.mrf.mxu0 }
 0x505   : > { %v2126_v7 = vpop.f32.mrf.mxu0 }
 0x507   : > { %v3850_v8 = vpop.f32.mrf.mxu0 }
 0x564   : > { %v2131_v9 = vpop.permute.xlu1 %2130 }
 0x565   : > { %v2141_v11 = vsel %vm1690_vm3, %v1790_v53, %v2131_v9 }
 0x56c   : > { %v2135_v10 = vpop.permute.xlu0 %2134 }
 0x56d   : > { %v2143_v12 = vsel %vm2142_vm6, %v2141_v11, %v2135_v10 }
 0x574   : > { %v2139_v13 = vpop.permute.xlu1 %2138 }
 0x575   : > { %v2145_v14 = vsel %vm2144_vm7, %v2143_v12, %v2139_v13 }
 0x576   : > { %v2146_v15 = vpack.c.bf16 %v2145_v14, %v2145_v14 }
 0x578   : > { %3856 = vmatmul.mubr.msk.bf16.vlgmr.msra.gmra.mxu1 %vm1511_vm2, %v2146_v15 }
 0x579   : > { %3871 = vmatprep.mubr.msk.bf16.mxu1 %vm4328_vm1, %v4327_v2  ;;  %3868 = vmatpush3.bf16.msra.mxu1 %v4086_v29 }
 0x57a   : > { %3869 = vmatprep.subr.bf16.mxu1 %v4327_v2 }
 0x638   : > { %v2202_v17 = vpop.f32.mrf.mxu1 }
 0x639   : > { %v2203_v18 = vadd.f32 %v3657_v16, %v2202_v17  ;;  %v3671_v16 = vld [vmem:[%s1426_s30] ss:$0 sm:$0xff] }
 0x63a   : > { %v3857_v19 = vpop.f32.mrf.mxu1 }
 0x63b   : > { %v2208_v20 = vadd.f32 %v2203_v18, %v4755_v6  ;;  %v4087_v6 = vld [vmem:[%s5175_s25] sm:$0xff]   ;;  %s5187_s25 = scalar_lea.vmem %s5185_s12, %s5168_s15 }
 0x63c   : > { %v2205_v21 = vpop.f32.mrf.mxu1  ;;  %3870 = vmatpush3.bf16.msra.mxu1 %v4087_v6  ;;  %v3675_v9 = vld [vmem:[%s5187_s25] ss:$0 sm:$0xff] }
 0x63d   : > { %v2211_v22 = vsel %vm1511_vm2, %v2208_v20, 0.0  ;;  %3883 = vmatprep.subr.bf16.mxu1 %v4327_v2 }
 0x63e   : > { %2212 = vadd.xlane.f32.xlu0 %v2211_v22  ;;  %v3858_v23 = vpop.f32.mrf.mxu1 }
 0x63f   : > { %3872 = vmatmul.mubr.msk.bf16.vlgmr.msra.gmra.mxu1 %vm1511_vm2, %v2240_v31 }
 0x640   : > { %3885 = vmatprep.mubr.msk.bf16.mxu1 %vm4328_vm1, %v4327_v2 }
 0x6c7   : > { %v2213_v24 = vpop.xlane.xlu0 %2212 }
 0x6c8   : > { %v2215_v25 = vmul.f32 0.03125, %v2213_v24 }
 0x6ca   : > { %v2216_v26 = vsub.f32 %v2208_v20, %v2215_v25 }
 0x6cc   : > { %v2217_v27 = vmul.f32 %v2216_v26, %v2216_v26 }
 0x6ce   : > { %v2218_v28 = vsel %vm1511_vm2, %v2217_v27, 0.0 }
 0x6cf   : > { %2219 = vadd.xlane.f32.xlu1 %v2218_v28 }
 0x6ff   : > { %v2369_v45 = vpop.f32.mrf.mxu1 }
 0x700   : > { %v2370_v46 = vadd.f32 %v3667_v44, %v2369_v45 }
 0x701   : > { %v3873_v47 = vpop.f32.mrf.mxu1 }
 0x702   : > { %v2445_v48 = vpack.c.bf16 %v2370_v46, %v2370_v46 }
 0x703   : > { %v2372_v49 = vpop.f32.mrf.mxu1 }
 0x704   : > { %2561 = vrot.lane.b32.xlu0 %v2445_v48, %s4330_s0  ;;  %v2457_v51 = vsel %vm1690_vm3, %v2445_v48, 0 }
 0x705   : > { %v3874_v50 = vpop.f32.mrf.mxu1  ;;  %3884 = vmatpush3.bf16.xpose.msra.mxu1 %v2457_v51 }
 0x706   : > { %3895 = vmatprep.subr.bf16.mxu1 %v4327_v2 }
 0x708   : > { %2672 = vrot.lane.b32.xlu0 %v2445_v48, %s4329_s29 }
 0x70c   : > { %2782 = vrot.lane.b32.xlu0 %v2445_v48, %s4331_s11 }
 0x758   : > { %v2220_v34 = vpop.xlane.xlu1 %2219 }
 0x759   : > { %v2221_v35 = vmul.f32 0.03125, %v2220_v34 }
 0x75b   : > { %v2222_v36 = vadd.f32 1e-05, %v2221_v35 }
 0x75d   : > { %4116 = vrsqrt.f32 %v2222_v36 }
 0x76a   : > { %v4117_v37 = vpop.eup %4116 }
 0x76b   : > { %v2224_v39 = vmul.f32 %v4117_v37, %v2216_v26 }
 0x76d   : > { %v2231_v41 = vmul.f32 %v3661_v38, %v2224_v39 }
 0x76f   : > { %v4883_v42 = vadd.f32 %v3662_v40, %v2231_v41 }
 0x771   : > { %v2241_v43 = vpack.c.bf16 %v4883_v42, %v4883_v42 }
 0x773   : > { %3864 = vmatmul.mubr.msk.bf16.vlgmr.msra.gmra.mxu0 %vm1511_vm2, %v2241_v43 }
 0x774   : > { %3879 = vmatprep.mubr.msk.bf16.mxu0 %vm4328_vm1, %v4327_v2  ;;  %3876 = vmatpush3.bf16.msra.mxu0 %v4090_v62 }
 0x775   : > { %3877 = vmatprep.subr.bf16.mxu0 %v4327_v2 }
 0x776   : > { %v2562_v58 = vpop.permute.xlu0 %2561 }
 0x777   : > { %v2567_v60 = vsel %vm1690_vm3, %v2562_v58, 0 }
 0x778   : > { %3878 = vmatpush3.bf16.msra.mxu0 %v4091_v63 }
 0x779   : > { %3889 = vmatprep.subr.bf16.mxu0 %v4327_v2 }
 0x77a   : > { %v2673_v0 = vpop.permute.xlu0 %2672 }
 0x77b   : > { %3880 = vmatmul.mubr.msk.bf16.vlgmr.msra.gmra.mxu0 %vm1511_vm2, %v2240_v31  ;;  %v2678_v3 = vsel %vm1690_vm3, %v2673_v0, 0 }
 0x77c   : > { %3891 = vmatprep.mubr.msk.bf16.mxu0 %vm4328_vm1, %v4327_v2 }
 0x77e   : > { %v2783_v4 = vpop.permute.xlu0 %2782 }
 0x77f   : > { %v2788_v7 = vsel %vm1690_vm3, %v2783_v4, 0 }
 0x833   : > { %v2302_v53 = vpop.f32.mrf.mxu0 }
 0x834   : > { %v2303_v54 = vadd.f32 %v3663_v52, %v2302_v53 }
 0x835   : > { %v3865_v55 = vpop.f32.mrf.mxu0 }
 0x836   : > { %v2308_v56 = vmul.f32 0.35355338, %v2303_v54 }
 0x837   : > { %v2305_v57 = vpop.f32.mrf.mxu0 }
 0x838   : > { %v2444_v59 = vpack.c.bf16 %v2308_v56, %v2308_v56 }
 0x839   : > { %v3866_v61 = vpop.f32.mrf.mxu0 }
 0x83a   : > { %2558 = vrot.lane.b32.xlu1 %v2444_v59, %s4330_s0  ;;  %3886 = vmatmul.mubr.msk.bf16.vlgmr.msra.gmra.mxu1 %vm1690_vm3, %v2444_v59 }
 0x83b   : > { %3896 = vmatpush3.bf16.xpose.msra.mxu1 %v2567_v60  ;;  %3897 = vmatprep.mubr.msk.bf16.mxu1 %vm4328_vm1, %v4327_v2  ;;  %v2432_v17 = vpop.f32.mrf.mxu0 }
 0x83c   : > { %3907 = vmatprep.subr.bf16.mxu1 %v4327_v2  ;;  %v2433_v18 = vadd.f32 %v3671_v16, %v2432_v17 }
 0x83d   : > { %v3881_v19 = vpop.f32.mrf.mxu0 }
 0x83e   : > { %2670 = vrot.lane.b32.xlu1 %v2444_v59, %s4329_s29  ;;  %v2446_v20 = vpack.c.bf16 %v2433_v18, %v2433_v18 }
 0x83f   : > { %v2435_v21 = vpop.f32.mrf.mxu0 }
 0x840   : > { %v2515_v22 = vsel %vm1752_vm5, %v2446_v20, 0 }
 0x841   : > { %v3882_v23 = vpop.f32.mrf.mxu0  ;;  %3890 = vmatpush3.bf16.msra.mxu0 %v2515_v22 }
 0x842   : > { %2780 = vrot.lane.b32.xlu1 %v2444_v59, %s4331_s11  ;;  %3901 = vmatprep.subr.bf16.mxu0 %v4327_v2 }
 0x8ac   : > { %v2559_v1 = vpop.permute.xlu1 %2558 }
 0x8ad   : > { %3898 = vmatmul.mubr.msk.bf16.vlgmr.msra.gmra.mxu1 %vm1690_vm3, %v2559_v1 }
 0x8ae   : > { %3908 = vmatpush3.bf16.xpose.msra.mxu1 %v2678_v3  ;;  %3909 = vmatprep.mubr.msk.bf16.mxu1 %vm4328_vm1, %v4327_v2 }
 0x8af   : > { %3919 = vmatprep.subr.bf16.mxu1 %v4327_v2 }
 0x8b0   : > { %v2671_v5 = vpop.permute.xlu1 %2670 }
 0x8b4   : > { %v2781_v8 = vpop.permute.xlu1 %2780 }
 0x8b5   : > { %3910 = vmatmul.mubr.msk.bf16.vlgmr.msra.gmra.mxu1 %vm1690_vm3, %v2671_v5 }
 0x8b6   : > { %3920 = vmatpush3.bf16.xpose.msra.mxu1 %v2788_v7  ;;  %3921 = vmatprep.mubr.msk.bf16.mxu1 %vm4328_vm1, %v4327_v2 }
 0x8b7   : > { %3931 = vmatprep.subr.bf16.mxu1 %v4327_v2 }
 0x8bd   : > { %3922 = vmatmul.mubr.msk.bf16.vlgmr.msra.gmra.mxu1 %vm1690_vm3, %v2781_v8 }
 0x8be   : > { %3935 = vmatprep.mubr.msk.bf16.mxu1 %vm4328_vm1, %v4327_v2 }
 0x8fa   : > { %v2493_v10 = vpop.f32.mrf.mxu1 }
 0x8fb   : > { %v2494_v11 = vadd.f32 %v3675_v9, %v2493_v10 }
 0x8fc   : > { %v3887_v12 = vpop.f32.mrf.mxu1 }
 0x8fd   : > { %v2499_v13 = vsel %vm1690_vm3, %v2494_v11, -inf }
 0x8fe   : > { %2500 = vmax.xlane.f32.xlu0 %v2499_v13  ;;  %v2496_v14 = vpop.f32.mrf.mxu1 }
 0x900   : > { %v3888_v15 = vpop.f32.mrf.mxu1 }
 0x96d   : > { %v2603_v24 = vpop.f32.mrf.mxu1 }
 0x96e   : > { %v2604_v25 = vadd.f32 %v3675_v9, %v2603_v24 }
 0x96f   : > { %v3899_v26 = vpop.f32.mrf.mxu1 }
 0x970   : > { %v2609_v27 = vsel %vm1690_vm3, %v2604_v25, -inf  ;;  %v4092_v26 = vld [vmem:[%s4715_s8 + $0x8] sm:$0xff]  }
 0x971   : > { %2610 = vmax.xlane.f32.xlu1 %v2609_v27  ;;  %v2606_v28 = vpop.f32.mrf.mxu1  ;;  %3932 = vmatpush3.bf16.msra.mxu1 %v4092_v26 }
 0x972   : > { %3933 = vmatprep.subr.bf16.mxu1 %v4327_v2 }
 0x973   : > { %v3900_v29 = vpop.f32.mrf.mxu1 }
 0x974   : > { %v4093_v29 = vld [vmem:[%s4715_s8] sm:$0xff]  }
 0x975   : > { %v2714_v6 = vpop.f32.mrf.mxu1  ;;  %3934 = vmatpush3.bf16.msra.mxu1 %v4093_v29 }
 0x976   : > { %v2715_v30 = vadd.f32 %v3675_v9, %v2714_v6  ;;  %3947 = vmatprep.subr.bf16.mxu1 %v4327_v2 }
 0x977   : > { %v3911_v31 = vpop.f32.mrf.mxu1 }
 0x978   : > { %v2720_v32 = vsel %vm1690_vm3, %v2715_v30, -inf }
 0x979   : > { %2721 = vmax.xlane.f32.xlu0 %v2720_v32  ;;  %v2717_v33 = vpop.f32.mrf.mxu1 }
 0x97b   : > { %v3912_v34 = vpop.f32.mrf.mxu1 }
 0x97d   : > { %v2824_v35 = vpop.f32.mrf.mxu1 }
 0x97e   : > { %v2825_v36 = vadd.f32 %v3675_v9, %v2824_v35 }
 0x97f   : > { %v3923_v37 = vpop.f32.mrf.mxu1 }
 0x980   : > { %v2830_v38 = vsel %vm1690_vm3, %v2825_v36, -inf }
 0x981   : > { %2831 = vmax.xlane.f32.xlu0 %v2830_v38  ;;  %v2827_v39 = vpop.f32.mrf.mxu1 }
 0x983   : > { %v3924_v40 = vpop.f32.mrf.mxu1 }
 0x987   : > { %v2501_v41 = vpop.xlane.xlu0 %2500 }
 0x988   : > { %v2502_v43 = vsub.f32 %v2494_v11, %v2501_v41 }
 0x98a   : > { %v2503_v44 = vmul.f32 1.442695, %v2502_v43 }
 0x98c   : > { %4118 = vpow2.f32 %v2503_v44 }
 0x999   : > { %v4119_v45 = vpop.eup %4118 }
 0x99a   : > { %v2505_v46 = vsel %vm1690_vm3, %v4119_v45, 0.0 }
 0x99b   : > { %2506 = vadd.xlane.f32.xlu1 %v2505_v46 }
 0x9ac   : > { %2622 = vrot.lane.b32.xlu1 %v2446_v20, %s4330_s0 }
 0x9fa   : > { %v2611_v47 = vpop.xlane.xlu1 %2610 }
 0x9fb   : > { %v2612_v48 = vsub.f32 %v2604_v25, %v2611_v47  ;;  %v3684_v47 = vld [vmem:[%s1434_s7] ss:$0 sm:$0xff]  ;;  %s5190_s7 = sld [smem:[#allocation50_spill]] }
 0x9fd   : > { %v2613_v49 = vmul.f32 1.442695, %v2612_v48 }
 0x9ff   : > { %4120 = vpow2.f32 %v2613_v49 }
 0xa02   : > { %v2722_v50 = vpop.xlane.xlu0 %2721 }
 0xa03   : > { %v2723_v51 = vsub.f32 %v2715_v30, %v2722_v50 }
 0xa05   : > { %v2724_v52 = vmul.f32 1.442695, %v2723_v51 }
 0xa07   : > { %4122 = vpow2.f32 %v2724_v52 }
 0xa0a   : > { %v2832_v53 = vpop.xlane.xlu0 %2831 }
 0xa0b   : > { %v2833_v54 = vsub.f32 %v2825_v36, %v2832_v53 }
 0xa0c   : > { %v4121_v55 = vpop.eup %4120 }
 0xa0d   : > { %v2834_v56 = vmul.f32 1.442695, %v2833_v54  ;;  %v2615_v57 = vsel %vm1690_vm3, %v4121_v55, 0.0 }
 0xa0e   : > { %2616 = vadd.xlane.f32.xlu0 %v2615_v57 }
 0xa0f   : > { %4124 = vpow2.f32 %v2834_v56 }
 0xa14   : > { %v4123_v58 = vpop.eup %4122 }
 0xa15   : > { %v2726_v59 = vsel %vm1690_vm3, %v4123_v58, 0.0 }
 0xa16   : > { %2727 = vadd.xlane.f32.xlu1 %v2726_v59 }
 0xa1c   : > { %v4125_v60 = vpop.eup %4124 }
 0xa1d   : > { %v2836_v61 = vsel %vm1690_vm3, %v4125_v60, 0.0 }
 0xa1e   : > { %2837 = vadd.xlane.f32.xlu0 %v2836_v61  ;;  %v4095_v61 = vld [vmem:[%s4720_s23] sm:$0xff]  }
 0xa24   : > { %v2507_v62 = vpop.xlane.xlu1 %2506 }
 0xa25   : > { %4126 = vrcp.f32 %v2507_v62  ;;  %v4097_v62 = vld [vmem:[%s4728_s18 + $0x10] sm:$0xff]  }
 0xa27   : > { %2842 = vrot.lane.b32.xlu1 %v2446_v20, %s4331_s11 }
 0xa28   : > { %v2623_v0 = vpop.permute.xlu1 %2622 }
 0xa29   : > { %v2628_v4 = vsel %vm1752_vm5, %v2623_v0, 0 }
 0xa32   : > { %v4127_v63 = vpop.eup %4126 }
 0xa33   : > { %v2509_v1 = vmul.f32 %v4127_v63, %v4119_v45 }
 0xa34   : > { %2732 = vrot.lane.b32.xlu0 %v2446_v20, %s4329_s29 }
 0xa35   : > { %v2510_v3 = vpack.c.bf16 %v2509_v1, %v2509_v1 }
 0xa37   : > { %3892 = vmatmul.mubr.msk.bf16.vlgmr.msra.gmra.mxu0 %vm1690_vm3, %v2510_v3 }
 0xa38   : > { %3902 = vmatpush3.bf16.msra.mxu0 %v2628_v4  ;;  %3903 = vmatprep.mubr.msk.bf16.mxu0 %vm4328_vm1, %v4327_v2  ;;  %v3688_v4 = vld [vmem:[%s1459_s24] ss:$0 sm:$0xff] }
 0xa39   : > { %3913 = vmatprep.subr.bf16.mxu0 %v4327_v2 }
 0xa97   : > { %v2617_v5 = vpop.xlane.xlu0 %2616 }
 0xa98   : > { %4128 = vrcp.f32 %v2617_v5 }
 0xa9f   : > { %v2728_v7 = vpop.xlane.xlu1 %2727 }
 0xaa0   : > { %4130 = vrcp.f32 %v2728_v7 }
 0xaa3   : > { %v2843_v16 = vpop.permute.xlu1 %2842 }
 0xaa4   : > { %v2848_v18 = vsel %vm1752_vm5, %v2843_v16, 0 }
 0xaa5   : > { %v4129_v8 = vpop.eup %4128 }
 0xaa6   : > { %v2619_v9 = vmul.f32 %v4129_v8, %v4121_v55 }
 0xaa7   : > { %v2838_v10 = vpop.xlane.xlu0 %2837 }
 0xaa8   : > { %4132 = vrcp.f32 %v2838_v10  ;;  %v2620_v11 = vpack.c.bf16 %v2619_v9, %v2619_v9 }
 0xaaa   : > { %3904 = vmatmul.mubr.msk.bf16.vlgmr.msra.gmra.mxu0 %vm1690_vm3, %v2620_v11  ;;  %v4098_v11 = vld [vmem:[%s4728_s18 + $0x8] sm:$0xff]  }
 0xaab   : > { %v2733_v12 = vpop.permute.xlu0 %2732  ;;  %3915 = vmatprep.mubr.msk.bf16.mxu0 %vm4328_vm1, %v4327_v2 }
 0xaac   : > { %v2738_v13 = vsel %vm1752_vm5, %v2733_v12, 0  ;;  %v4099_v12 = vld [vmem:[%s4728_s18] sm:$0xff]  }
 0xaad   : > { %v4131_v14 = vpop.eup %4130  ;;  %3914 = vmatpush3.bf16.msra.mxu0 %v2738_v13  ;;  %v3690_v13 = vld [vmem:[%s1442_s2] ss:$0 sm:$0xff] }
 0xaae   : > { %3925 = vmatprep.subr.bf16.mxu0 %v4327_v2  ;;  %v2730_v15 = vmul.f32 %v4131_v14, %v4123_v58 }
 0xab0   : > { %v2731_v17 = vpack.c.bf16 %v2730_v15, %v2730_v15 }
 0xab2   : > { %3916 = vmatmul.mubr.msk.bf16.vlgmr.msra.gmra.mxu0 %vm1690_vm3, %v2731_v17 }
 0xab3   : > { %3926 = vmatpush3.bf16.msra.mxu0 %v2848_v18  ;;  %3927 = vmatprep.mubr.msk.bf16.mxu0 %vm4328_vm1, %v4327_v2 }
 0xab4   : > { %3939 = vmatprep.subr.bf16.mxu0 %v4327_v2 }
 0xab5   : > { %v4133_v19 = vpop.eup %4132 }
 0xab6   : > { %v2840_v20 = vmul.f32 %v4133_v19, %v4125_v60  ;;  %v4094_v60 = vld [vmem:[%s4720_s23 + $0x8] sm:$0xff]   ;;  %s5192_s23 = scalar_lea.vmem [#allocation3], %s5190_s7 }
 0xab7   : > { %v3689_v7 = vld [vmem:[%s5192_s23] ss:$0 sm:$0xff] }
 0xab8   : > { %v2841_v21 = vpack.c.bf16 %v2840_v20, %v2840_v20 }
 0xaba   : > { %3928 = vmatmul.mubr.msk.bf16.vlgmr.msra.gmra.mxu0 %vm1690_vm3, %v2841_v21  ;;  %v3694_v21 = vld [vmem:[%s1450_s28] ss:$0 sm:$0xff] }
 0xabb   : > { %3943 = vmatprep.mubr.msk.bf16.mxu0 %vm4328_vm1, %v4327_v2  ;;  %3940 = vmatpush3.bf16.msra.mxu0 %v4094_v60 }
 0xabc   : > { %3941 = vmatprep.subr.bf16.mxu0 %v4327_v2 }
 0xabf   : > { %3942 = vmatpush3.bf16.msra.mxu0 %v4095_v61 }
 0xaf7   : > { %v2551_v22 = vpop.f32.mrf.mxu0 }
 0xaf9   : > { %v3893_v23 = vpop.f32.mrf.mxu0 }
 0xafb   : > { %v2554_v24 = vpop.f32.mrf.mxu0 }
 0xafd   : > { %v3894_v25 = vpop.f32.mrf.mxu0 }
 0xb6a   : > { %v2664_v27 = vpop.f32.mrf.mxu0 }
 0xb6b   : > { %2891 = vrot.lane.b32.xlu1 %v2664_v27, %s4332_s20 }
 0xb6c   : > { %v3905_v28 = vpop.f32.mrf.mxu0 }
 0xb6e   : > { %v2667_v6 = vpop.f32.mrf.mxu0 }
 0xb70   : > { %v3906_v30 = vpop.f32.mrf.mxu0 }
 0xb72   : > { %v2774_v31 = vpop.f32.mrf.mxu0 }
 0xb73   : > { %2895 = vrot.lane.b32.xlu0 %v2774_v31, %s4333_s16 }
 0xb74   : > { %v3917_v32 = vpop.f32.mrf.mxu0 }
 0xb76   : > { %v2777_v33 = vpop.f32.mrf.mxu0 }
 0xb78   : > { %v3918_v34 = vpop.f32.mrf.mxu0 }
 0xb7a   : > { %v2884_v35 = vpop.f32.mrf.mxu0 }
 0xb7b   : > { %2899 = vrot.lane.b32.xlu1 %v2884_v35, %s4334_s5 }
 0xb7c   : > { %v3929_v36 = vpop.f32.mrf.mxu0 }
 0xb7e   : > { %v2887_v37 = vpop.f32.mrf.mxu0 }
 0xb80   : > { %v3930_v38 = vpop.f32.mrf.mxu0 }
 0xb81   : > { %v3701_v38 = vld [vmem:[%s1171_s9] ss:$0 sm:$0xff] }
 0xbdd   : > { %v2892_v39 = vpop.permute.xlu1 %2891 }
 0xbde   : > { %v2902_v41 = vsel %vm1690_vm3, %v2551_v22, %v2892_v39 }
 0xbe5   : > { %v2896_v40 = vpop.permute.xlu0 %2895 }
 0xbe6   : > { %v2903_v43 = vsel %vm2142_vm6, %v2902_v41, %v2896_v40 }
 0xbed   : > { %v2900_v44 = vpop.permute.xlu1 %2899 }
 0xbee   : > { %v2904_v45 = vsel %vm2144_vm7, %v2903_v43, %v2900_v44 }
 0xbef   : > { %v2905_v46 = vpack.c.bf16 %v2904_v45, %v2904_v45 }
 0xbf1   : > { %3936 = vmatmul.mubr.msk.bf16.vlgmr.msra.gmra.mxu1 %vm1511_vm2, %v2905_v46 }
 0xbf2   : > { %3955 = vmatprep.mubr.msk.bf16.mxu1 %vm4328_vm1, %v4327_v2 }
 0xcb1   : > { %v2961_v48 = vpop.f32.mrf.mxu1 }
 0xcb2   : > { %v2962_v49 = vadd.f32 %v3684_v47, %v2961_v48 }
 0xcb3   : > { %v3937_v50 = vpop.f32.mrf.mxu1 }
 0xcb4   : > { %v2967_v51 = vadd.f32 %v2962_v49, %v4883_v42  ;;  %v4096_v42 = vld [vmem:[%s4728_s18 + $0x18] sm:$0xff]   ;;  %s5194_s18 = scalar_lea.vmem [#allocation5], %s5190_s7 }
 0xcb5   : > { %v2964_v52 = vpop.f32.mrf.mxu1  ;;  %3948 = vmatpush3.bf16.msra.mxu1 %v4096_v42  ;;  %v3700_v36 = vld [vmem:[%s5194_s18] ss:$0 sm:$0xff] }
 0xcb6   : > { %v2970_v53 = vsel %vm1511_vm2, %v2967_v51, 0.0  ;;  %3949 = vmatprep.subr.bf16.mxu1 %v4327_v2 }
 0xcb7   : > { %2971 = vadd.xlane.f32.xlu0 %v2970_v53  ;;  %v3938_v54 = vpop.f32.mrf.mxu1 }
 0xcb9   : > { %3950 = vmatpush3.bf16.msra.mxu1 %v4097_v62 }
 0xcba   : > { %3951 = vmatprep.subr.bf16.mxu1 %v4327_v2 }
 0xcbd   : > { %3952 = vmatpush3.bf16.msra.mxu1 %v4098_v11 }
 0xcbe   : > { %3953 = vmatprep.subr.bf16.mxu1 %v4327_v2 }
 0xcc1   : > { %3954 = vmatpush3.bf16.msra.mxu1 %v4099_v12 }
 0xd40   : > { %v2972_v55 = vpop.xlane.xlu0 %2971 }
 0xd41   : > { %v2973_v56 = vmul.f32 0.03125, %v2972_v55 }
 0xd43   : > { %v2974_v57 = vsub.f32 %v2967_v51, %v2973_v56 }
 0xd45   : > { %v2975_v58 = vmul.f32 %v2974_v57, %v2974_v57 }
 0xd47   : > { %v2976_v59 = vsel %vm1511_vm2, %v2975_v58, 0.0 }
 0xd48   : > { %2977 = vadd.xlane.f32.xlu1 %v2976_v59 }
 0xdd1   : > { %v2978_v63 = vpop.xlane.xlu1 %2977 }
 0xdd2   : > { %v2979_v0 = vmul.f32 0.03125, %v2978_v63 }
 0xdd4   : > { %v2980_v1 = vadd.f32 1e-05, %v2979_v0 }
 0xdd6   : > { %4134 = vrsqrt.f32 %v2980_v1 }
 0xde3   : > { %v4135_v3 = vpop.eup %4134 }
 0xde4   : > { %v2982_v5 = vmul.f32 %v4135_v3, %v2974_v57 }
 0xde6   : > { %v2989_v8 = vmul.f32 %v3688_v4, %v2982_v5 }
 0xde8   : > { %v2996_v9 = vadd.f32 %v3689_v7, %v2989_v8 }
 0xdea   : > { %v2997_v10 = vpack.c.bf16 %v2996_v9, %v2996_v9 }
 0xdec   : > { %3944 = vmatmul.mubr.msk.bf16.vlgmr.msra.gmra.mxu0 %vm1511_vm2, %v2997_v10 }
 0xeac   : > { %v3058_v14 = vpop.f32.mrf.mxu0 }
 0xead   : > { %v3059_v15 = vadd.f32 %v3690_v13, %v3058_v14 }
 0xeae   : > { %v3945_v16 = vpop.f32.mrf.mxu0 }
 0xeaf   : > { %v3064_v17 = vmax.f32 %v3059_v15, 0.0 }
 0xeb0   : > { %v3061_v18 = vpop.f32.mrf.mxu0 }
 0xeb1   : > { %v3065_v19 = vpack.c.bf16 %v3064_v17, %v3064_v17 }
 0xeb2   : > { %v3946_v20 = vpop.f32.mrf.mxu0 }
 0xeb3   : > { %3956 = vmatmul.mubr.msk.bf16.vlgmr.msra.gmra.mxu1 %vm3105_vm8, %v3065_v19 }
 0xf73   : > { %v3143_v22 = vpop.f32.mrf.mxu1 }
 0xf74   : > { %v3144_v23 = vadd.f32 %v3694_v21, %v3143_v22 }
 0xf75   : > { %v3957_v24 = vpop.f32.mrf.mxu1 }
 0xf76   : > { %v3149_v25 = vadd.f32 %v3144_v23, %v2996_v9 }
 0xf77   : > { %v3146_v2 = vpop.f32.mrf.mxu1 }
 0xf78   : > { %v3152_v26 = vsel %vm1511_vm2, %v3149_v25, 0.0 }
 0xf79   : > { %3153 = vadd.xlane.f32.xlu0 %v3152_v26  ;;  %v3958_v27 = vpop.f32.mrf.mxu1 }
0x1002   : > { %v3154_v28 = vpop.xlane.xlu0 %3153 }
0x1003   : > { %v3155_v29 = vmul.f32 0.03125, %v3154_v28 }
0x1005   : > { %v3156_v6 = vsub.f32 %v3149_v25, %v3155_v29 }
0x1007   : > { %v3157_v30 = vmul.f32 %v3156_v6, %v3156_v6 }
0x1009   : > { %v3158_v31 = vsel %vm1511_vm2, %v3157_v30, 0.0 }
0x100a   : > { %3159 = vadd.xlane.f32.xlu0 %v3158_v31 }
0x1093   : > { %v3160_v32 = vpop.xlane.xlu0 %3159 }
0x1094   : > { %v3161_v33 = vmul.f32 0.03125, %v3160_v32 }
0x1096   : > { %v3162_v34 = vadd.f32 1e-05, %v3161_v33 }
0x1098   : > { %4136 = vrsqrt.f32 %v3162_v34 }
0x10a5   : > { %v4137_v35 = vpop.eup %4136 }
0x10a6   : > { %v3164_v37 = vmul.f32 %v4137_v35, %v3156_v6 }
0x10a8   : > { %v3171_v39 = vmul.f32 %v3700_v36, %v3164_v37  ;;  %3183 = sbr.rel (%p3702_p8) target bundleno = 4270 (0x10ae), region = 160 }
0x10aa   : > { %v3178_v40 = vadd.f32 %v3701_v38, %v3171_v39 }
0x10ac   : > { %3179 = vst.msk [vmem:[#allocation2] sm:$0xff] %vm1511_vm2, %v3178_v40 }
0x10ad   : > { %3184 = vst.msk [vmem:[%s1463_s3] sm:$0xff] %vm1511_vm2, %v3178_v40 }
0x10ae PF: > { %s5197_s28 = sld [smem:[#allocation46_spill]] }
0x10af   : > { %s5198_s15 = sld [smem:[#allocation41_spill]] }
0x10b0   : > { %s5199_s16 = sld [smem:[#allocation42_spill]] }
0x10b1   : > { %s5200_s18 = sld [smem:[#allocation49_spill]] }
0x10b2   : > { %s5201_s22 = sld [smem:[#allocation44_spill]] }
0x10b3   : > { %s5202_s23 = sld [smem:[#allocation45_spill]] }
0x10b4   : > { %s77_s0 = sadd.s32 1, %s5197_s28   ;;  %s5203_s26 = sld [smem:[#allocation47_spill]] }
0x10b5   : > { %p74_p13 = scmp.ge.s32.totalorder %s77_s0, 6   ;;  %s5204_s28 = sld [smem:[#allocation48_spill]] }
0x10b7   :  { %76 = sbr.rel (!%p74_p13) target bundleno = 81 (0x51), region = 323 }
0x10bc   :  { %3204 = vsyncpa [#allocation4], 1 }
0x10bd   :  { %3206 = vsyncpa [#allocation4 + $0x1], 1 }
0x10be   :  { %3207 = vsyncpa [#allocation6], 1 }
0x10bf   :  { %3209 = vsyncpa [#allocation6 + $0x1], 1 }

</bundles_post_ra>
